<compile_context>
chip_gen: v5e
topology: v5e:2x2
jax: 0.10.0
libtpu: 0.0.40
codegen_flags: <defaults>
</compile_context>

<pallas_src>
import functools
import math

import jax
import jax.numpy as jnp
from jax.experimental import pallas as pl
from jax.experimental.pallas import tpu as pltpu

NEG_INF = -1e30   # Python float literal (NOT a jnp array, so kernels don't capture a constant)
LN_EPS = 1e-5     # nn.Transformer default layer_norm_eps

# Matmul operand dtype. Set to jnp.bfloat16 on v6e/v7x for ~2x MXU throughput and half the
# weight/activation DMA bytes (accumulation stays f32). Keep f32 for exact numerics.
MATMUL_DTYPE = jnp.float32

# Tile targets sized so double-buffered input tiles + f32 accumulator stay well under
# v7x's 64 MiB VMEM (and trivially under v5e/v6e's 128 MiB).
TM, TN, TK = 256, 256, 512


def _pick_tile(dim, target):
    """Largest legal tile: full dim if small or not evenly divisible, else the aligned target."""
    if dim <= target or dim % target != 0:
        return dim
    return target


# ----------------------------- Pallas kernels ------------------------------

def _matmul_bias_kernel(x_ref, w_ref, b_ref, o_ref, acc_ref, *, relu):
    @pl.when(pl.program_id(2) == 0)
    def _():
        acc_ref[...] = jnp.zeros_like(acc_ref)

    acc_ref[...] += jnp.dot(x_ref[...].astype(MATMUL_DTYPE),
                            w_ref[...].astype(MATMUL_DTYPE),
                            preferred_element_type=jnp.float32)

    @pl.when(pl.program_id(2) == pl.num_programs(2) - 1)
    def _():
        y = acc_ref[...] + b_ref[...]
        if relu:
            y = jnp.maximum(y, 0.0)
        o_ref[...] = y.astype(o_ref.dtype)


def linear(x2d, w, b, relu=False):
    """Tiled y = x @ W + b (optional ReLU). x2d: (M,K), w: (K,N), b: (N,)."""
    M, K = x2d.shape
    N = w.shape[1]
    tm, tn, tk = _pick_tile(M, TM), _pick_tile(N, TN), _pick_tile(K, TK)
    return pl.pallas_call(
        functools.partial(_matmul_bias_kernel, relu=relu),
        out_shape=jax.ShapeDtypeStruct((M, N), jnp.float32),
        grid_spec=pltpu.PrefetchScalarGridSpec(
            num_scalar_prefetch=0,
            grid=(M // tm, N // tn, K // tk),
            in_specs=[
                pl.BlockSpec((tm, tk), lambda i, j, k: (i, k)),
                pl.BlockSpec((tk, tn), lambda i, j, k: (k, j)),
                pl.BlockSpec((1, tn), lambda i, j, k: (0, j)),
            ],
            out_specs=pl.BlockSpec((tm, tn), lambda i, j, k: (i, j)),
            scratch_shapes=[pltpu.VMEM((tm, tn), jnp.float32)],
        ),
        compiler_params=pltpu.CompilerParams(
            dimension_semantics=("parallel", "parallel", "arbitrary")),
    )(x2d, w, b.reshape(1, N))


def _proj_res_ln_kernel(x_ref, w_ref, b_ref, r_ref, g_ref, bt_ref, o_ref):
    """Fused: LayerNorm((x @ W + b) + residual)."""
    y = jnp.dot(x_ref[...].astype(MATMUL_DTYPE), w_ref[...].astype(MATMUL_DTYPE),
                preferred_element_type=jnp.float32)
    y = y + b_ref[...] + r_ref[...]
    mu = jnp.mean(y, axis=-1, keepdims=True)
    var = jnp.mean(jnp.square(y - mu), axis=-1, keepdims=True)
    o_ref[...] = ((y - mu) * jax.lax.rsqrt(var + LN_EPS) * g_ref[...]
                  + bt_ref[...]).astype(o_ref.dtype)


def proj_residual_layernorm(x2d, w, b, residual2d, gamma, beta):
    M, K = x2d.shape
    N = w.shape[1]
    tm = _pick_tile(M, TM)
    return pl.pallas_call(
        _proj_res_ln_kernel,
        out_shape=jax.ShapeDtypeStruct((M, N), jnp.float32),
        grid_spec=pltpu.PrefetchScalarGridSpec(
            num_scalar_prefetch=0,
            grid=(M // tm,),
            in_specs=[
                pl.BlockSpec((tm, K), lambda i: (i, 0)),
                pl.BlockSpec((K, N), lambda i: (0, 0)),
                pl.BlockSpec((1, N), lambda i: (0, 0)),
                pl.BlockSpec((tm, N), lambda i: (i, 0)),
                pl.BlockSpec((1, N), lambda i: (0, 0)),
                pl.BlockSpec((1, N), lambda i: (0, 0)),
            ],
            out_specs=pl.BlockSpec((tm, N), lambda i: (i, 0)),
        ),
        compiler_params=pltpu.CompilerParams(dimension_semantics=("parallel",)),
    )(x2d, w, b.reshape(1, N), residual2d, gamma.reshape(1, N), beta.reshape(1, N))


def _ffn_res_ln_kernel(x_ref, w1_ref, b1_ref, w2_ref, b2_ref, g_ref, bt_ref,
                       o_ref, acc_ref):
    """Fused FFN: LayerNorm(x + relu(x@w1 + b1) @ w2 + b2), ff_dim tiled as reduction."""
    f = pl.program_id(1)

    @pl.when(f == 0)
    def _():
        acc_ref[...] = jnp.zeros_like(acc_ref)

    h = jnp.dot(x_ref[...].astype(MATMUL_DTYPE), w1_ref[...].astype(MATMUL_DTYPE),
                preferred_element_type=jnp.float32) + b1_ref[...]
    h = jnp.maximum(h, 0.0)
    acc_ref[...] += jnp.dot(h.astype(MATMUL_DTYPE), w2_ref[...].astype(MATMUL_DTYPE),
                            preferred_element_type=jnp.float32)

    @pl.when(f == pl.num_programs(1) - 1)
    def _():
        y = acc_ref[...] + b2_ref[...] + x_ref[...]
        mu = jnp.mean(y, axis=-1, keepdims=True)
        var = jnp.mean(jnp.square(y - mu), axis=-1, keepdims=True)
        o_ref[...] = ((y - mu) * jax.lax.rsqrt(var + LN_EPS) * g_ref[...]
                      + bt_ref[...]).astype(o_ref.dtype)


def ffn_residual_layernorm(x2d, w1, b1, w2, b2, gamma, beta):
    M, E = x2d.shape
    F = w1.shape[1]
    tm = _pick_tile(M, TM)
    tf = _pick_tile(F, TK)
    return pl.pallas_call(
        _ffn_res_ln_kernel,
        out_shape=jax.ShapeDtypeStruct((M, E), jnp.float32),
        grid_spec=pltpu.PrefetchScalarGridSpec(
            num_scalar_prefetch=0,
            grid=(M // tm, F // tf),
            in_specs=[
                pl.BlockSpec((tm, E), lambda i, f: (i, 0)),
                pl.BlockSpec((E, tf), lambda i, f: (0, f)),
                pl.BlockSpec((1, tf), lambda i, f: (0, f)),
                pl.BlockSpec((tf, E), lambda i, f: (f, 0)),
                pl.BlockSpec((1, E), lambda i, f: (0, 0)),
                pl.BlockSpec((1, E), lambda i, f: (0, 0)),
                pl.BlockSpec((1, E), lambda i, f: (0, 0)),
            ],
            out_specs=pl.BlockSpec((tm, E), lambda i, f: (i, 0)),
            scratch_shapes=[pltpu.VMEM((tm, E), jnp.float32)],
        ),
        compiler_params=pltpu.CompilerParams(
            dimension_semantics=("parallel", "arbitrary")),
    )(x2d, w1, b1.reshape(1, F), w2, b2.reshape(1, E),
      gamma.reshape(1, E), beta.reshape(1, E))


def _ln_kernel(x_ref, g_ref, b_ref, o_ref):
    x = x_ref[...]
    mu = jnp.mean(x, axis=-1, keepdims=True)
    var = jnp.mean(jnp.square(x - mu), axis=-1, keepdims=True)
    o_ref[...] = ((x - mu) * jax.lax.rsqrt(var + LN_EPS) * g_ref[...]
                  + b_ref[...]).astype(o_ref.dtype)


def layernorm(x, gamma, beta):
    B, S, E = x.shape
    M = B * S
    tm = _pick_tile(M, TM)
    out = pl.pallas_call(
        _ln_kernel,
        out_shape=jax.ShapeDtypeStruct((M, E), jnp.float32),
        grid_spec=pltpu.PrefetchScalarGridSpec(
            num_scalar_prefetch=0,
            grid=(M // tm,),
            in_specs=[
                pl.BlockSpec((tm, E), lambda i: (i, 0)),
                pl.BlockSpec((1, E), lambda i: (0, 0)),
                pl.BlockSpec((1, E), lambda i: (0, 0)),
            ],
            out_specs=pl.BlockSpec((tm, E), lambda i: (i, 0)),
        ),
        compiler_params=pltpu.CompilerParams(dimension_semantics=("parallel",)),
    )(x.reshape(M, E), gamma.reshape(1, E), beta.reshape(1, E))
    return out.reshape(B, S, E)


def _attn_kernel(q_ref, k_ref, v_ref, kpm_ref, o_ref, *, scale, causal):
    """All-heads attention for one batch element. Causal mask built in-kernel (no captured consts)."""
    q = q_ref[...].astype(MATMUL_DTYPE)     # (H, Sq, Dh)
    k = k_ref[...].astype(MATMUL_DTYPE)     # (H, Sk, Dh)
    v = v_ref[...].astype(MATMUL_DTYPE)     # (H, Sk, Dh)
    kpm = kpm_ref[...]                      # (1, Sk) additive f32 key-padding mask

    # scores: (H, Sq, Sk), contraction over Dh, batch over heads (no explicit k.T).
    s = jax.lax.dot_general(q, k, dimension_numbers=(((2,), (2,)), ((0,), (0,))),
                            preferred_element_type=jnp.float32)
    s = s * scale + kpm[None, :, :]
    if causal:
        _, sq, sk = s.shape
        row = jax.lax.broadcasted_iota(jnp.int32, (sq, sk), 0)
        col = jax.lax.broadcasted_iota(jnp.int32, (sq, sk), 1)
        s = jnp.where((col <= row)[None, :, :], s, NEG_INF)

    s = s - jnp.max(s, axis=-1, keepdims=True)
    p = jnp.exp(s)
    denom = jnp.sum(p, axis=-1, keepdims=True)       # >= 1 after max-subtraction
    p = p * pl.reciprocal(denom, approx=True)

    o = jax.lax.dot_general(p.astype(MATMUL_DTYPE), v,
                            dimension_numbers=(((2,), (1,)), ((0,), (0,))),
                            preferred_element_type=jnp.float32)   # (H, Sq, Dh)
    o_ref[...] = o.astype(o_ref.dtype)


def scaled_dot_product_attention(q, k, v, key_pad_mask, causal):
    """q: (B,H,Sq,Dh); k,v: (B,H,Sk,Dh); key_pad_mask: (B,1,Sk) additive f32."""
    B, H, Sq, Dh = q.shape
    Sk = k.shape[2]
    scale = 1.0 / math.sqrt(Dh)
    return pl.pallas_call(
        functools.partial(_attn_kernel, scale=scale, causal=causal),
        out_shape=jax.ShapeDtypeStruct((B, H, Sq, Dh), jnp.float32),
        grid_spec=pltpu.PrefetchScalarGridSpec(
            num_scalar_prefetch=0,
            grid=(B,),
            in_specs=[
                pl.BlockSpec((None, H, Sq, Dh), lambda b: (b, 0, 0, 0)),
                pl.BlockSpec((None, H, Sk, Dh), lambda b: (b, 0, 0, 0)),
                pl.BlockSpec((None, H, Sk, Dh), lambda b: (b, 0, 0, 0)),
                pl.BlockSpec((None, 1, Sk), lambda b: (b, 0, 0)),
            ],
            out_specs=pl.BlockSpec((None, H, Sq, Dh), lambda b: (b, 0, 0, 0)),
        ),
        compiler_params=pltpu.CompilerParams(dimension_semantics=("parallel",)),
    )(q, k, v, key_pad_mask)


# --------------------------- Transformer modules ---------------------------

def attention_block(x_q, x_kv, p, num_heads, key_pad_mask, causal, self_attn,
                    ln_g, ln_b):
    """MHA (fused QKV/KV projections) + fused out-proj + residual + LayerNorm."""
    B, Sq, E = x_q.shape
    Sk = x_kv.shape[1]
    Dh = E // num_heads

    if self_attn:
        qkv = linear(x_q.reshape(B * Sq, E), p["w_qkv"], p["b_qkv"])   # (B*Sq, 3E)
        qkv = qkv.reshape(B, Sq, 3, num_heads, Dh)
        q, k, v = qkv[:, :, 0], qkv[:, :, 1], qkv[:, :, 2]
    else:
        q = linear(x_q.reshape(B * Sq, E), p["w_q"], p["b_q"]).reshape(B, Sq, num_heads, Dh)
        kv = linear(x_kv.reshape(B * Sk, E), p["w_kv"], p["b_kv"]).reshape(B, Sk, 2, num_heads, Dh)
        k, v = kv[:, :, 0], kv[:, :, 1]

    q = q.transpose(0, 2, 1, 3)   # (B, H, Sq, Dh)
    k = k.transpose(0, 2, 1, 3)
    v = v.transpose(0, 2, 1, 3)

    o = scaled_dot_product_attention(q, k, v, key_pad_mask, causal)    # (B, H, Sq, Dh)
    o2d = o.transpose(0, 2, 1, 3).reshape(B * Sq, E)

    y = proj_residual_layernorm(o2d, p["w_o"], p["b_o"],
                                x_q.reshape(B * Sq, E), ln_g, ln_b)
    return y.reshape(B, Sq, E)


def encoder_layer(x, p, src_kpm, num_heads):
    x = attention_block(x, x, p["self_attn"], num_heads, src_kpm, causal=False,
                        self_attn=True, ln_g=p["ln1_g"], ln_b=p["ln1_b"])
    B, S, E = x.shape
    f = p["ffn"]
    y = ffn_residual_layernorm(x.reshape(B * S, E), f["w1"], f["b1"], f["w2"], f["b2"],
                               p["ln2_g"], p["ln2_b"])
    return y.reshape(B, S, E)


def decoder_layer(x, memory, p, tgt_kpm, mem_kpm, num_heads):
    x = attention_block(x, x, p["self_attn"], num_heads, tgt_kpm, causal=True,
                        self_attn=True, ln_g=p["ln1_g"], ln_b=p["ln1_b"])
    x = attention_block(x, memory, p["cross_attn"], num_heads, mem_kpm, causal=False,
                        self_attn=False, ln_g=p["ln2_g"], ln_b=p["ln2_b"])
    B, S, E = x.shape
    f = p["ffn"]
    y = ffn_residual_layernorm(x.reshape(B * S, E), f["w1"], f["b1"], f["w2"], f["b2"],
                               p["ln3_g"], p["ln3_b"])
    return y.reshape(B, S, E)


def sinusoidal_positional_embedding(batch, length, embed_dim):
    # Reproduces SinousPositionalEmbedding exactly (including 10000 ** (+i/size)).
    fractions = 10000.0 ** (jnp.arange(0, embed_dim, 2, dtype=jnp.float32) / embed_dim)
    angles = fractions[None, :] * jnp.arange(length, dtype=jnp.float32)[:, None]
    out = jnp.zeros((length, embed_dim), jnp.float32)
    out = out.at[:, 0::2].set(jnp.sin(angles))
    out = out.at[:, 1::2].set(jnp.cos(angles))
    return jnp.broadcast_to(out[None], (batch, length, embed_dim))


def transformer_forward(params, src, tgt, *, src_pad_index, tgt_pad_index, num_heads):
    E = params["src_embedding"].shape[1]
    B, Ss = src.shape
    _, St = tgt.shape

    # Embedding * sqrt(d_model) + positional embedding
    src_emb = jnp.take(params["src_embedding"], src, axis=0) * (E ** 0.5)
    src_emb = src_emb + sinusoidal_positional_embedding(B, Ss, E)
    tgt_emb = jnp.take(params["tgt_embedding"], tgt, axis=0) * (E ** 0.5)
    tgt_emb = tgt_emb + sinusoidal_positional_embedding(B, St, E)

    # Thin additive key-padding masks only: (B, 1, S). Causal term is built inside the kernel.
    src_kpm = jnp.where(src == src_pad_index, NEG_INF, 0.0).astype(jnp.float32)[:, None, :]
    tgt_kpm = jnp.where(tgt == tgt_pad_index, NEG_INF, 0.0).astype(jnp.float32)[:, None, :]

    # Encoder stack + final encoder LayerNorm (nn.Transformer default)
    x = src_emb
    for lp in params["enc_layers"]:
        x = encoder_layer(x, lp, src_kpm, num_heads)
    memory = layernorm(x, params["enc_norm_g"], params["enc_norm_b"])

    # Decoder stack + final decoder LayerNorm
    y = tgt_emb
    for lp in params["dec_layers"]:
        y = decoder_layer(y, memory, lp, tgt_kpm, src_kpm, num_heads)
    y = layernorm(y, params["dec_norm_g"], params["dec_norm_b"])

    # Output projection to target vocabulary logits
    logits = linear(y.reshape(B * St, E), params["out_w"], params["out_b"])
    return logits.reshape(B, St, -1)


# ------------------------------ Param init ---------------------------------

def init_params(key, src_vocab, tgt_vocab, E, ff_dim, num_layers):
    keys = iter(jax.random.split(key, 4096))

    def w(shape, scale=0.05):
        return jax.random.normal(next(keys), shape, jnp.float32) * scale

    def self_attn_params():
        # Fused QKV weight matches nn.MultiheadAttention's in_proj layout ([q|k|v] on the out axis).
        return dict(w_qkv=w((E, 3 * E)), b_qkv=w((3 * E,)), w_o=w((E, E)), b_o=w((E,)))

    def cross_attn_params():
        return dict(w_q=w((E, E)), b_q=w((E,)),
                    w_kv=w((E, 2 * E)), b_kv=w((2 * E,)),
                    w_o=w((E, E)), b_o=w((E,)))

    def ffn_params():
        return dict(w1=w((E, ff_dim)), b1=w((ff_dim,)),
                    w2=w((ff_dim, E)), b2=w((E,)))

    def ln():
        return jnp.ones((E,), jnp.float32), jnp.zeros((E,), jnp.float32)

    enc_layers = []
    for _ in range(num_layers):
        g1, b1 = ln(); g2, b2 = ln()
        enc_layers.append(dict(self_attn=self_attn_params(), ffn=ffn_params(),
                               ln1_g=g1, ln1_b=b1, ln2_g=g2, ln2_b=b2))
    dec_layers = []
    for _ in range(num_layers):
        g1, b1 = ln(); g2, b2 = ln(); g3, b3 = ln()
        dec_layers.append(dict(self_attn=self_attn_params(), cross_attn=cross_attn_params(),
                               ffn=ffn_params(),
                               ln1_g=g1, ln1_b=b1, ln2_g=g2, ln2_b=b2,
                               ln3_g=g3, ln3_b=b3))
    eng, enb = ln(); dng, dnb = ln()
    return dict(
        src_embedding=w((src_vocab, E), 1.0),
        tgt_embedding=w((tgt_vocab, E), 1.0),
        enc_layers=enc_layers,
        dec_layers=dec_layers,
        enc_norm_g=eng, enc_norm_b=enb,
        dec_norm_g=dng, dec_norm_b=dnb,
        out_w=w((E, tgt_vocab)), out_b=w((tgt_vocab,)),
    )


# --------------------------------- Main -------------------------------------

if __name__ == "__main__":
    SRC_VOCAB, TGT_VOCAB = 50, 60
    EMBED_DIM, HIDDEN_DIM, NUM_HEADS, NUM_LAYERS = 32, 64, 4, 2
    SRC_PAD, TGT_PAD = 0, 0
    B, S_SRC, S_TGT = 2, 10, 8

    key = jax.random.PRNGKey(0)
    pkey, skey, tkey = jax.random.split(key, 3)

    params = init_params(pkey, SRC_VOCAB, TGT_VOCAB, EMBED_DIM, HIDDEN_DIM, NUM_LAYERS)

    # Token ids (>=1 so rows are never fully masked); last position is padding.
    src = jax.random.randint(skey, (B, S_SRC), 1, SRC_VOCAB, dtype=jnp.int32)
    tgt = jax.random.randint(tkey, (B, S_TGT), 1, TGT_VOCAB, dtype=jnp.int32)
    src = src.at[:, -1].set(SRC_PAD)
    tgt = tgt.at[:, -1].set(TGT_PAD)

    fwd = jax.jit(functools.partial(
        transformer_forward,
        src_pad_index=SRC_PAD, tgt_pad_index=TGT_PAD, num_heads=NUM_HEADS))

    logits = fwd(params, src, tgt)
    jax.block_until_ready(logits)

    assert logits.shape == (B, S_TGT, TGT_VOCAB), logits.shape
    assert bool(jnp.all(jnp.isfinite(logits)))
    print("KERNEL_OK")
</pallas_src>

<mosaic_0001>
module attributes {stable_mosaic.version = 11 : i64} {
  func.func @_matmul_bias_kernel(%arg0: i32, %arg1: i32, %arg2: i32, %arg3: memref<20x32xf32, #tpu.memory_space<vmem>>, %arg4: memref<32x96xf32, #tpu.memory_space<vmem>>, %arg5: memref<1x96xf32, #tpu.memory_space<vmem>>, %arg6: memref<20x96xf32, #tpu.memory_space<vmem>>, %arg7: memref<20x96xf32, #tpu.memory_space<vmem>>) attributes {dimension_semantics = [#tpu.dimension_semantics<parallel>, #tpu.dimension_semantics<parallel>, #tpu.dimension_semantics<arbitrary>], iteration_bounds = array<i64: 1, 1, 1>, scalar_prefetch = 0 : i64, scratch_operands = 1 : i64, tpu.core_type = #tpu.core_type<tc>, window_params = [{transform_indices = @transform_0, window_bounds = array<i64: 20, 32>}, {transform_indices = @transform_1, window_bounds = array<i64: 32, 96>}, {transform_indices = @transform_2, window_bounds = array<i64: 1, 96>}, {transform_indices = @transform_3, window_bounds = array<i64: 20, 96>}]} {
    %c0_i32 = arith.constant 0 : i32
    %0 = arith.cmpi eq, %arg2, %c0_i32 : i32
    %1 = arith.extui %0 : i1 to i32
    %c0_i32_0 = arith.constant 0 : i32
    %2 = arith.cmpi ne, %1, %c0_i32_0 : i32
    scf.if %2 {
      %cst_10 = arith.constant 0.000000e+00 : f32
      %12 = vector.broadcast %cst_10 : f32 to vector<20x96xf32>
      %c0_11 = arith.constant 0 : index
      %c0_12 = arith.constant 0 : index
      %13 = vector.load %arg7[%c0_11, %c0_12] : memref<20x96xf32, #tpu.memory_space<vmem>>, vector<20x96xf32>
      tpu.vector_store %arg7[%c0_11, %c0_12], %12 {strides = array<i32>} : memref<20x96xf32, #tpu.memory_space<vmem>>, vector<20x96xf32>,
    } else {
    }
    %c0 = arith.constant 0 : index
    %c0_1 = arith.constant 0 : index
    %3 = vector.load %arg7[%c0, %c0_1] : memref<20x96xf32, #tpu.memory_space<vmem>>, vector<20x96xf32>
    %c0_2 = arith.constant 0 : index
    %c0_3 = arith.constant 0 : index
    %4 = vector.load %arg3[%c0_2, %c0_3] : memref<20x32xf32, #tpu.memory_space<vmem>>, vector<20x32xf32>
    %c0_4 = arith.constant 0 : index
    %c0_5 = arith.constant 0 : index
    %5 = vector.load %arg4[%c0_4, %c0_5] : memref<32x96xf32, #tpu.memory_space<vmem>>, vector<32x96xf32>
    %cst = arith.constant dense<0.000000e+00> : vector<20x96xf32>
    %6 = tpu.matmul %4, %5, %cst {dimension_numbers = #tpu.dot_dimension_numbers<[1], [0], [0], [1], [0, 0, 1, 1], [], []>} : vector<20x32xf32>, vector<32x96xf32>, vector<20x96xf32> -> vector<20x96xf32>
    %7 = arith.addf %3, %6 : vector<20x96xf32>
    %c0_6 = arith.constant 0 : index
    %c0_7 = arith.constant 0 : index
    %8 = vector.load %arg7[%c0_6, %c0_7] : memref<20x96xf32, #tpu.memory_space<vmem>>, vector<20x96xf32>
    tpu.vector_store %arg7[%c0_6, %c0_7], %7 {strides = array<i32>} : memref<20x96xf32, #tpu.memory_space<vmem>>, vector<20x96xf32>,
    %c0_i32_8 = arith.constant 0 : i32
    %9 = arith.cmpi eq, %arg2, %c0_i32_8 : i32
    %10 = arith.extui %9 : i1 to i32
    %c0_i32_9 = arith.constant 0 : i32
    %11 = arith.cmpi ne, %10, %c0_i32_9 : i32
    scf.if %11 {
      %c0_10 = arith.constant 0 : index
      %c0_11 = arith.constant 0 : index
      %12 = vector.load %arg7[%c0_10, %c0_11] : memref<20x96xf32, #tpu.memory_space<vmem>>, vector<20x96xf32>
      %c0_12 = arith.constant 0 : index
      %c0_13 = arith.constant 0 : index
      %13 = vector.load %arg5[%c0_12, %c0_13] : memref<1x96xf32, #tpu.memory_space<vmem>>, vector<1x96xf32>
      %14 = vector.broadcast %13 : vector<1x96xf32> to vector<20x96xf32>
      %15 = arith.addf %12, %14 : vector<20x96xf32>
      %c0_14 = arith.constant 0 : index
      %c0_15 = arith.constant 0 : index
      %16 = vector.load %arg6[%c0_14, %c0_15] : memref<20x96xf32, #tpu.memory_space<vmem>>, vector<20x96xf32>
      tpu.vector_store %arg6[%c0_14, %c0_15], %15 {strides = array<i32>} : memref<20x96xf32, #tpu.memory_space<vmem>>, vector<20x96xf32>,
    } else {
    }
    return
  }
  func.func @transform_0(%arg0: i32, %arg1: i32, %arg2: i32) -> (i32, i32) {
    %c0_i32 = arith.constant 0 : i32
    return %arg0, %arg2 : i32, i32
  }
  func.func @transform_1(%arg0: i32, %arg1: i32, %arg2: i32) -> (i32, i32) {
    %c0_i32 = arith.constant 0 : i32
    return %arg2, %arg1 : i32, i32
  }
  func.func @transform_2(%arg0: i32, %arg1: i32, %arg2: i32) -> (i32, i32) {
    %c0_i32 = arith.constant 0 : i32
    %c0_i32_0 = arith.constant 0 : i32
    return %c0_i32, %arg1 : i32, i32
  }
  func.func @transform_3(%arg0: i32, %arg1: i32, %arg2: i32) -> (i32, i32) {
    %c0_i32 = arith.constant 0 : i32
    return %arg0, %arg1 : i32, i32
  }
}

module attributes {stable_mosaic.version = 11 : i64} {
  func.func @_attn_kernel(%arg0: i32, %arg1: memref<1x4x10x8xf32, #tpu.memory_space<vmem>>, %arg2: memref<1x4x10x8xf32, #tpu.memory_space<vmem>>, %arg3: memref<1x4x10x8xf32, #tpu.memory_space<vmem>>, %arg4: memref<1x1x10xf32, #tpu.memory_space<vmem>>, %arg5: memref<1x4x10x8xf32, #tpu.memory_space<vmem>>) attributes {dimension_semantics = [#tpu.dimension_semantics<parallel>], iteration_bounds = array<i64: 2>, scalar_prefetch = 0 : i64, scratch_operands = 0 : i64, tpu.core_type = #tpu.core_type<tc>, window_params = [{transform_indices = @transform_0, window_bounds = array<i64: 1, 4, 10, 8>}, {transform_indices = @transform_1, window_bounds = array<i64: 1, 4, 10, 8>}, {transform_indices = @transform_2, window_bounds = array<i64: 1, 4, 10, 8>}, {transform_indices = @transform_3, window_bounds = array<i64: 1, 1, 10>}, {transform_indices = @transform_4, window_bounds = array<i64: 1, 4, 10, 8>}]} {
    %c0 = arith.constant 0 : index
    %c0_0 = arith.constant 0 : index
    %c0_1 = arith.constant 0 : index
    %c0_2 = arith.constant 0 : index
    %0 = vector.load %arg1[%c0, %c0_0, %c0_1, %c0_2] : memref<1x4x10x8xf32, #tpu.memory_space<vmem>>, vector<1x4x10x8xf32>
    %1 = vector.shape_cast %0 : vector<1x4x10x8xf32> to vector<4x10x8xf32>
    %c0_3 = arith.constant 0 : index
    %c0_4 = arith.constant 0 : index
    %c0_5 = arith.constant 0 : index
    %c0_6 = arith.constant 0 : index
    %2 = vector.load %arg2[%c0_3, %c0_4, %c0_5, %c0_6] : memref<1x4x10x8xf32, #tpu.memory_space<vmem>>, vector<1x4x10x8xf32>
    %3 = vector.shape_cast %2 : vector<1x4x10x8xf32> to vector<4x10x8xf32>
    %c0_7 = arith.constant 0 : index
    %c0_8 = arith.constant 0 : index
    %c0_9 = arith.constant 0 : index
    %c0_10 = arith.constant 0 : index
    %4 = vector.load %arg3[%c0_7, %c0_8, %c0_9, %c0_10] : memref<1x4x10x8xf32, #tpu.memory_space<vmem>>, vector<1x4x10x8xf32>
    %5 = vector.shape_cast %4 : vector<1x4x10x8xf32> to vector<4x10x8xf32>
    %c0_11 = arith.constant 0 : index
    %c0_12 = arith.constant 0 : index
    %c0_13 = arith.constant 0 : index
    %6 = vector.load %arg4[%c0_11, %c0_12, %c0_13] : memref<1x1x10xf32, #tpu.memory_space<vmem>>, vector<1x1x10xf32>
    %7 = vector.shape_cast %6 : vector<1x1x10xf32> to vector<1x10xf32>
    %cst = arith.constant dense<0.000000e+00> : vector<4x10x10xf32>
    %8 = tpu.matmul %1, %3, %cst {dimension_numbers = #tpu.dot_dimension_numbers<[2], [2], [1], [1], [0, 0, 0, 1, 1, 1], [0], [0]>} : vector<4x10x8xf32>, vector<4x10x8xf32>, vector<4x10x10xf32> -> vector<4x10x10xf32>
    %cst_14 = arith.constant 0.353553385 : f32
    %9 = vector.broadcast %cst_14 : f32 to vector<4x10x10xf32>
    %10 = arith.mulf %8, %9 : vector<4x10x10xf32>
    %11 = vector.shape_cast %7 : vector<1x10xf32> to vector<1x1x10xf32>
    %12 = vector.broadcast %11 : vector<1x1x10xf32> to vector<4x10x10xf32>
    %13 = arith.addf %10, %12 : vector<4x10x10xf32>
    %cst_15 = arith.constant dense<0xFF800000> : vector<4x10xf32>
    %14 = vector.multi_reduction <maximumf>, %13, %cst_15 [2] : vector<4x10x10xf32> to vector<4x10xf32>
    %15 = vector.shape_cast %14 : vector<4x10xf32> to vector<4x10x1xf32>
    %16 = vector.broadcast %15 : vector<4x10x1xf32> to vector<4x10x10xf32>
    %17 = arith.subf %13, %16 : vector<4x10x10xf32>
    %18 = math.exp %17 : vector<4x10x10xf32>
    %cst_16 = arith.constant dense<0.000000e+00> : vector<4x10xf32>
    %19 = vector.multi_reduction <add>, %18, %cst_16 [2] : vector<4x10x10xf32> to vector<4x10xf32>
    %20 = vector.shape_cast %19 : vector<4x10xf32> to vector<4x10x1xf32>
    %21 = tpu.reciprocal %20 {approx = true} : vector<4x10x1xf32> -> vector<4x10x1xf32>
    %22 = vector.broadcast %21 : vector<4x10x1xf32> to vector<4x10x10xf32>
    %23 = arith.mulf %18, %22 : vector<4x10x10xf32>
    %cst_17 = arith.constant dense<0.000000e+00> : vector<4x10x8xf32>
    %24 = tpu.matmul %23, %5, %cst_17 {dimension_numbers = #tpu.dot_dimension_numbers<[2], [1], [1], [2], [0, 0, 0, 1, 1, 2], [0], [0]>} : vector<4x10x10xf32>, vector<4x10x8xf32>, vector<4x10x8xf32> -> vector<4x10x8xf32>
    %c0_18 = arith.constant 0 : index
    %c0_19 = arith.constant 0 : index
    %c0_20 = arith.constant 0 : index
    %c0_21 = arith.constant 0 : index
    %25 = vector.load %arg5[%c0_18, %c0_19, %c0_20, %c0_21] : memref<1x4x10x8xf32, #tpu.memory_space<vmem>>, vector<1x4x10x8xf32>
    %26 = vector.shape_cast %25 : vector<1x4x10x8xf32> to vector<4x10x8xf32>
    %27 = vector.shape_cast %24 : vector<4x10x8xf32> to vector<1x4x10x8xf32>
    tpu.vector_store %arg5[%c0_18, %c0_19, %c0_20, %c0_21], %27 {strides = array<i32>} : memref<1x4x10x8xf32, #tpu.memory_space<vmem>>, vector<1x4x10x8xf32>,
    return
  }
  func.func @transform_0(%arg0: i32) -> (i32, i32, i32, i32) {
    %c0_i32 = arith.constant 0 : i32
    %c0_i32_0 = arith.constant 0 : i32
    %c0_i32_1 = arith.constant 0 : i32
    %c0_i32_2 = arith.constant 0 : i32
    return %arg0, %c0_i32, %c0_i32_0, %c0_i32_1 : i32, i32, i32, i32
  }
  func.func @transform_1(%arg0: i32) -> (i32, i32, i32, i32) {
    %c0_i32 = arith.constant 0 : i32
    %c0_i32_0 = arith.constant 0 : i32
    %c0_i32_1 = arith.constant 0 : i32
    %c0_i32_2 = arith.constant 0 : i32
    return %arg0, %c0_i32, %c0_i32_0, %c0_i32_1 : i32, i32, i32, i32
  }
  func.func @transform_2(%arg0: i32) -> (i32, i32, i32, i32) {
    %c0_i32 = arith.constant 0 : i32
    %c0_i32_0 = arith.constant 0 : i32
    %c0_i32_1 = arith.constant 0 : i32
    %c0_i32_2 = arith.constant 0 : i32
    return %arg0, %c0_i32, %c0_i32_0, %c0_i32_1 : i32, i32, i32, i32
  }
  func.func @transform_3(%arg0: i32) -> (i32, i32, i32) {
    %c0_i32 = arith.constant 0 : i32
    %c0_i32_0 = arith.constant 0 : i32
    %c0_i32_1 = arith.constant 0 : i32
    return %arg0, %c0_i32, %c0_i32_0 : i32, i32, i32
  }
  func.func @transform_4(%arg0: i32) -> (i32, i32, i32, i32) {
    %c0_i32 = arith.constant 0 : i32
    %c0_i32_0 = arith.constant 0 : i32
    %c0_i32_1 = arith.constant 0 : i32
    %c0_i32_2 = arith.constant 0 : i32
    return %arg0, %c0_i32, %c0_i32_0, %c0_i32_1 : i32, i32, i32, i32
  }
}

module attributes {stable_mosaic.version = 11 : i64} {
  func.func @_proj_res_ln_kernel(%arg0: i32, %arg1: memref<20x32xf32, #tpu.memory_space<vmem>>, %arg2: memref<32x32xf32, #tpu.memory_space<vmem>>, %arg3: memref<1x32xf32, #tpu.memory_space<vmem>>, %arg4: memref<20x32xf32, #tpu.memory_space<vmem>>, %arg5: memref<1x32xf32, #tpu.memory_space<vmem>>, %arg6: memref<1x32xf32, #tpu.memory_space<vmem>>, %arg7: memref<20x32xf32, #tpu.memory_space<vmem>>) attributes {dimension_semantics = [#tpu.dimension_semantics<parallel>], iteration_bounds = array<i64: 1>, scalar_prefetch = 0 : i64, scratch_operands = 0 : i64, tpu.core_type = #tpu.core_type<tc>, window_params = [{transform_indices = @transform_0, window_bounds = array<i64: 20, 32>}, {pipeline_mode = #tpu.pipeline_mode<synchronous>, transform_indices = @transform_1, window_bounds = array<i64: 32, 32>}, {pipeline_mode = #tpu.pipeline_mode<synchronous>, transform_indices = @transform_2, window_bounds = array<i64: 1, 32>}, {transform_indices = @transform_3, window_bounds = array<i64: 20, 32>}, {pipeline_mode = #tpu.pipeline_mode<synchronous>, transform_indices = @transform_4, window_bounds = array<i64: 1, 32>}, {pipeline_mode = #tpu.pipeline_mode<synchronous>, transform_indices = @transform_5, window_bounds = array<i64: 1, 32>}, {transform_indices = @transform_6, window_bounds = array<i64: 20, 32>}]} {
    %c0 = arith.constant 0 : index
    %c0_0 = arith.constant 0 : index
    %0 = vector.load %arg1[%c0, %c0_0] : memref<20x32xf32, #tpu.memory_space<vmem>>, vector<20x32xf32>
    %c0_1 = arith.constant 0 : index
    %c0_2 = arith.constant 0 : index
    %1 = vector.load %arg2[%c0_1, %c0_2] : memref<32x32xf32, #tpu.memory_space<vmem>>, vector<32x32xf32>
    %cst = arith.constant dense<0.000000e+00> : vector<20x32xf32>
    %2 = tpu.matmul %0, %1, %cst {dimension_numbers = #tpu.dot_dimension_numbers<[1], [0], [0], [1], [0, 0, 1, 1], [], []>} : vector<20x32xf32>, vector<32x32xf32>, vector<20x32xf32> -> vector<20x32xf32>
    %c0_3 = arith.constant 0 : index
    %c0_4 = arith.constant 0 : index
    %3 = vector.load %arg3[%c0_3, %c0_4] : memref<1x32xf32, #tpu.memory_space<vmem>>, vector<1x32xf32>
    %4 = vector.broadcast %3 : vector<1x32xf32> to vector<20x32xf32>
    %5 = arith.addf %2, %4 : vector<20x32xf32>
    %c0_5 = arith.constant 0 : index
    %c0_6 = arith.constant 0 : index
    %6 = vector.load %arg4[%c0_5, %c0_6] : memref<20x32xf32, #tpu.memory_space<vmem>>, vector<20x32xf32>
    %7 = arith.addf %5, %6 : vector<20x32xf32>
    %cst_7 = arith.constant dense<0.000000e+00> : vector<20xf32>
    %8 = vector.multi_reduction <add>, %7, %cst_7 [1] : vector<20x32xf32> to vector<20xf32>
    %9 = vector.shape_cast %8 : vector<20xf32> to vector<20x1xf32>
    %cst_8 = arith.constant 3.200000e+01 : f32
    %10 = vector.broadcast %cst_8 : f32 to vector<20x1xf32>
    %11 = arith.divf %9, %10 : vector<20x1xf32>
    %12 = vector.broadcast %11 : vector<20x1xf32> to vector<20x32xf32>
    %13 = arith.subf %7, %12 : vector<20x32xf32>
    %14 = arith.mulf %13, %13 : vector<20x32xf32>
    %cst_9 = arith.constant dense<0.000000e+00> : vector<20xf32>
    %15 = vector.multi_reduction <add>, %14, %cst_9 [1] : vector<20x32xf32> to vector<20xf32>
    %16 = vector.shape_cast %15 : vector<20xf32> to vector<20x1xf32>
    %cst_10 = arith.constant 3.200000e+01 : f32
    %17 = vector.broadcast %cst_10 : f32 to vector<20x1xf32>
    %18 = arith.divf %16, %17 : vector<20x1xf32>
    %19 = vector.broadcast %11 : vector<20x1xf32> to vector<20x32xf32>
    %20 = arith.subf %7, %19 : vector<20x32xf32>
    %cst_11 = arith.constant 9.99999974E-6 : f32
    %21 = vector.broadcast %cst_11 : f32 to vector<20x1xf32>
    %22 = arith.addf %18, %21 : vector<20x1xf32>
    %23 = math.rsqrt %22 : vector<20x1xf32>
    %24 = vector.broadcast %23 : vector<20x1xf32> to vector<20x32xf32>
    %25 = arith.mulf %20, %24 : vector<20x32xf32>
    %c0_12 = arith.constant 0 : index
    %c0_13 = arith.constant 0 : index
    %26 = vector.load %arg5[%c0_12, %c0_13] : memref<1x32xf32, #tpu.memory_space<vmem>>, vector<1x32xf32>
    %27 = vector.broadcast %26 : vector<1x32xf32> to vector<20x32xf32>
    %28 = arith.mulf %25, %27 : vector<20x32xf32>
    %c0_14 = arith.constant 0 : index
    %c0_15 = arith.constant 0 : index
    %29 = vector.load %arg6[%c0_14, %c0_15] : memref<1x32xf32, #tpu.memory_space<vmem>>, vector<1x32xf32>
    %30 = vector.broadcast %29 : vector<1x32xf32> to vector<20x32xf32>
    %31 = arith.addf %28, %30 : vector<20x32xf32>
    %c0_16 = arith.constant 0 : index
    %c0_17 = arith.constant 0 : index
    %32 = vector.load %arg7[%c0_16, %c0_17] : memref<20x32xf32, #tpu.memory_space<vmem>>, vector<20x32xf32>
    tpu.vector_store %arg7[%c0_16, %c0_17], %31 {strides = array<i32>} : memref<20x32xf32, #tpu.memory_space<vmem>>, vector<20x32xf32>,
    return
  }
  func.func @transform_0(%arg0: i32) -> (i32, i32) {
    %c0_i32 = arith.constant 0 : i32
    %c0_i32_0 = arith.constant 0 : i32
    return %arg0, %c0_i32 : i32, i32
  }
  func.func @transform_1(%arg0: i32) -> (i32, i32) {
    %c0_i32 = arith.constant 0 : i32
    %c0_i32_0 = arith.constant 0 : i32
    %c0_i32_1 = arith.constant 0 : i32
    return %c0_i32, %c0_i32_0 : i32, i32
  }
  func.func @transform_2(%arg0: i32) -> (i32, i32) {
    %c0_i32 = arith.constant 0 : i32
    %c0_i32_0 = arith.constant 0 : i32
    %c0_i32_1 = arith.constant 0 : i32
    return %c0_i32, %c0_i32_0 : i32, i32
  }
  func.func @transform_3(%arg0: i32) -> (i32, i32) {
    %c0_i32 = arith.constant 0 : i32
    %c0_i32_0 = arith.constant 0 : i32
    return %arg0, %c0_i32 : i32, i32
  }
  func.func @transform_4(%arg0: i32) -> (i32, i32) {
    %c0_i32 = arith.constant 0 : i32
    %c0_i32_0 = arith.constant 0 : i32
    %c0_i32_1 = arith.constant 0 : i32
    return %c0_i32, %c0_i32_0 : i32, i32
  }
  func.func @transform_5(%arg0: i32) -> (i32, i32) {
    %c0_i32 = arith.constant 0 : i32
    %c0_i32_0 = arith.constant 0 : i32
    %c0_i32_1 = arith.constant 0 : i32
    return %c0_i32, %c0_i32_0 : i32, i32
  }
  func.func @transform_6(%arg0: i32) -> (i32, i32) {
    %c0_i32 = arith.constant 0 : i32
    %c0_i32_0 = arith.constant 0 : i32
    return %arg0, %c0_i32 : i32, i32
  }
}

module attributes {stable_mosaic.version = 11 : i64} {
  func.func @_ffn_res_ln_kernel(%arg0: i32, %arg1: i32, %arg2: memref<20x32xf32, #tpu.memory_space<vmem>>, %arg3: memref<32x64xf32, #tpu.memory_space<vmem>>, %arg4: memref<1x64xf32, #tpu.memory_space<vmem>>, %arg5: memref<64x32xf32, #tpu.memory_space<vmem>>, %arg6: memref<1x32xf32, #tpu.memory_space<vmem>>, %arg7: memref<1x32xf32, #tpu.memory_space<vmem>>, %arg8: memref<1x32xf32, #tpu.memory_space<vmem>>, %arg9: memref<20x32xf32, #tpu.memory_space<vmem>>, %arg10: memref<20x32xf32, #tpu.memory_space<vmem>>) attributes {dimension_semantics = [#tpu.dimension_semantics<parallel>, #tpu.dimension_semantics<arbitrary>], iteration_bounds = array<i64: 1, 1>, scalar_prefetch = 0 : i64, scratch_operands = 1 : i64, tpu.core_type = #tpu.core_type<tc>, window_params = [{transform_indices = @transform_0, window_bounds = array<i64: 20, 32>}, {transform_indices = @transform_1, window_bounds = array<i64: 32, 64>}, {transform_indices = @transform_2, window_bounds = array<i64: 1, 64>}, {transform_indices = @transform_3, window_bounds = array<i64: 64, 32>}, {pipeline_mode = #tpu.pipeline_mode<synchronous>, transform_indices = @transform_4, window_bounds = array<i64: 1, 32>}, {pipeline_mode = #tpu.pipeline_mode<synchronous>, transform_indices = @transform_5, window_bounds = array<i64: 1, 32>}, {pipeline_mode = #tpu.pipeline_mode<synchronous>, transform_indices = @transform_6, window_bounds = array<i64: 1, 32>}, {transform_indices = @transform_7, window_bounds = array<i64: 20, 32>}]} {
    %c0_i32 = arith.constant 0 : i32
    %0 = arith.cmpi eq, %arg1, %c0_i32 : i32
    %1 = arith.extui %0 : i1 to i32
    %c0_i32_0 = arith.constant 0 : i32
    %2 = arith.cmpi ne, %1, %c0_i32_0 : i32
    scf.if %2 {
      %cst_16 = arith.constant 0.000000e+00 : f32
      %19 = vector.broadcast %cst_16 : f32 to vector<20x32xf32>
      %c0_17 = arith.constant 0 : index
      %c0_18 = arith.constant 0 : index
      %20 = vector.load %arg10[%c0_17, %c0_18] : memref<20x32xf32, #tpu.memory_space<vmem>>, vector<20x32xf32>
      tpu.vector_store %arg10[%c0_17, %c0_18], %19 {strides = array<i32>} : memref<20x32xf32, #tpu.memory_space<vmem>>, vector<20x32xf32>,
    } else {
    }
    %c0 = arith.constant 0 : index
    %c0_1 = arith.constant 0 : index
    %3 = vector.load %arg2[%c0, %c0_1] : memref<20x32xf32, #tpu.memory_space<vmem>>, vector<20x32xf32>
    %c0_2 = arith.constant 0 : index
    %c0_3 = arith.constant 0 : index
    %4 = vector.load %arg3[%c0_2, %c0_3] : memref<32x64xf32, #tpu.memory_space<vmem>>, vector<32x64xf32>
    %cst = arith.constant dense<0.000000e+00> : vector<20x64xf32>
    %5 = tpu.matmul %3, %4, %cst {dimension_numbers = #tpu.dot_dimension_numbers<[1], [0], [0], [1], [0, 0, 1, 1], [], []>} : vector<20x32xf32>, vector<32x64xf32>, vector<20x64xf32> -> vector<20x64xf32>
    %c0_4 = arith.constant 0 : index
    %c0_5 = arith.constant 0 : index
    %6 = vector.load %arg4[%c0_4, %c0_5] : memref<1x64xf32, #tpu.memory_space<vmem>>, vector<1x64xf32>
    %7 = vector.broadcast %6 : vector<1x64xf32> to vector<20x64xf32>
    %8 = arith.addf %5, %7 : vector<20x64xf32>
    %cst_6 = arith.constant 0.000000e+00 : f32
    %9 = vector.broadcast %cst_6 : f32 to vector<20x64xf32>
    %10 = arith.maximumf %8, %9 : vector<20x64xf32>
    %c0_7 = arith.constant 0 : index
    %c0_8 = arith.constant 0 : index
    %11 = vector.load %arg10[%c0_7, %c0_8] : memref<20x32xf32, #tpu.memory_space<vmem>>, vector<20x32xf32>
    %c0_9 = arith.constant 0 : index
    %c0_10 = arith.constant 0 : index
    %12 = vector.load %arg5[%c0_9, %c0_10] : memref<64x32xf32, #tpu.memory_space<vmem>>, vector<64x32xf32>
    %cst_11 = arith.constant dense<0.000000e+00> : vector<20x32xf32>
    %13 = tpu.matmul %10, %12, %cst_11 {dimension_numbers = #tpu.dot_dimension_numbers<[1], [0], [0], [1], [0, 0, 1, 1], [], []>} : vector<20x64xf32>, vector<64x32xf32>, vector<20x32xf32> -> vector<20x32xf32>
    %14 = arith.addf %11, %13 : vector<20x32xf32>
    %c0_12 = arith.constant 0 : index
    %c0_13 = arith.constant 0 : index
    %15 = vector.load %arg10[%c0_12, %c0_13] : memref<20x32xf32, #tpu.memory_space<vmem>>, vector<20x32xf32>
    tpu.vector_store %arg10[%c0_12, %c0_13], %14 {strides = array<i32>} : memref<20x32xf32, #tpu.memory_space<vmem>>, vector<20x32xf32>,
    %c0_i32_14 = arith.constant 0 : i32
    %16 = arith.cmpi eq, %arg1, %c0_i32_14 : i32
    %17 = arith.extui %16 : i1 to i32
    %c0_i32_15 = arith.constant 0 : i32
    %18 = arith.cmpi ne, %17, %c0_i32_15 : i32
    scf.if %18 {
      %c0_16 = arith.constant 0 : index
      %c0_17 = arith.constant 0 : index
      %19 = vector.load %arg10[%c0_16, %c0_17] : memref<20x32xf32, #tpu.memory_space<vmem>>, vector<20x32xf32>
      %c0_18 = arith.constant 0 : index
      %c0_19 = arith.constant 0 : index
      %20 = vector.load %arg6[%c0_18, %c0_19] : memref<1x32xf32, #tpu.memory_space<vmem>>, vector<1x32xf32>
      %21 = vector.broadcast %20 : vector<1x32xf32> to vector<20x32xf32>
      %22 = arith.addf %19, %21 : vector<20x32xf32>
      %c0_20 = arith.constant 0 : index
      %c0_21 = arith.constant 0 : index
      %23 = vector.load %arg2[%c0_20, %c0_21] : memref<20x32xf32, #tpu.memory_space<vmem>>, vector<20x32xf32>
      %24 = arith.addf %22, %23 : vector<20x32xf32>
      %cst_22 = arith.constant dense<0.000000e+00> : vector<20xf32>
      %25 = vector.multi_reduction <add>, %24, %cst_22 [1] : vector<20x32xf32> to vector<20xf32>
      %26 = vector.shape_cast %25 : vector<20xf32> to vector<20x1xf32>
      %cst_23 = arith.constant 3.200000e+01 : f32
      %27 = vector.broadcast %cst_23 : f32 to vector<20x1xf32>
      %28 = arith.divf %26, %27 : vector<20x1xf32>
      %29 = vector.broadcast %28 : vector<20x1xf32> to vector<20x32xf32>
      %30 = arith.subf %24, %29 : vector<20x32xf32>
      %31 = arith.mulf %30, %30 : vector<20x32xf32>
      %cst_24 = arith.constant dense<0.000000e+00> : vector<20xf32>
      %32 = vector.multi_reduction <add>, %31, %cst_24 [1] : vector<20x32xf32> to vector<20xf32>
      %33 = vector.shape_cast %32 : vector<20xf32> to vector<20x1xf32>
      %cst_25 = arith.constant 3.200000e+01 : f32
      %34 = vector.broadcast %cst_25 : f32 to vector<20x1xf32>
      %35 = arith.divf %33, %34 : vector<20x1xf32>
      %36 = vector.broadcast %28 : vector<20x1xf32> to vector<20x32xf32>
      %37 = arith.subf %24, %36 : vector<20x32xf32>
      %cst_26 = arith.constant 9.99999974E-6 : f32
      %38 = vector.broadcast %cst_26 : f32 to vector<20x1xf32>
      %39 = arith.addf %35, %38 : vector<20x1xf32>
      %40 = math.rsqrt %39 : vector<20x1xf32>
      %41 = vector.broadcast %40 : vector<20x1xf32> to vector<20x32xf32>
      %42 = arith.mulf %37, %41 : vector<20x32xf32>
      %c0_27 = arith.constant 0 : index
      %c0_28 = arith.constant 0 : index
      %43 = vector.load %arg7[%c0_27, %c0_28] : memref<1x32xf32, #tpu.memory_space<vmem>>, vector<1x32xf32>
      %44 = vector.broadcast %43 : vector<1x32xf32> to vector<20x32xf32>
      %45 = arith.mulf %42, %44 : vector<20x32xf32>
      %c0_29 = arith.constant 0 : index
      %c0_30 = arith.constant 0 : index
      %46 = vector.load %arg8[%c0_29, %c0_30] : memref<1x32xf32, #tpu.memory_space<vmem>>, vector<1x32xf32>
      %47 = vector.broadcast %46 : vector<1x32xf32> to vector<20x32xf32>
      %48 = arith.addf %45, %47 : vector<20x32xf32>
      %c0_31 = arith.constant 0 : index
      %c0_32 = arith.constant 0 : index
      %49 = vector.load %arg9[%c0_31, %c0_32] : memref<20x32xf32, #tpu.memory_space<vmem>>, vector<20x32xf32>
      tpu.vector_store %arg9[%c0_31, %c0_32], %48 {strides = array<i32>} : memref<20x32xf32, #tpu.memory_space<vmem>>, vector<20x32xf32>,
    } else {
    }
    return
  }
  func.func @transform_0(%arg0: i32, %arg1: i32) -> (i32, i32) {
    %c0_i32 = arith.constant 0 : i32
    %c0_i32_0 = arith.constant 0 : i32
    return %arg0, %c0_i32 : i32, i32
  }
  func.func @transform_1(%arg0: i32, %arg1: i32) -> (i32, i32) {
    %c0_i32 = arith.constant 0 : i32
    %c0_i32_0 = arith.constant 0 : i32
    return %c0_i32, %arg1 : i32, i32
  }
  func.func @transform_2(%arg0: i32, %arg1: i32) -> (i32, i32) {
    %c0_i32 = arith.constant 0 : i32
    %c0_i32_0 = arith.constant 0 : i32
    return %c0_i32, %arg1 : i32, i32
  }
  func.func @transform_3(%arg0: i32, %arg1: i32) -> (i32, i32) {
    %c0_i32 = arith.constant 0 : i32
    %c0_i32_0 = arith.constant 0 : i32
    return %arg1, %c0_i32 : i32, i32
  }
  func.func @transform_4(%arg0: i32, %arg1: i32) -> (i32, i32) {
    %c0_i32 = arith.constant 0 : i32
    %c0_i32_0 = arith.constant 0 : i32
    %c0_i32_1 = arith.constant 0 : i32
    return %c0_i32, %c0_i32_0 : i32, i32
  }
  func.func @transform_5(%arg0: i32, %arg1: i32) -> (i32, i32) {
    %c0_i32 = arith.constant 0 : i32
    %c0_i32_0 = arith.constant 0 : i32
    %c0_i32_1 = arith.constant 0 : i32
    return %c0_i32, %c0_i32_0 : i32, i32
  }
  func.func @transform_6(%arg0: i32, %arg1: i32) -> (i32, i32) {
    %c0_i32 = arith.constant 0 : i32
    %c0_i32_0 = arith.constant 0 : i32
    %c0_i32_1 = arith.constant 0 : i32
    return %c0_i32, %c0_i32_0 : i32, i32
  }
  func.func @transform_7(%arg0: i32, %arg1: i32) -> (i32, i32) {
    %c0_i32 = arith.constant 0 : i32
    %c0_i32_0 = arith.constant 0 : i32
    return %arg0, %c0_i32 : i32, i32
  }
}

module attributes {stable_mosaic.version = 11 : i64} {
  func.func @_ln_kernel(%arg0: i32, %arg1: memref<20x32xf32, #tpu.memory_space<vmem>>, %arg2: memref<1x32xf32, #tpu.memory_space<vmem>>, %arg3: memref<1x32xf32, #tpu.memory_space<vmem>>, %arg4: memref<20x32xf32, #tpu.memory_space<vmem>>) attributes {dimension_semantics = [#tpu.dimension_semantics<parallel>], iteration_bounds = array<i64: 1>, scalar_prefetch = 0 : i64, scratch_operands = 0 : i64, tpu.core_type = #tpu.core_type<tc>, window_params = [{transform_indices = @transform_0, window_bounds = array<i64: 20, 32>}, {pipeline_mode = #tpu.pipeline_mode<synchronous>, transform_indices = @transform_1, window_bounds = array<i64: 1, 32>}, {pipeline_mode = #tpu.pipeline_mode<synchronous>, transform_indices = @transform_2, window_bounds = array<i64: 1, 32>}, {transform_indices = @transform_3, window_bounds = array<i64: 20, 32>}]} {
    %c0 = arith.constant 0 : index
    %c0_0 = arith.constant 0 : index
    %0 = vector.load %arg1[%c0, %c0_0] : memref<20x32xf32, #tpu.memory_space<vmem>>, vector<20x32xf32>
    %cst = arith.constant dense<0.000000e+00> : vector<20xf32>
    %1 = vector.multi_reduction <add>, %0, %cst [1] : vector<20x32xf32> to vector<20xf32>
    %2 = vector.shape_cast %1 : vector<20xf32> to vector<20x1xf32>
    %cst_1 = arith.constant 3.200000e+01 : f32
    %3 = vector.broadcast %cst_1 : f32 to vector<20x1xf32>
    %4 = arith.divf %2, %3 : vector<20x1xf32>
    %5 = vector.broadcast %4 : vector<20x1xf32> to vector<20x32xf32>
    %6 = arith.subf %0, %5 : vector<20x32xf32>
    %7 = arith.mulf %6, %6 : vector<20x32xf32>
    %cst_2 = arith.constant dense<0.000000e+00> : vector<20xf32>
    %8 = vector.multi_reduction <add>, %7, %cst_2 [1] : vector<20x32xf32> to vector<20xf32>
    %9 = vector.shape_cast %8 : vector<20xf32> to vector<20x1xf32>
    %cst_3 = arith.constant 3.200000e+01 : f32
    %10 = vector.broadcast %cst_3 : f32 to vector<20x1xf32>
    %11 = arith.divf %9, %10 : vector<20x1xf32>
    %12 = vector.broadcast %4 : vector<20x1xf32> to vector<20x32xf32>
    %13 = arith.subf %0, %12 : vector<20x32xf32>
    %cst_4 = arith.constant 9.99999974E-6 : f32
    %14 = vector.broadcast %cst_4 : f32 to vector<20x1xf32>
    %15 = arith.addf %11, %14 : vector<20x1xf32>
    %16 = math.rsqrt %15 : vector<20x1xf32>
    %17 = vector.broadcast %16 : vector<20x1xf32> to vector<20x32xf32>
    %18 = arith.mulf %13, %17 : vector<20x32xf32>
    %c0_5 = arith.constant 0 : index
    %c0_6 = arith.constant 0 : index
    %19 = vector.load %arg2[%c0_5, %c0_6] : memref<1x32xf32, #tpu.memory_space<vmem>>, vector<1x32xf32>
    %20 = vector.broadcast %19 : vector<1x32xf32> to vector<20x32xf32>
    %21 = arith.mulf %18, %20 : vector<20x32xf32>
    %c0_7 = arith.constant 0 : index
    %c0_8 = arith.constant 0 : index
    %22 = vector.load %arg3[%c0_7, %c0_8] : memref<1x32xf32, #tpu.memory_space<vmem>>, vector<1x32xf32>
    %23 = vector.broadcast %22 : vector<1x32xf32> to vector<20x32xf32>
    %24 = arith.addf %21, %23 : vector<20x32xf32>
    %c0_9 = arith.constant 0 : index
    %c0_10 = arith.constant 0 : index
    %25 = vector.load %arg4[%c0_9, %c0_10] : memref<20x32xf32, #tpu.memory_space<vmem>>, vector<20x32xf32>
    tpu.vector_store %arg4[%c0_9, %c0_10], %24 {strides = array<i32>} : memref<20x32xf32, #tpu.memory_space<vmem>>, vector<20x32xf32>,
    return
  }
  func.func @transform_0(%arg0: i32) -> (i32, i32) {
    %c0_i32 = arith.constant 0 : i32
    %c0_i32_0 = arith.constant 0 : i32
    return %arg0, %c0_i32 : i32, i32
  }
  func.func @transform_1(%arg0: i32) -> (i32, i32) {
    %c0_i32 = arith.constant 0 : i32
    %c0_i32_0 = arith.constant 0 : i32
    %c0_i32_1 = arith.constant 0 : i32
    return %c0_i32, %c0_i32_0 : i32, i32
  }
  func.func @transform_2(%arg0: i32) -> (i32, i32) {
    %c0_i32 = arith.constant 0 : i32
    %c0_i32_0 = arith.constant 0 : i32
    %c0_i32_1 = arith.constant 0 : i32
    return %c0_i32, %c0_i32_0 : i32, i32
  }
  func.func @transform_3(%arg0: i32) -> (i32, i32) {
    %c0_i32 = arith.constant 0 : i32
    %c0_i32_0 = arith.constant 0 : i32
    return %arg0, %c0_i32 : i32, i32
  }
}

module attributes {stable_mosaic.version = 11 : i64} {
  func.func @_matmul_bias_kernel(%arg0: i32, %arg1: i32, %arg2: i32, %arg3: memref<20x32xf32, #tpu.memory_space<vmem>>, %arg4: memref<32x64xf32, #tpu.memory_space<vmem>>, %arg5: memref<1x64xf32, #tpu.memory_space<vmem>>, %arg6: memref<20x64xf32, #tpu.memory_space<vmem>>, %arg7: memref<20x64xf32, #tpu.memory_space<vmem>>) attributes {dimension_semantics = [#tpu.dimension_semantics<parallel>, #tpu.dimension_semantics<parallel>, #tpu.dimension_semantics<arbitrary>], iteration_bounds = array<i64: 1, 1, 1>, scalar_prefetch = 0 : i64, scratch_operands = 1 : i64, tpu.core_type = #tpu.core_type<tc>, window_params = [{transform_indices = @transform_0, window_bounds = array<i64: 20, 32>}, {transform_indices = @transform_1, window_bounds = array<i64: 32, 64>}, {transform_indices = @transform_2, window_bounds = array<i64: 1, 64>}, {transform_indices = @transform_3, window_bounds = array<i64: 20, 64>}]} {
    %c0_i32 = arith.constant 0 : i32
    %0 = arith.cmpi eq, %arg2, %c0_i32 : i32
    %1 = arith.extui %0 : i1 to i32
    %c0_i32_0 = arith.constant 0 : i32
    %2 = arith.cmpi ne, %1, %c0_i32_0 : i32
    scf.if %2 {
      %cst_10 = arith.constant 0.000000e+00 : f32
      %12 = vector.broadcast %cst_10 : f32 to vector<20x64xf32>
      %c0_11 = arith.constant 0 : index
      %c0_12 = arith.constant 0 : index
      %13 = vector.load %arg7[%c0_11, %c0_12] : memref<20x64xf32, #tpu.memory_space<vmem>>, vector<20x64xf32>
      tpu.vector_store %arg7[%c0_11, %c0_12], %12 {strides = array<i32>} : memref<20x64xf32, #tpu.memory_space<vmem>>, vector<20x64xf32>,
    } else {
    }
    %c0 = arith.constant 0 : index
    %c0_1 = arith.constant 0 : index
    %3 = vector.load %arg7[%c0, %c0_1] : memref<20x64xf32, #tpu.memory_space<vmem>>, vector<20x64xf32>
    %c0_2 = arith.constant 0 : index
    %c0_3 = arith.constant 0 : index
    %4 = vector.load %arg3[%c0_2, %c0_3] : memref<20x32xf32, #tpu.memory_space<vmem>>, vector<20x32xf32>
    %c0_4 = arith.constant 0 : index
    %c0_5 = arith.constant 0 : index
    %5 = vector.load %arg4[%c0_4, %c0_5] : memref<32x64xf32, #tpu.memory_space<vmem>>, vector<32x64xf32>
    %cst = arith.constant dense<0.000000e+00> : vector<20x64xf32>
    %6 = tpu.matmul %4, %5, %cst {dimension_numbers = #tpu.dot_dimension_numbers<[1], [0], [0], [1], [0, 0, 1, 1], [], []>} : vector<20x32xf32>, vector<32x64xf32>, vector<20x64xf32> -> vector<20x64xf32>
    %7 = arith.addf %3, %6 : vector<20x64xf32>
    %c0_6 = arith.constant 0 : index
    %c0_7 = arith.constant 0 : index
    %8 = vector.load %arg7[%c0_6, %c0_7] : memref<20x64xf32, #tpu.memory_space<vmem>>, vector<20x64xf32>
    tpu.vector_store %arg7[%c0_6, %c0_7], %7 {strides = array<i32>} : memref<20x64xf32, #tpu.memory_space<vmem>>, vector<20x64xf32>,
    %c0_i32_8 = arith.constant 0 : i32
    %9 = arith.cmpi eq, %arg2, %c0_i32_8 : i32
    %10 = arith.extui %9 : i1 to i32
    %c0_i32_9 = arith.constant 0 : i32
    %11 = arith.cmpi ne, %10, %c0_i32_9 : i32
    scf.if %11 {
      %c0_10 = arith.constant 0 : index
      %c0_11 = arith.constant 0 : index
      %12 = vector.load %arg7[%c0_10, %c0_11] : memref<20x64xf32, #tpu.memory_space<vmem>>, vector<20x64xf32>
      %c0_12 = arith.constant 0 : index
      %c0_13 = arith.constant 0 : index
      %13 = vector.load %arg5[%c0_12, %c0_13] : memref<1x64xf32, #tpu.memory_space<vmem>>, vector<1x64xf32>
      %14 = vector.broadcast %13 : vector<1x64xf32> to vector<20x64xf32>
      %15 = arith.addf %12, %14 : vector<20x64xf32>
      %c0_14 = arith.constant 0 : index
      %c0_15 = arith.constant 0 : index
      %16 = vector.load %arg6[%c0_14, %c0_15] : memref<20x64xf32, #tpu.memory_space<vmem>>, vector<20x64xf32>
      tpu.vector_store %arg6[%c0_14, %c0_15], %15 {strides = array<i32>} : memref<20x64xf32, #tpu.memory_space<vmem>>, vector<20x64xf32>,
    } else {
    }
    return
  }
  func.func @transform_0(%arg0: i32, %arg1: i32, %arg2: i32) -> (i32, i32) {
    %c0_i32 = arith.constant 0 : i32
    return %arg0, %arg2 : i32, i32
  }
  func.func @transform_1(%arg0: i32, %arg1: i32, %arg2: i32) -> (i32, i32) {
    %c0_i32 = arith.constant 0 : i32
    return %arg2, %arg1 : i32, i32
  }
  func.func @transform_2(%arg0: i32, %arg1: i32, %arg2: i32) -> (i32, i32) {
    %c0_i32 = arith.constant 0 : i32
    %c0_i32_0 = arith.constant 0 : i32
    return %c0_i32, %arg1 : i32, i32
  }
  func.func @transform_3(%arg0: i32, %arg1: i32, %arg2: i32) -> (i32, i32) {
    %c0_i32 = arith.constant 0 : i32
    return %arg0, %arg1 : i32, i32
  }
}

module attributes {stable_mosaic.version = 11 : i64} {
  func.func @_matmul_bias_kernel(%arg0: i32, %arg1: i32, %arg2: i32, %arg3: memref<16x32xf32, #tpu.memory_space<vmem>>, %arg4: memref<32x96xf32, #tpu.memory_space<vmem>>, %arg5: memref<1x96xf32, #tpu.memory_space<vmem>>, %arg6: memref<16x96xf32, #tpu.memory_space<vmem>>, %arg7: memref<16x96xf32, #tpu.memory_space<vmem>>) attributes {dimension_semantics = [#tpu.dimension_semantics<parallel>, #tpu.dimension_semantics<parallel>, #tpu.dimension_semantics<arbitrary>], iteration_bounds = array<i64: 1, 1, 1>, scalar_prefetch = 0 : i64, scratch_operands = 1 : i64, tpu.core_type = #tpu.core_type<tc>, window_params = [{transform_indices = @transform_0, window_bounds = array<i64: 16, 32>}, {transform_indices = @transform_1, window_bounds = array<i64: 32, 96>}, {transform_indices = @transform_2, window_bounds = array<i64: 1, 96>}, {transform_indices = @transform_3, window_bounds = array<i64: 16, 96>}]} {
    %c0_i32 = arith.constant 0 : i32
    %0 = arith.cmpi eq, %arg2, %c0_i32 : i32
    %1 = arith.extui %0 : i1 to i32
    %c0_i32_0 = arith.constant 0 : i32
    %2 = arith.cmpi ne, %1, %c0_i32_0 : i32
    scf.if %2 {
      %cst_10 = arith.constant 0.000000e+00 : f32
      %12 = vector.broadcast %cst_10 : f32 to vector<16x96xf32>
      %c0_11 = arith.constant 0 : index
      %c0_12 = arith.constant 0 : index
      %13 = vector.load %arg7[%c0_11, %c0_12] : memref<16x96xf32, #tpu.memory_space<vmem>>, vector<16x96xf32>
      tpu.vector_store %arg7[%c0_11, %c0_12], %12 {strides = array<i32>} : memref<16x96xf32, #tpu.memory_space<vmem>>, vector<16x96xf32>,
    } else {
    }
    %c0 = arith.constant 0 : index
    %c0_1 = arith.constant 0 : index
    %3 = vector.load %arg7[%c0, %c0_1] : memref<16x96xf32, #tpu.memory_space<vmem>>, vector<16x96xf32>
    %c0_2 = arith.constant 0 : index
    %c0_3 = arith.constant 0 : index
    %4 = vector.load %arg3[%c0_2, %c0_3] : memref<16x32xf32, #tpu.memory_space<vmem>>, vector<16x32xf32>
    %c0_4 = arith.constant 0 : index
    %c0_5 = arith.constant 0 : index
    %5 = vector.load %arg4[%c0_4, %c0_5] : memref<32x96xf32, #tpu.memory_space<vmem>>, vector<32x96xf32>
    %cst = arith.constant dense<0.000000e+00> : vector<16x96xf32>
    %6 = tpu.matmul %4, %5, %cst {dimension_numbers = #tpu.dot_dimension_numbers<[1], [0], [0], [1], [0, 0, 1, 1], [], []>} : vector<16x32xf32>, vector<32x96xf32>, vector<16x96xf32> -> vector<16x96xf32>
    %7 = arith.addf %3, %6 : vector<16x96xf32>
    %c0_6 = arith.constant 0 : index
    %c0_7 = arith.constant 0 : index
    %8 = vector.load %arg7[%c0_6, %c0_7] : memref<16x96xf32, #tpu.memory_space<vmem>>, vector<16x96xf32>
    tpu.vector_store %arg7[%c0_6, %c0_7], %7 {strides = array<i32>} : memref<16x96xf32, #tpu.memory_space<vmem>>, vector<16x96xf32>,
    %c0_i32_8 = arith.constant 0 : i32
    %9 = arith.cmpi eq, %arg2, %c0_i32_8 : i32
    %10 = arith.extui %9 : i1 to i32
    %c0_i32_9 = arith.constant 0 : i32
    %11 = arith.cmpi ne, %10, %c0_i32_9 : i32
    scf.if %11 {
      %c0_10 = arith.constant 0 : index
      %c0_11 = arith.constant 0 : index
      %12 = vector.load %arg7[%c0_10, %c0_11] : memref<16x96xf32, #tpu.memory_space<vmem>>, vector<16x96xf32>
      %c0_12 = arith.constant 0 : index
      %c0_13 = arith.constant 0 : index
      %13 = vector.load %arg5[%c0_12, %c0_13] : memref<1x96xf32, #tpu.memory_space<vmem>>, vector<1x96xf32>
      %14 = vector.broadcast %13 : vector<1x96xf32> to vector<16x96xf32>
      %15 = arith.addf %12, %14 : vector<16x96xf32>
      %c0_14 = arith.constant 0 : index
      %c0_15 = arith.constant 0 : index
      %16 = vector.load %arg6[%c0_14, %c0_15] : memref<16x96xf32, #tpu.memory_space<vmem>>, vector<16x96xf32>
      tpu.vector_store %arg6[%c0_14, %c0_15], %15 {strides = array<i32>} : memref<16x96xf32, #tpu.memory_space<vmem>>, vector<16x96xf32>,
    } else {
    }
    return
  }
  func.func @transform_0(%arg0: i32, %arg1: i32, %arg2: i32) -> (i32, i32) {
    %c0_i32 = arith.constant 0 : i32
    return %arg0, %arg2 : i32, i32
  }
  func.func @transform_1(%arg0: i32, %arg1: i32, %arg2: i32) -> (i32, i32) {
    %c0_i32 = arith.constant 0 : i32
    return %arg2, %arg1 : i32, i32
  }
  func.func @transform_2(%arg0: i32, %arg1: i32, %arg2: i32) -> (i32, i32) {
    %c0_i32 = arith.constant 0 : i32
    %c0_i32_0 = arith.constant 0 : i32
    return %c0_i32, %arg1 : i32, i32
  }
  func.func @transform_3(%arg0: i32, %arg1: i32, %arg2: i32) -> (i32, i32) {
    %c0_i32 = arith.constant 0 : i32
    return %arg0, %arg1 : i32, i32
  }
}

module attributes {stable_mosaic.version = 11 : i64} {
  func.func @_attn_kernel(%arg0: i32, %arg1: memref<1x4x8x8xf32, #tpu.memory_space<vmem>>, %arg2: memref<1x4x8x8xf32, #tpu.memory_space<vmem>>, %arg3: memref<1x4x8x8xf32, #tpu.memory_space<vmem>>, %arg4: memref<1x1x8xf32, #tpu.memory_space<vmem>>, %arg5: memref<1x4x8x8xf32, #tpu.memory_space<vmem>>) attributes {dimension_semantics = [#tpu.dimension_semantics<parallel>], iteration_bounds = array<i64: 2>, scalar_prefetch = 0 : i64, scratch_operands = 0 : i64, tpu.core_type = #tpu.core_type<tc>, window_params = [{transform_indices = @transform_0, window_bounds = array<i64: 1, 4, 8, 8>}, {transform_indices = @transform_1, window_bounds = array<i64: 1, 4, 8, 8>}, {transform_indices = @transform_2, window_bounds = array<i64: 1, 4, 8, 8>}, {transform_indices = @transform_3, window_bounds = array<i64: 1, 1, 8>}, {transform_indices = @transform_4, window_bounds = array<i64: 1, 4, 8, 8>}]} {
    %c0 = arith.constant 0 : index
    %c0_0 = arith.constant 0 : index
    %c0_1 = arith.constant 0 : index
    %c0_2 = arith.constant 0 : index
    %0 = vector.load %arg1[%c0, %c0_0, %c0_1, %c0_2] : memref<1x4x8x8xf32, #tpu.memory_space<vmem>>, vector<1x4x8x8xf32>
    %1 = vector.shape_cast %0 : vector<1x4x8x8xf32> to vector<4x8x8xf32>
    %c0_3 = arith.constant 0 : index
    %c0_4 = arith.constant 0 : index
    %c0_5 = arith.constant 0 : index
    %c0_6 = arith.constant 0 : index
    %2 = vector.load %arg2[%c0_3, %c0_4, %c0_5, %c0_6] : memref<1x4x8x8xf32, #tpu.memory_space<vmem>>, vector<1x4x8x8xf32>
    %3 = vector.shape_cast %2 : vector<1x4x8x8xf32> to vector<4x8x8xf32>
    %c0_7 = arith.constant 0 : index
    %c0_8 = arith.constant 0 : index
    %c0_9 = arith.constant 0 : index
    %c0_10 = arith.constant 0 : index
    %4 = vector.load %arg3[%c0_7, %c0_8, %c0_9, %c0_10] : memref<1x4x8x8xf32, #tpu.memory_space<vmem>>, vector<1x4x8x8xf32>
    %5 = vector.shape_cast %4 : vector<1x4x8x8xf32> to vector<4x8x8xf32>
    %c0_11 = arith.constant 0 : index
    %c0_12 = arith.constant 0 : index
    %c0_13 = arith.constant 0 : index
    %6 = vector.load %arg4[%c0_11, %c0_12, %c0_13] : memref<1x1x8xf32, #tpu.memory_space<vmem>>, vector<1x1x8xf32>
    %7 = vector.shape_cast %6 : vector<1x1x8xf32> to vector<1x8xf32>
    %cst = arith.constant dense<0.000000e+00> : vector<4x8x8xf32>
    %8 = tpu.matmul %1, %3, %cst {dimension_numbers = #tpu.dot_dimension_numbers<[2], [2], [1], [1], [0, 0, 0, 1, 1, 1], [0], [0]>} : vector<4x8x8xf32>, vector<4x8x8xf32>, vector<4x8x8xf32> -> vector<4x8x8xf32>
    %cst_14 = arith.constant 0.353553385 : f32
    %9 = vector.broadcast %cst_14 : f32 to vector<4x8x8xf32>
    %10 = arith.mulf %8, %9 : vector<4x8x8xf32>
    %11 = vector.shape_cast %7 : vector<1x8xf32> to vector<1x1x8xf32>
    %12 = vector.broadcast %11 : vector<1x1x8xf32> to vector<4x8x8xf32>
    %13 = arith.addf %10, %12 : vector<4x8x8xf32>
    %14 = tpu.iota {dimensions = array<i32: 0>} : vector<8x8xi32>
    %15 = tpu.iota {dimensions = array<i32: 1>} : vector<8x8xi32>
    %16 = arith.cmpi sle, %15, %14 : vector<8x8xi32>
    %17 = vector.shape_cast %16 : vector<8x8xi1> to vector<1x8x8xi1>
    %cst_15 = arith.constant -1.000000e+30 : f32
    %18 = vector.shape_cast %17 : vector<1x8x8xi1> to vector<1x8x8xi1>
    %19 = vector.broadcast %18 : vector<1x8x8xi1> to vector<4x8x8xi1>
    %20 = vector.broadcast %cst_15 : f32 to vector<4x8x8xf32>
    %21 = arith.select %19, %13, %20 : vector<4x8x8xi1>, vector<4x8x8xf32>
    %cst_16 = arith.constant dense<0xFF800000> : vector<4x8xf32>
    %22 = vector.multi_reduction <maximumf>, %21, %cst_16 [2] : vector<4x8x8xf32> to vector<4x8xf32>
    %23 = vector.shape_cast %22 : vector<4x8xf32> to vector<4x8x1xf32>
    %24 = vector.broadcast %23 : vector<4x8x1xf32> to vector<4x8x8xf32>
    %25 = arith.subf %21, %24 : vector<4x8x8xf32>
    %26 = math.exp %25 : vector<4x8x8xf32>
    %cst_17 = arith.constant dense<0.000000e+00> : vector<4x8xf32>
    %27 = vector.multi_reduction <add>, %26, %cst_17 [2] : vector<4x8x8xf32> to vector<4x8xf32>
    %28 = vector.shape_cast %27 : vector<4x8xf32> to vector<4x8x1xf32>
    %29 = tpu.reciprocal %28 {approx = true} : vector<4x8x1xf32> -> vector<4x8x1xf32>
    %30 = vector.broadcast %29 : vector<4x8x1xf32> to vector<4x8x8xf32>
    %31 = arith.mulf %26, %30 : vector<4x8x8xf32>
    %cst_18 = arith.constant dense<0.000000e+00> : vector<4x8x8xf32>
    %32 = tpu.matmul %31, %5, %cst_18 {dimension_numbers = #tpu.dot_dimension_numbers<[2], [1], [1], [2], [0, 0, 0, 1, 1, 2], [0], [0]>} : vector<4x8x8xf32>, vector<4x8x8xf32>, vector<4x8x8xf32> -> vector<4x8x8xf32>
    %c0_19 = arith.constant 0 : index
    %c0_20 = arith.constant 0 : index
    %c0_21 = arith.constant 0 : index
    %c0_22 = arith.constant 0 : index
    %33 = vector.load %arg5[%c0_19, %c0_20, %c0_21, %c0_22] : memref<1x4x8x8xf32, #tpu.memory_space<vmem>>, vector<1x4x8x8xf32>
    %34 = vector.shape_cast %33 : vector<1x4x8x8xf32> to vector<4x8x8xf32>
    %35 = vector.shape_cast %32 : vector<4x8x8xf32> to vector<1x4x8x8xf32>
    tpu.vector_store %arg5[%c0_19, %c0_20, %c0_21, %c0_22], %35 {strides = array<i32>} : memref<1x4x8x8xf32, #tpu.memory_space<vmem>>, vector<1x4x8x8xf32>,
    return
  }
  func.func @transform_0(%arg0: i32) -> (i32, i32, i32, i32) {
    %c0_i32 = arith.constant 0 : i32
    %c0_i32_0 = arith.constant 0 : i32
    %c0_i32_1 = arith.constant 0 : i32
    %c0_i32_2 = arith.constant 0 : i32
    return %arg0, %c0_i32, %c0_i32_0, %c0_i32_1 : i32, i32, i32, i32
  }
  func.func @transform_1(%arg0: i32) -> (i32, i32, i32, i32) {
    %c0_i32 = arith.constant 0 : i32
    %c0_i32_0 = arith.constant 0 : i32
    %c0_i32_1 = arith.constant 0 : i32
    %c0_i32_2 = arith.constant 0 : i32
    return %arg0, %c0_i32, %c0_i32_0, %c0_i32_1 : i32, i32, i32, i32
  }
  func.func @transform_2(%arg0: i32) -> (i32, i32, i32, i32) {
    %c0_i32 = arith.constant 0 : i32
    %c0_i32_0 = arith.constant 0 : i32
    %c0_i32_1 = arith.constant 0 : i32
    %c0_i32_2 = arith.constant 0 : i32
    return %arg0, %c0_i32, %c0_i32_0, %c0_i32_1 : i32, i32, i32, i32
  }
  func.func @transform_3(%arg0: i32) -> (i32, i32, i32) {
    %c0_i32 = arith.constant 0 : i32
    %c0_i32_0 = arith.constant 0 : i32
    %c0_i32_1 = arith.constant 0 : i32
    return %arg0, %c0_i32, %c0_i32_0 : i32, i32, i32
  }
  func.func @transform_4(%arg0: i32) -> (i32, i32, i32, i32) {
    %c0_i32 = arith.constant 0 : i32
    %c0_i32_0 = arith.constant 0 : i32
    %c0_i32_1 = arith.constant 0 : i32
    %c0_i32_2 = arith.constant 0 : i32
    return %arg0, %c0_i32, %c0_i32_0, %c0_i32_1 : i32, i32, i32, i32
  }
}

module attributes {stable_mosaic.version = 11 : i64} {
  func.func @_matmul_bias_kernel(%arg0: i32, %arg1: i32, %arg2: i32, %arg3: memref<16x32xf32, #tpu.memory_space<vmem>>, %arg4: memref<32x32xf32, #tpu.memory_space<vmem>>, %arg5: memref<1x32xf32, #tpu.memory_space<vmem>>, %arg6: memref<16x32xf32, #tpu.memory_space<vmem>>, %arg7: memref<16x32xf32, #tpu.memory_space<vmem>>) attributes {dimension_semantics = [#tpu.dimension_semantics<parallel>, #tpu.dimension_semantics<parallel>, #tpu.dimension_semantics<arbitrary>], iteration_bounds = array<i64: 1, 1, 1>, scalar_prefetch = 0 : i64, scratch_operands = 1 : i64, tpu.core_type = #tpu.core_type<tc>, window_params = [{transform_indices = @transform_0, window_bounds = array<i64: 16, 32>}, {transform_indices = @transform_1, window_bounds = array<i64: 32, 32>}, {transform_indices = @transform_2, window_bounds = array<i64: 1, 32>}, {transform_indices = @transform_3, window_bounds = array<i64: 16, 32>}]} {
    %c0_i32 = arith.constant 0 : i32
    %0 = arith.cmpi eq, %arg2, %c0_i32 : i32
    %1 = arith.extui %0 : i1 to i32
    %c0_i32_0 = arith.constant 0 : i32
    %2 = arith.cmpi ne, %1, %c0_i32_0 : i32
    scf.if %2 {
      %cst_10 = arith.constant 0.000000e+00 : f32
      %12 = vector.broadcast %cst_10 : f32 to vector<16x32xf32>
      %c0_11 = arith.constant 0 : index
      %c0_12 = arith.constant 0 : index
      %13 = vector.load %arg7[%c0_11, %c0_12] : memref<16x32xf32, #tpu.memory_space<vmem>>, vector<16x32xf32>
      tpu.vector_store %arg7[%c0_11, %c0_12], %12 {strides = array<i32>} : memref<16x32xf32, #tpu.memory_space<vmem>>, vector<16x32xf32>,
    } else {
    }
    %c0 = arith.constant 0 : index
    %c0_1 = arith.constant 0 : index
    %3 = vector.load %arg7[%c0, %c0_1] : memref<16x32xf32, #tpu.memory_space<vmem>>, vector<16x32xf32>
    %c0_2 = arith.constant 0 : index
    %c0_3 = arith.constant 0 : index
    %4 = vector.load %arg3[%c0_2, %c0_3] : memref<16x32xf32, #tpu.memory_space<vmem>>, vector<16x32xf32>
    %c0_4 = arith.constant 0 : index
    %c0_5 = arith.constant 0 : index
    %5 = vector.load %arg4[%c0_4, %c0_5] : memref<32x32xf32, #tpu.memory_space<vmem>>, vector<32x32xf32>
    %cst = arith.constant dense<0.000000e+00> : vector<16x32xf32>
    %6 = tpu.matmul %4, %5, %cst {dimension_numbers = #tpu.dot_dimension_numbers<[1], [0], [0], [1], [0, 0, 1, 1], [], []>} : vector<16x32xf32>, vector<32x32xf32>, vector<16x32xf32> -> vector<16x32xf32>
    %7 = arith.addf %3, %6 : vector<16x32xf32>
    %c0_6 = arith.constant 0 : index
    %c0_7 = arith.constant 0 : index
    %8 = vector.load %arg7[%c0_6, %c0_7] : memref<16x32xf32, #tpu.memory_space<vmem>>, vector<16x32xf32>
    tpu.vector_store %arg7[%c0_6, %c0_7], %7 {strides = array<i32>} : memref<16x32xf32, #tpu.memory_space<vmem>>, vector<16x32xf32>,
    %c0_i32_8 = arith.constant 0 : i32
    %9 = arith.cmpi eq, %arg2, %c0_i32_8 : i32
    %10 = arith.extui %9 : i1 to i32
    %c0_i32_9 = arith.constant 0 : i32
    %11 = arith.cmpi ne, %10, %c0_i32_9 : i32
    scf.if %11 {
      %c0_10 = arith.constant 0 : index
      %c0_11 = arith.constant 0 : index
      %12 = vector.load %arg7[%c0_10, %c0_11] : memref<16x32xf32, #tpu.memory_space<vmem>>, vector<16x32xf32>
      %c0_12 = arith.constant 0 : index
      %c0_13 = arith.constant 0 : index
      %13 = vector.load %arg5[%c0_12, %c0_13] : memref<1x32xf32, #tpu.memory_space<vmem>>, vector<1x32xf32>
      %14 = vector.broadcast %13 : vector<1x32xf32> to vector<16x32xf32>
      %15 = arith.addf %12, %14 : vector<16x32xf32>
      %c0_14 = arith.constant 0 : index
      %c0_15 = arith.constant 0 : index
      %16 = vector.load %arg6[%c0_14, %c0_15] : memref<16x32xf32, #tpu.memory_space<vmem>>, vector<16x32xf32>
      tpu.vector_store %arg6[%c0_14, %c0_15], %15 {strides = array<i32>} : memref<16x32xf32, #tpu.memory_space<vmem>>, vector<16x32xf32>,
    } else {
    }
    return
  }
  func.func @transform_0(%arg0: i32, %arg1: i32, %arg2: i32) -> (i32, i32) {
    %c0_i32 = arith.constant 0 : i32
    return %arg0, %arg2 : i32, i32
  }
  func.func @transform_1(%arg0: i32, %arg1: i32, %arg2: i32) -> (i32, i32) {
    %c0_i32 = arith.constant 0 : i32
    return %arg2, %arg1 : i32, i32
  }
  func.func @transform_2(%arg0: i32, %arg1: i32, %arg2: i32) -> (i32, i32) {
    %c0_i32 = arith.constant 0 : i32
    %c0_i32_0 = arith.constant 0 : i32
    return %c0_i32, %arg1 : i32, i32
  }
  func.func @transform_3(%arg0: i32, %arg1: i32, %arg2: i32) -> (i32, i32) {
    %c0_i32 = arith.constant 0 : i32
    return %arg0, %arg1 : i32, i32
  }
}

module attributes {stable_mosaic.version = 11 : i64} {
  func.func @_proj_res_ln_kernel(%arg0: i32, %arg1: memref<16x32xf32, #tpu.memory_space<vmem>>, %arg2: memref<32x32xf32, #tpu.memory_space<vmem>>, %arg3: memref<1x32xf32, #tpu.memory_space<vmem>>, %arg4: memref<16x32xf32, #tpu.memory_space<vmem>>, %arg5: memref<1x32xf32, #tpu.memory_space<vmem>>, %arg6: memref<1x32xf32, #tpu.memory_space<vmem>>, %arg7: memref<16x32xf32, #tpu.memory_space<vmem>>) attributes {dimension_semantics = [#tpu.dimension_semantics<parallel>], iteration_bounds = array<i64: 1>, scalar_prefetch = 0 : i64, scratch_operands = 0 : i64, tpu.core_type = #tpu.core_type<tc>, window_params = [{transform_indices = @transform_0, window_bounds = array<i64: 16, 32>}, {pipeline_mode = #tpu.pipeline_mode<synchronous>, transform_indices = @transform_1, window_bounds = array<i64: 32, 32>}, {pipeline_mode = #tpu.pipeline_mode<synchronous>, transform_indices = @transform_2, window_bounds = array<i64: 1, 32>}, {transform_indices = @transform_3, window_bounds = array<i64: 16, 32>}, {pipeline_mode = #tpu.pipeline_mode<synchronous>, transform_indices = @transform_4, window_bounds = array<i64: 1, 32>}, {pipeline_mode = #tpu.pipeline_mode<synchronous>, transform_indices = @transform_5, window_bounds = array<i64: 1, 32>}, {transform_indices = @transform_6, window_bounds = array<i64: 16, 32>}]} {
    %c0 = arith.constant 0 : index
    %c0_0 = arith.constant 0 : index
    %0 = vector.load %arg1[%c0, %c0_0] : memref<16x32xf32, #tpu.memory_space<vmem>>, vector<16x32xf32>
    %c0_1 = arith.constant 0 : index
    %c0_2 = arith.constant 0 : index
    %1 = vector.load %arg2[%c0_1, %c0_2] : memref<32x32xf32, #tpu.memory_space<vmem>>, vector<32x32xf32>
    %cst = arith.constant dense<0.000000e+00> : vector<16x32xf32>
    %2 = tpu.matmul %0, %1, %cst {dimension_numbers = #tpu.dot_dimension_numbers<[1], [0], [0], [1], [0, 0, 1, 1], [], []>} : vector<16x32xf32>, vector<32x32xf32>, vector<16x32xf32> -> vector<16x32xf32>
    %c0_3 = arith.constant 0 : index
    %c0_4 = arith.constant 0 : index
    %3 = vector.load %arg3[%c0_3, %c0_4] : memref<1x32xf32, #tpu.memory_space<vmem>>, vector<1x32xf32>
    %4 = vector.broadcast %3 : vector<1x32xf32> to vector<16x32xf32>
    %5 = arith.addf %2, %4 : vector<16x32xf32>
    %c0_5 = arith.constant 0 : index
    %c0_6 = arith.constant 0 : index
    %6 = vector.load %arg4[%c0_5, %c0_6] : memref<16x32xf32, #tpu.memory_space<vmem>>, vector<16x32xf32>
    %7 = arith.addf %5, %6 : vector<16x32xf32>
    %cst_7 = arith.constant dense<0.000000e+00> : vector<16xf32>
    %8 = vector.multi_reduction <add>, %7, %cst_7 [1] : vector<16x32xf32> to vector<16xf32>
    %9 = vector.shape_cast %8 : vector<16xf32> to vector<16x1xf32>
    %cst_8 = arith.constant 3.200000e+01 : f32
    %10 = vector.broadcast %cst_8 : f32 to vector<16x1xf32>
    %11 = arith.divf %9, %10 : vector<16x1xf32>
    %12 = vector.broadcast %11 : vector<16x1xf32> to vector<16x32xf32>
    %13 = arith.subf %7, %12 : vector<16x32xf32>
    %14 = arith.mulf %13, %13 : vector<16x32xf32>
    %cst_9 = arith.constant dense<0.000000e+00> : vector<16xf32>
    %15 = vector.multi_reduction <add>, %14, %cst_9 [1] : vector<16x32xf32> to vector<16xf32>
    %16 = vector.shape_cast %15 : vector<16xf32> to vector<16x1xf32>
    %cst_10 = arith.constant 3.200000e+01 : f32
    %17 = vector.broadcast %cst_10 : f32 to vector<16x1xf32>
    %18 = arith.divf %16, %17 : vector<16x1xf32>
    %19 = vector.broadcast %11 : vector<16x1xf32> to vector<16x32xf32>
    %20 = arith.subf %7, %19 : vector<16x32xf32>
    %cst_11 = arith.constant 9.99999974E-6 : f32
    %21 = vector.broadcast %cst_11 : f32 to vector<16x1xf32>
    %22 = arith.addf %18, %21 : vector<16x1xf32>
    %23 = math.rsqrt %22 : vector<16x1xf32>
    %24 = vector.broadcast %23 : vector<16x1xf32> to vector<16x32xf32>
    %25 = arith.mulf %20, %24 : vector<16x32xf32>
    %c0_12 = arith.constant 0 : index
    %c0_13 = arith.constant 0 : index
    %26 = vector.load %arg5[%c0_12, %c0_13] : memref<1x32xf32, #tpu.memory_space<vmem>>, vector<1x32xf32>
    %27 = vector.broadcast %26 : vector<1x32xf32> to vector<16x32xf32>
    %28 = arith.mulf %25, %27 : vector<16x32xf32>
    %c0_14 = arith.constant 0 : index
    %c0_15 = arith.constant 0 : index
    %29 = vector.load %arg6[%c0_14, %c0_15] : memref<1x32xf32, #tpu.memory_space<vmem>>, vector<1x32xf32>
    %30 = vector.broadcast %29 : vector<1x32xf32> to vector<16x32xf32>
    %31 = arith.addf %28, %30 : vector<16x32xf32>
    %c0_16 = arith.constant 0 : index
    %c0_17 = arith.constant 0 : index
    %32 = vector.load %arg7[%c0_16, %c0_17] : memref<16x32xf32, #tpu.memory_space<vmem>>, vector<16x32xf32>
    tpu.vector_store %arg7[%c0_16, %c0_17], %31 {strides = array<i32>} : memref<16x32xf32, #tpu.memory_space<vmem>>, vector<16x32xf32>,
    return
  }
  func.func @transform_0(%arg0: i32) -> (i32, i32) {
    %c0_i32 = arith.constant 0 : i32
    %c0_i32_0 = arith.constant 0 : i32
    return %arg0, %c0_i32 : i32, i32
  }
  func.func @transform_1(%arg0: i32) -> (i32, i32) {
    %c0_i32 = arith.constant 0 : i32
    %c0_i32_0 = arith.constant 0 : i32
    %c0_i32_1 = arith.constant 0 : i32
    return %c0_i32, %c0_i32_0 : i32, i32
  }
  func.func @transform_2(%arg0: i32) -> (i32, i32) {
    %c0_i32 = arith.constant 0 : i32
    %c0_i32_0 = arith.constant 0 : i32
    %c0_i32_1 = arith.constant 0 : i32
    return %c0_i32, %c0_i32_0 : i32, i32
  }
  func.func @transform_3(%arg0: i32) -> (i32, i32) {
    %c0_i32 = arith.constant 0 : i32
    %c0_i32_0 = arith.constant 0 : i32
    return %arg0, %c0_i32 : i32, i32
  }
  func.func @transform_4(%arg0: i32) -> (i32, i32) {
    %c0_i32 = arith.constant 0 : i32
    %c0_i32_0 = arith.constant 0 : i32
    %c0_i32_1 = arith.constant 0 : i32
    return %c0_i32, %c0_i32_0 : i32, i32
  }
  func.func @transform_5(%arg0: i32) -> (i32, i32) {
    %c0_i32 = arith.constant 0 : i32
    %c0_i32_0 = arith.constant 0 : i32
    %c0_i32_1 = arith.constant 0 : i32
    return %c0_i32, %c0_i32_0 : i32, i32
  }
  func.func @transform_6(%arg0: i32) -> (i32, i32) {
    %c0_i32 = arith.constant 0 : i32
    %c0_i32_0 = arith.constant 0 : i32
    return %arg0, %c0_i32 : i32, i32
  }
}

module attributes {stable_mosaic.version = 11 : i64} {
  func.func @_attn_kernel(%arg0: i32, %arg1: memref<1x4x8x8xf32, #tpu.memory_space<vmem>>, %arg2: memref<1x4x10x8xf32, #tpu.memory_space<vmem>>, %arg3: memref<1x4x10x8xf32, #tpu.memory_space<vmem>>, %arg4: memref<1x1x10xf32, #tpu.memory_space<vmem>>, %arg5: memref<1x4x8x8xf32, #tpu.memory_space<vmem>>) attributes {dimension_semantics = [#tpu.dimension_semantics<parallel>], iteration_bounds = array<i64: 2>, scalar_prefetch = 0 : i64, scratch_operands = 0 : i64, tpu.core_type = #tpu.core_type<tc>, window_params = [{transform_indices = @transform_0, window_bounds = array<i64: 1, 4, 8, 8>}, {transform_indices = @transform_1, window_bounds = array<i64: 1, 4, 10, 8>}, {transform_indices = @transform_2, window_bounds = array<i64: 1, 4, 10, 8>}, {transform_indices = @transform_3, window_bounds = array<i64: 1, 1, 10>}, {transform_indices = @transform_4, window_bounds = array<i64: 1, 4, 8, 8>}]} {
    %c0 = arith.constant 0 : index
    %c0_0 = arith.constant 0 : index
    %c0_1 = arith.constant 0 : index
    %c0_2 = arith.constant 0 : index
    %0 = vector.load %arg1[%c0, %c0_0, %c0_1, %c0_2] : memref<1x4x8x8xf32, #tpu.memory_space<vmem>>, vector<1x4x8x8xf32>
    %1 = vector.shape_cast %0 : vector<1x4x8x8xf32> to vector<4x8x8xf32>
    %c0_3 = arith.constant 0 : index
    %c0_4 = arith.constant 0 : index
    %c0_5 = arith.constant 0 : index
    %c0_6 = arith.constant 0 : index
    %2 = vector.load %arg2[%c0_3, %c0_4, %c0_5, %c0_6] : memref<1x4x10x8xf32, #tpu.memory_space<vmem>>, vector<1x4x10x8xf32>
    %3 = vector.shape_cast %2 : vector<1x4x10x8xf32> to vector<4x10x8xf32>
    %c0_7 = arith.constant 0 : index
    %c0_8 = arith.constant 0 : index
    %c0_9 = arith.constant 0 : index
    %c0_10 = arith.constant 0 : index
    %4 = vector.load %arg3[%c0_7, %c0_8, %c0_9, %c0_10] : memref<1x4x10x8xf32, #tpu.memory_space<vmem>>, vector<1x4x10x8xf32>
    %5 = vector.shape_cast %4 : vector<1x4x10x8xf32> to vector<4x10x8xf32>
    %c0_11 = arith.constant 0 : index
    %c0_12 = arith.constant 0 : index
    %c0_13 = arith.constant 0 : index
    %6 = vector.load %arg4[%c0_11, %c0_12, %c0_13] : memref<1x1x10xf32, #tpu.memory_space<vmem>>, vector<1x1x10xf32>
    %7 = vector.shape_cast %6 : vector<1x1x10xf32> to vector<1x10xf32>
    %cst = arith.constant dense<0.000000e+00> : vector<4x8x10xf32>
    %8 = tpu.matmul %1, %3, %cst {dimension_numbers = #tpu.dot_dimension_numbers<[2], [2], [1], [1], [0, 0, 0, 1, 1, 1], [0], [0]>} : vector<4x8x8xf32>, vector<4x10x8xf32>, vector<4x8x10xf32> -> vector<4x8x10xf32>
    %cst_14 = arith.constant 0.353553385 : f32
    %9 = vector.broadcast %cst_14 : f32 to vector<4x8x10xf32>
    %10 = arith.mulf %8, %9 : vector<4x8x10xf32>
    %11 = vector.shape_cast %7 : vector<1x10xf32> to vector<1x1x10xf32>
    %12 = vector.broadcast %11 : vector<1x1x10xf32> to vector<4x8x10xf32>
    %13 = arith.addf %10, %12 : vector<4x8x10xf32>
    %cst_15 = arith.constant dense<0xFF800000> : vector<4x8xf32>
    %14 = vector.multi_reduction <maximumf>, %13, %cst_15 [2] : vector<4x8x10xf32> to vector<4x8xf32>
    %15 = vector.shape_cast %14 : vector<4x8xf32> to vector<4x8x1xf32>
    %16 = vector.broadcast %15 : vector<4x8x1xf32> to vector<4x8x10xf32>
    %17 = arith.subf %13, %16 : vector<4x8x10xf32>
    %18 = math.exp %17 : vector<4x8x10xf32>
    %cst_16 = arith.constant dense<0.000000e+00> : vector<4x8xf32>
    %19 = vector.multi_reduction <add>, %18, %cst_16 [2] : vector<4x8x10xf32> to vector<4x8xf32>
    %20 = vector.shape_cast %19 : vector<4x8xf32> to vector<4x8x1xf32>
    %21 = tpu.reciprocal %20 {approx = true} : vector<4x8x1xf32> -> vector<4x8x1xf32>
    %22 = vector.broadcast %21 : vector<4x8x1xf32> to vector<4x8x10xf32>
    %23 = arith.mulf %18, %22 : vector<4x8x10xf32>
    %cst_17 = arith.constant dense<0.000000e+00> : vector<4x8x8xf32>
    %24 = tpu.matmul %23, %5, %cst_17 {dimension_numbers = #tpu.dot_dimension_numbers<[2], [1], [1], [2], [0, 0, 0, 1, 1, 2], [0], [0]>} : vector<4x8x10xf32>, vector<4x10x8xf32>, vector<4x8x8xf32> -> vector<4x8x8xf32>
    %c0_18 = arith.constant 0 : index
    %c0_19 = arith.constant 0 : index
    %c0_20 = arith.constant 0 : index
    %c0_21 = arith.constant 0 : index
    %25 = vector.load %arg5[%c0_18, %c0_19, %c0_20, %c0_21] : memref<1x4x8x8xf32, #tpu.memory_space<vmem>>, vector<1x4x8x8xf32>
    %26 = vector.shape_cast %25 : vector<1x4x8x8xf32> to vector<4x8x8xf32>
    %27 = vector.shape_cast %24 : vector<4x8x8xf32> to vector<1x4x8x8xf32>
    tpu.vector_store %arg5[%c0_18, %c0_19, %c0_20, %c0_21], %27 {strides = array<i32>} : memref<1x4x8x8xf32, #tpu.memory_space<vmem>>, vector<1x4x8x8xf32>,
    return
  }
  func.func @transform_0(%arg0: i32) -> (i32, i32, i32, i32) {
    %c0_i32 = arith.constant 0 : i32
    %c0_i32_0 = arith.constant 0 : i32
    %c0_i32_1 = arith.constant 0 : i32
    %c0_i32_2 = arith.constant 0 : i32
    return %arg0, %c0_i32, %c0_i32_0, %c0_i32_1 : i32, i32, i32, i32
  }
  func.func @transform_1(%arg0: i32) -> (i32, i32, i32, i32) {
    %c0_i32 = arith.constant 0 : i32
    %c0_i32_0 = arith.constant 0 : i32
    %c0_i32_1 = arith.constant 0 : i32
    %c0_i32_2 = arith.constant 0 : i32
    return %arg0, %c0_i32, %c0_i32_0, %c0_i32_1 : i32, i32, i32, i32
  }
  func.func @transform_2(%arg0: i32) -> (i32, i32, i32, i32) {
    %c0_i32 = arith.constant 0 : i32
    %c0_i32_0 = arith.constant 0 : i32
    %c0_i32_1 = arith.constant 0 : i32
    %c0_i32_2 = arith.constant 0 : i32
    return %arg0, %c0_i32, %c0_i32_0, %c0_i32_1 : i32, i32, i32, i32
  }
  func.func @transform_3(%arg0: i32) -> (i32, i32, i32) {
    %c0_i32 = arith.constant 0 : i32
    %c0_i32_0 = arith.constant 0 : i32
    %c0_i32_1 = arith.constant 0 : i32
    return %arg0, %c0_i32, %c0_i32_0 : i32, i32, i32
  }
  func.func @transform_4(%arg0: i32) -> (i32, i32, i32, i32) {
    %c0_i32 = arith.constant 0 : i32
    %c0_i32_0 = arith.constant 0 : i32
    %c0_i32_1 = arith.constant 0 : i32
    %c0_i32_2 = arith.constant 0 : i32
    return %arg0, %c0_i32, %c0_i32_0, %c0_i32_1 : i32, i32, i32, i32
  }
}

module attributes {stable_mosaic.version = 11 : i64} {
  func.func @_ffn_res_ln_kernel(%arg0: i32, %arg1: i32, %arg2: memref<16x32xf32, #tpu.memory_space<vmem>>, %arg3: memref<32x64xf32, #tpu.memory_space<vmem>>, %arg4: memref<1x64xf32, #tpu.memory_space<vmem>>, %arg5: memref<64x32xf32, #tpu.memory_space<vmem>>, %arg6: memref<1x32xf32, #tpu.memory_space<vmem>>, %arg7: memref<1x32xf32, #tpu.memory_space<vmem>>, %arg8: memref<1x32xf32, #tpu.memory_space<vmem>>, %arg9: memref<16x32xf32, #tpu.memory_space<vmem>>, %arg10: memref<16x32xf32, #tpu.memory_space<vmem>>) attributes {dimension_semantics = [#tpu.dimension_semantics<parallel>, #tpu.dimension_semantics<arbitrary>], iteration_bounds = array<i64: 1, 1>, scalar_prefetch = 0 : i64, scratch_operands = 1 : i64, tpu.core_type = #tpu.core_type<tc>, window_params = [{transform_indices = @transform_0, window_bounds = array<i64: 16, 32>}, {transform_indices = @transform_1, window_bounds = array<i64: 32, 64>}, {transform_indices = @transform_2, window_bounds = array<i64: 1, 64>}, {transform_indices = @transform_3, window_bounds = array<i64: 64, 32>}, {pipeline_mode = #tpu.pipeline_mode<synchronous>, transform_indices = @transform_4, window_bounds = array<i64: 1, 32>}, {pipeline_mode = #tpu.pipeline_mode<synchronous>, transform_indices = @transform_5, window_bounds = array<i64: 1, 32>}, {pipeline_mode = #tpu.pipeline_mode<synchronous>, transform_indices = @transform_6, window_bounds = array<i64: 1, 32>}, {transform_indices = @transform_7, window_bounds = array<i64: 16, 32>}]} {
    %c0_i32 = arith.constant 0 : i32
    %0 = arith.cmpi eq, %arg1, %c0_i32 : i32
    %1 = arith.extui %0 : i1 to i32
    %c0_i32_0 = arith.constant 0 : i32
    %2 = arith.cmpi ne, %1, %c0_i32_0 : i32
    scf.if %2 {
      %cst_16 = arith.constant 0.000000e+00 : f32
      %19 = vector.broadcast %cst_16 : f32 to vector<16x32xf32>
      %c0_17 = arith.constant 0 : index
      %c0_18 = arith.constant 0 : index
      %20 = vector.load %arg10[%c0_17, %c0_18] : memref<16x32xf32, #tpu.memory_space<vmem>>, vector<16x32xf32>
      tpu.vector_store %arg10[%c0_17, %c0_18], %19 {strides = array<i32>} : memref<16x32xf32, #tpu.memory_space<vmem>>, vector<16x32xf32>,
    } else {
    }
    %c0 = arith.constant 0 : index
    %c0_1 = arith.constant 0 : index
    %3 = vector.load %arg2[%c0, %c0_1] : memref<16x32xf32, #tpu.memory_space<vmem>>, vector<16x32xf32>
    %c0_2 = arith.constant 0 : index
    %c0_3 = arith.constant 0 : index
    %4 = vector.load %arg3[%c0_2, %c0_3] : memref<32x64xf32, #tpu.memory_space<vmem>>, vector<32x64xf32>
    %cst = arith.constant dense<0.000000e+00> : vector<16x64xf32>
    %5 = tpu.matmul %3, %4, %cst {dimension_numbers = #tpu.dot_dimension_numbers<[1], [0], [0], [1], [0, 0, 1, 1], [], []>} : vector<16x32xf32>, vector<32x64xf32>, vector<16x64xf32> -> vector<16x64xf32>
    %c0_4 = arith.constant 0 : index
    %c0_5 = arith.constant 0 : index
    %6 = vector.load %arg4[%c0_4, %c0_5] : memref<1x64xf32, #tpu.memory_space<vmem>>, vector<1x64xf32>
    %7 = vector.broadcast %6 : vector<1x64xf32> to vector<16x64xf32>
    %8 = arith.addf %5, %7 : vector<16x64xf32>
    %cst_6 = arith.constant 0.000000e+00 : f32
    %9 = vector.broadcast %cst_6 : f32 to vector<16x64xf32>
    %10 = arith.maximumf %8, %9 : vector<16x64xf32>
    %c0_7 = arith.constant 0 : index
    %c0_8 = arith.constant 0 : index
    %11 = vector.load %arg10[%c0_7, %c0_8] : memref<16x32xf32, #tpu.memory_space<vmem>>, vector<16x32xf32>
    %c0_9 = arith.constant 0 : index
    %c0_10 = arith.constant 0 : index
    %12 = vector.load %arg5[%c0_9, %c0_10] : memref<64x32xf32, #tpu.memory_space<vmem>>, vector<64x32xf32>
    %cst_11 = arith.constant dense<0.000000e+00> : vector<16x32xf32>
    %13 = tpu.matmul %10, %12, %cst_11 {dimension_numbers = #tpu.dot_dimension_numbers<[1], [0], [0], [1], [0, 0, 1, 1], [], []>} : vector<16x64xf32>, vector<64x32xf32>, vector<16x32xf32> -> vector<16x32xf32>
    %14 = arith.addf %11, %13 : vector<16x32xf32>
    %c0_12 = arith.constant 0 : index
    %c0_13 = arith.constant 0 : index
    %15 = vector.load %arg10[%c0_12, %c0_13] : memref<16x32xf32, #tpu.memory_space<vmem>>, vector<16x32xf32>
    tpu.vector_store %arg10[%c0_12, %c0_13], %14 {strides = array<i32>} : memref<16x32xf32, #tpu.memory_space<vmem>>, vector<16x32xf32>,
    %c0_i32_14 = arith.constant 0 : i32
    %16 = arith.cmpi eq, %arg1, %c0_i32_14 : i32
    %17 = arith.extui %16 : i1 to i32
    %c0_i32_15 = arith.constant 0 : i32
    %18 = arith.cmpi ne, %17, %c0_i32_15 : i32
    scf.if %18 {
      %c0_16 = arith.constant 0 : index
      %c0_17 = arith.constant 0 : index
      %19 = vector.load %arg10[%c0_16, %c0_17] : memref<16x32xf32, #tpu.memory_space<vmem>>, vector<16x32xf32>
      %c0_18 = arith.constant 0 : index
      %c0_19 = arith.constant 0 : index
      %20 = vector.load %arg6[%c0_18, %c0_19] : memref<1x32xf32, #tpu.memory_space<vmem>>, vector<1x32xf32>
      %21 = vector.broadcast %20 : vector<1x32xf32> to vector<16x32xf32>
      %22 = arith.addf %19, %21 : vector<16x32xf32>
      %c0_20 = arith.constant 0 : index
      %c0_21 = arith.constant 0 : index
      %23 = vector.load %arg2[%c0_20, %c0_21] : memref<16x32xf32, #tpu.memory_space<vmem>>, vector<16x32xf32>
      %24 = arith.addf %22, %23 : vector<16x32xf32>
      %cst_22 = arith.constant dense<0.000000e+00> : vector<16xf32>
      %25 = vector.multi_reduction <add>, %24, %cst_22 [1] : vector<16x32xf32> to vector<16xf32>
      %26 = vector.shape_cast %25 : vector<16xf32> to vector<16x1xf32>
      %cst_23 = arith.constant 3.200000e+01 : f32
      %27 = vector.broadcast %cst_23 : f32 to vector<16x1xf32>
      %28 = arith.divf %26, %27 : vector<16x1xf32>
      %29 = vector.broadcast %28 : vector<16x1xf32> to vector<16x32xf32>
      %30 = arith.subf %24, %29 : vector<16x32xf32>
      %31 = arith.mulf %30, %30 : vector<16x32xf32>
      %cst_24 = arith.constant dense<0.000000e+00> : vector<16xf32>
      %32 = vector.multi_reduction <add>, %31, %cst_24 [1] : vector<16x32xf32> to vector<16xf32>
      %33 = vector.shape_cast %32 : vector<16xf32> to vector<16x1xf32>
      %cst_25 = arith.constant 3.200000e+01 : f32
      %34 = vector.broadcast %cst_25 : f32 to vector<16x1xf32>
      %35 = arith.divf %33, %34 : vector<16x1xf32>
      %36 = vector.broadcast %28 : vector<16x1xf32> to vector<16x32xf32>
      %37 = arith.subf %24, %36 : vector<16x32xf32>
      %cst_26 = arith.constant 9.99999974E-6 : f32
      %38 = vector.broadcast %cst_26 : f32 to vector<16x1xf32>
      %39 = arith.addf %35, %38 : vector<16x1xf32>
      %40 = math.rsqrt %39 : vector<16x1xf32>
      %41 = vector.broadcast %40 : vector<16x1xf32> to vector<16x32xf32>
      %42 = arith.mulf %37, %41 : vector<16x32xf32>
      %c0_27 = arith.constant 0 : index
      %c0_28 = arith.constant 0 : index
      %43 = vector.load %arg7[%c0_27, %c0_28] : memref<1x32xf32, #tpu.memory_space<vmem>>, vector<1x32xf32>
      %44 = vector.broadcast %43 : vector<1x32xf32> to vector<16x32xf32>
      %45 = arith.mulf %42, %44 : vector<16x32xf32>
      %c0_29 = arith.constant 0 : index
      %c0_30 = arith.constant 0 : index
      %46 = vector.load %arg8[%c0_29, %c0_30] : memref<1x32xf32, #tpu.memory_space<vmem>>, vector<1x32xf32>
      %47 = vector.broadcast %46 : vector<1x32xf32> to vector<16x32xf32>
      %48 = arith.addf %45, %47 : vector<16x32xf32>
      %c0_31 = arith.constant 0 : index
      %c0_32 = arith.constant 0 : index
      %49 = vector.load %arg9[%c0_31, %c0_32] : memref<16x32xf32, #tpu.memory_space<vmem>>, vector<16x32xf32>
      tpu.vector_store %arg9[%c0_31, %c0_32], %48 {strides = array<i32>} : memref<16x32xf32, #tpu.memory_space<vmem>>, vector<16x32xf32>,
    } else {
    }
    return
  }
  func.func @transform_0(%arg0: i32, %arg1: i32) -> (i32, i32) {
    %c0_i32 = arith.constant 0 : i32
    %c0_i32_0 = arith.constant 0 : i32
    return %arg0, %c0_i32 : i32, i32
  }
  func.func @transform_1(%arg0: i32, %arg1: i32) -> (i32, i32) {
    %c0_i32 = arith.constant 0 : i32
    %c0_i32_0 = arith.constant 0 : i32
    return %c0_i32, %arg1 : i32, i32
  }
  func.func @transform_2(%arg0: i32, %arg1: i32) -> (i32, i32) {
    %c0_i32 = arith.constant 0 : i32
    %c0_i32_0 = arith.constant 0 : i32
    return %c0_i32, %arg1 : i32, i32
  }
  func.func @transform_3(%arg0: i32, %arg1: i32) -> (i32, i32) {
    %c0_i32 = arith.constant 0 : i32
    %c0_i32_0 = arith.constant 0 : i32
    return %arg1, %c0_i32 : i32, i32
  }
  func.func @transform_4(%arg0: i32, %arg1: i32) -> (i32, i32) {
    %c0_i32 = arith.constant 0 : i32
    %c0_i32_0 = arith.constant 0 : i32
    %c0_i32_1 = arith.constant 0 : i32
    return %c0_i32, %c0_i32_0 : i32, i32
  }
  func.func @transform_5(%arg0: i32, %arg1: i32) -> (i32, i32) {
    %c0_i32 = arith.constant 0 : i32
    %c0_i32_0 = arith.constant 0 : i32
    %c0_i32_1 = arith.constant 0 : i32
    return %c0_i32, %c0_i32_0 : i32, i32
  }
  func.func @transform_6(%arg0: i32, %arg1: i32) -> (i32, i32) {
    %c0_i32 = arith.constant 0 : i32
    %c0_i32_0 = arith.constant 0 : i32
    %c0_i32_1 = arith.constant 0 : i32
    return %c0_i32, %c0_i32_0 : i32, i32
  }
  func.func @transform_7(%arg0: i32, %arg1: i32) -> (i32, i32) {
    %c0_i32 = arith.constant 0 : i32
    %c0_i32_0 = arith.constant 0 : i32
    return %arg0, %c0_i32 : i32, i32
  }
}

module attributes {stable_mosaic.version = 11 : i64} {
  func.func @_ln_kernel(%arg0: i32, %arg1: memref<16x32xf32, #tpu.memory_space<vmem>>, %arg2: memref<1x32xf32, #tpu.memory_space<vmem>>, %arg3: memref<1x32xf32, #tpu.memory_space<vmem>>, %arg4: memref<16x32xf32, #tpu.memory_space<vmem>>) attributes {dimension_semantics = [#tpu.dimension_semantics<parallel>], iteration_bounds = array<i64: 1>, scalar_prefetch = 0 : i64, scratch_operands = 0 : i64, tpu.core_type = #tpu.core_type<tc>, window_params = [{transform_indices = @transform_0, window_bounds = array<i64: 16, 32>}, {pipeline_mode = #tpu.pipeline_mode<synchronous>, transform_indices = @transform_1, window_bounds = array<i64: 1, 32>}, {pipeline_mode = #tpu.pipeline_mode<synchronous>, transform_indices = @transform_2, window_bounds = array<i64: 1, 32>}, {transform_indices = @transform_3, window_bounds = array<i64: 16, 32>}]} {
    %c0 = arith.constant 0 : index
    %c0_0 = arith.constant 0 : index
    %0 = vector.load %arg1[%c0, %c0_0] : memref<16x32xf32, #tpu.memory_space<vmem>>, vector<16x32xf32>
    %cst = arith.constant dense<0.000000e+00> : vector<16xf32>
    %1 = vector.multi_reduction <add>, %0, %cst [1] : vector<16x32xf32> to vector<16xf32>
    %2 = vector.shape_cast %1 : vector<16xf32> to vector<16x1xf32>
    %cst_1 = arith.constant 3.200000e+01 : f32
    %3 = vector.broadcast %cst_1 : f32 to vector<16x1xf32>
    %4 = arith.divf %2, %3 : vector<16x1xf32>
    %5 = vector.broadcast %4 : vector<16x1xf32> to vector<16x32xf32>
    %6 = arith.subf %0, %5 : vector<16x32xf32>
    %7 = arith.mulf %6, %6 : vector<16x32xf32>
    %cst_2 = arith.constant dense<0.000000e+00> : vector<16xf32>
    %8 = vector.multi_reduction <add>, %7, %cst_2 [1] : vector<16x32xf32> to vector<16xf32>
    %9 = vector.shape_cast %8 : vector<16xf32> to vector<16x1xf32>
    %cst_3 = arith.constant 3.200000e+01 : f32
    %10 = vector.broadcast %cst_3 : f32 to vector<16x1xf32>
    %11 = arith.divf %9, %10 : vector<16x1xf32>
    %12 = vector.broadcast %4 : vector<16x1xf32> to vector<16x32xf32>
    %13 = arith.subf %0, %12 : vector<16x32xf32>
    %cst_4 = arith.constant 9.99999974E-6 : f32
    %14 = vector.broadcast %cst_4 : f32 to vector<16x1xf32>
    %15 = arith.addf %11, %14 : vector<16x1xf32>
    %16 = math.rsqrt %15 : vector<16x1xf32>
    %17 = vector.broadcast %16 : vector<16x1xf32> to vector<16x32xf32>
    %18 = arith.mulf %13, %17 : vector<16x32xf32>
    %c0_5 = arith.constant 0 : index
    %c0_6 = arith.constant 0 : index
    %19 = vector.load %arg2[%c0_5, %c0_6] : memref<1x32xf32, #tpu.memory_space<vmem>>, vector<1x32xf32>
    %20 = vector.broadcast %19 : vector<1x32xf32> to vector<16x32xf32>
    %21 = arith.mulf %18, %20 : vector<16x32xf32>
    %c0_7 = arith.constant 0 : index
    %c0_8 = arith.constant 0 : index
    %22 = vector.load %arg3[%c0_7, %c0_8] : memref<1x32xf32, #tpu.memory_space<vmem>>, vector<1x32xf32>
    %23 = vector.broadcast %22 : vector<1x32xf32> to vector<16x32xf32>
    %24 = arith.addf %21, %23 : vector<16x32xf32>
    %c0_9 = arith.constant 0 : index
    %c0_10 = arith.constant 0 : index
    %25 = vector.load %arg4[%c0_9, %c0_10] : memref<16x32xf32, #tpu.memory_space<vmem>>, vector<16x32xf32>
    tpu.vector_store %arg4[%c0_9, %c0_10], %24 {strides = array<i32>} : memref<16x32xf32, #tpu.memory_space<vmem>>, vector<16x32xf32>,
    return
  }
  func.func @transform_0(%arg0: i32) -> (i32, i32) {
    %c0_i32 = arith.constant 0 : i32
    %c0_i32_0 = arith.constant 0 : i32
    return %arg0, %c0_i32 : i32, i32
  }
  func.func @transform_1(%arg0: i32) -> (i32, i32) {
    %c0_i32 = arith.constant 0 : i32
    %c0_i32_0 = arith.constant 0 : i32
    %c0_i32_1 = arith.constant 0 : i32
    return %c0_i32, %c0_i32_0 : i32, i32
  }
  func.func @transform_2(%arg0: i32) -> (i32, i32) {
    %c0_i32 = arith.constant 0 : i32
    %c0_i32_0 = arith.constant 0 : i32
    %c0_i32_1 = arith.constant 0 : i32
    return %c0_i32, %c0_i32_0 : i32, i32
  }
  func.func @transform_3(%arg0: i32) -> (i32, i32) {
    %c0_i32 = arith.constant 0 : i32
    %c0_i32_0 = arith.constant 0 : i32
    return %arg0, %c0_i32 : i32, i32
  }
}

module attributes {stable_mosaic.version = 11 : i64} {
  func.func @_matmul_bias_kernel(%arg0: i32, %arg1: i32, %arg2: i32, %arg3: memref<16x32xf32, #tpu.memory_space<vmem>>, %arg4: memref<32x60xf32, #tpu.memory_space<vmem>>, %arg5: memref<1x60xf32, #tpu.memory_space<vmem>>, %arg6: memref<16x60xf32, #tpu.memory_space<vmem>>, %arg7: memref<16x60xf32, #tpu.memory_space<vmem>>) attributes {dimension_semantics = [#tpu.dimension_semantics<parallel>, #tpu.dimension_semantics<parallel>, #tpu.dimension_semantics<arbitrary>], iteration_bounds = array<i64: 1, 1, 1>, scalar_prefetch = 0 : i64, scratch_operands = 1 : i64, tpu.core_type = #tpu.core_type<tc>, window_params = [{transform_indices = @transform_0, window_bounds = array<i64: 16, 32>}, {transform_indices = @transform_1, window_bounds = array<i64: 32, 60>}, {transform_indices = @transform_2, window_bounds = array<i64: 1, 60>}, {transform_indices = @transform_3, window_bounds = array<i64: 16, 60>}]} {
    %c0_i32 = arith.constant 0 : i32
    %0 = arith.cmpi eq, %arg2, %c0_i32 : i32
    %1 = arith.extui %0 : i1 to i32
    %c0_i32_0 = arith.constant 0 : i32
    %2 = arith.cmpi ne, %1, %c0_i32_0 : i32
    scf.if %2 {
      %cst_10 = arith.constant 0.000000e+00 : f32
      %12 = vector.broadcast %cst_10 : f32 to vector<16x60xf32>
      %c0_11 = arith.constant 0 : index
      %c0_12 = arith.constant 0 : index
      %13 = vector.load %arg7[%c0_11, %c0_12] : memref<16x60xf32, #tpu.memory_space<vmem>>, vector<16x60xf32>
      tpu.vector_store %arg7[%c0_11, %c0_12], %12 {strides = array<i32>} : memref<16x60xf32, #tpu.memory_space<vmem>>, vector<16x60xf32>,
    } else {
    }
    %c0 = arith.constant 0 : index
    %c0_1 = arith.constant 0 : index
    %3 = vector.load %arg7[%c0, %c0_1] : memref<16x60xf32, #tpu.memory_space<vmem>>, vector<16x60xf32>
    %c0_2 = arith.constant 0 : index
    %c0_3 = arith.constant 0 : index
    %4 = vector.load %arg3[%c0_2, %c0_3] : memref<16x32xf32, #tpu.memory_space<vmem>>, vector<16x32xf32>
    %c0_4 = arith.constant 0 : index
    %c0_5 = arith.constant 0 : index
    %5 = vector.load %arg4[%c0_4, %c0_5] : memref<32x60xf32, #tpu.memory_space<vmem>>, vector<32x60xf32>
    %cst = arith.constant dense<0.000000e+00> : vector<16x60xf32>
    %6 = tpu.matmul %4, %5, %cst {dimension_numbers = #tpu.dot_dimension_numbers<[1], [0], [0], [1], [0, 0, 1, 1], [], []>} : vector<16x32xf32>, vector<32x60xf32>, vector<16x60xf32> -> vector<16x60xf32>
    %7 = arith.addf %3, %6 : vector<16x60xf32>
    %c0_6 = arith.constant 0 : index
    %c0_7 = arith.constant 0 : index
    %8 = vector.load %arg7[%c0_6, %c0_7] : memref<16x60xf32, #tpu.memory_space<vmem>>, vector<16x60xf32>
    tpu.vector_store %arg7[%c0_6, %c0_7], %7 {strides = array<i32>} : memref<16x60xf32, #tpu.memory_space<vmem>>, vector<16x60xf32>,
    %c0_i32_8 = arith.constant 0 : i32
    %9 = arith.cmpi eq, %arg2, %c0_i32_8 : i32
    %10 = arith.extui %9 : i1 to i32
    %c0_i32_9 = arith.constant 0 : i32
    %11 = arith.cmpi ne, %10, %c0_i32_9 : i32
    scf.if %11 {
      %c0_10 = arith.constant 0 : index
      %c0_11 = arith.constant 0 : index
      %12 = vector.load %arg7[%c0_10, %c0_11] : memref<16x60xf32, #tpu.memory_space<vmem>>, vector<16x60xf32>
      %c0_12 = arith.constant 0 : index
      %c0_13 = arith.constant 0 : index
      %13 = vector.load %arg5[%c0_12, %c0_13] : memref<1x60xf32, #tpu.memory_space<vmem>>, vector<1x60xf32>
      %14 = vector.broadcast %13 : vector<1x60xf32> to vector<16x60xf32>
      %15 = arith.addf %12, %14 : vector<16x60xf32>
      %c0_14 = arith.constant 0 : index
      %c0_15 = arith.constant 0 : index
      %16 = vector.load %arg6[%c0_14, %c0_15] : memref<16x60xf32, #tpu.memory_space<vmem>>, vector<16x60xf32>
      tpu.vector_store %arg6[%c0_14, %c0_15], %15 {strides = array<i32>} : memref<16x60xf32, #tpu.memory_space<vmem>>, vector<16x60xf32>,
    } else {
    }
    return
  }
  func.func @transform_0(%arg0: i32, %arg1: i32, %arg2: i32) -> (i32, i32) {
    %c0_i32 = arith.constant 0 : i32
    return %arg0, %arg2 : i32, i32
  }
  func.func @transform_1(%arg0: i32, %arg1: i32, %arg2: i32) -> (i32, i32) {
    %c0_i32 = arith.constant 0 : i32
    return %arg2, %arg1 : i32, i32
  }
  func.func @transform_2(%arg0: i32, %arg1: i32, %arg2: i32) -> (i32, i32) {
    %c0_i32 = arith.constant 0 : i32
    %c0_i32_0 = arith.constant 0 : i32
    return %c0_i32, %arg1 : i32, i32
  }
  func.func @transform_3(%arg0: i32, %arg1: i32, %arg2: i32) -> (i32, i32) {
    %c0_i32 = arith.constant 0 : i32
    return %arg0, %arg1 : i32, i32
  }
}

</mosaic_0001>

<bundles_post_ra>
// kernel: transformer_forward.27
= control target key start
LH: loop header
LB: loop body
LE: loop exit
PB: predicated region body
PF: predicated region fallthrough
CT: control target
= control target key end

     0   :  { %vm18_vm0 = vcmask 785408   ;;  %v110_v2 = vmov 0.0   ;;  %vm33_vm1 = vcmask 261120   ;;  %vm21_vm2 = vcmask 781312   ;;  %s173_s1 = inlined_call_operand.vmem [shape: f32[32,96], index: 1, kind: input, shape index: {}]   ;;  %s174_s0 = inlined_call_operand.vmem [shape: f32[20,32], index: 0, kind: input, shape index: {}]   ;;  %s175_s2 = inlined_call_operand.vmem [shape: f32[1,96], index: 2, kind: input, shape index: {}]   ;;  %s176_s3 = inlined_call_operand.vmem [shape: f32[20,96], index: 3, kind: output, shape index: {}]  }
   0x1   :  { %v32_v0 = vld [vmem:[%s173_s1 + $0x18] sm:$0xff]  ;;  %v31_v1 = vld [vmem:[%s173_s1 + $0x10] sm:$0xff]  ;;  %19 = vst.msk [vmem:[#allocation2] sm:$0xff] %vm18_vm0, %v110_v2  ;;  %v30_v3 = vld [vmem:[%s173_s1 + $0x8] sm:$0xff] }
   0x2   :  { %101 = vmatpush.msra.mxu2 %v32_v0  ;;  %55 = vmatpush.msra.mxu0 %v32_v0  ;;  %20 = vst.msk [vmem:[#allocation2 + $0x8] sm:$0xff] %vm18_vm0, %v110_v2  ;;  %v29_v4 = vld [vmem:[%s173_s1] sm:$0xff]  ;;  %v28_v5 = vld [vmem:[%s174_s0 + $0x10] sm:$0xf]  ;;  %v27_v7 = vld [vmem:[%s174_s0 + $0x8] sm:$0xff] }
   0x3   :  { %100 = vmatpush.msra.mxu1 %v32_v0  ;;  %v26_v6 = vld [vmem:[%s174_s0] sm:$0xff]  ;;  %22 = vst.msk [vmem:[#allocation2 + $0x10] sm:$0xf] %vm21_vm2, %v110_v2 }
   0x4   :  { %103 = vmatpush.msra.mxu2 %v31_v1  ;;  %56 = vmatpush.msra.mxu0 %v31_v1  ;;  %v109_v17 = vld [vmem:[%s175_s2] ss:$0 sm:$0xff] }
   0x5   :  { %102 = vmatpush.msra.mxu1 %v31_v1 }
   0x6   :  { %105 = vmatpush.msra.mxu2 %v30_v3  ;;  %57 = vmatpush.msra.mxu0 %v30_v3 }
   0x7   :  { %104 = vmatpush.msra.mxu1 %v30_v3 }
   0x8   :  { %107 = vmatpush.msra.mxu2 %v29_v4  ;;  %58 = vmatpush.msra.mxu0 %v29_v4  ;;  %v23_v8 = vld [vmem:[#allocation2] sm:$0xff] }
   0x9   :  { %99 = vmatmul.msk.f32.vlgmr.msra.gmra.mxu2 %vm33_vm1, %v28_v5  ;;  %106 = vmatpush.msra.mxu1 %v29_v4  ;;  %v24_v9 = vld [vmem:[#allocation2 + $0x8] sm:$0xff] }
   0xa   :  { %97 = vmatmul.msk.f32.vlgmr.msra.gmra.mxu0 %vm33_vm1, %v26_v6  ;;  %98 = vmatmul.msk.f32.vlgmr.msra.gmra.mxu1 %vm33_vm1, %v27_v7  ;;  %v25_v14 = vld [vmem:[#allocation2 + $0x10] sm:$0xf] }
  0x87   :  { %v60_v10 = vpop.f32.mrf.mxu0  ;;  %v63_v11 = vpop.f32.mrf.mxu1 }
  0x88   :  { %v69_v12 = vadd.f32 %v60_v10, %v23_v8  ;;  %v70_v13 = vadd.f32 %v63_v11, %v24_v9 }
  0x8a   :  { %73 = vst.msk [vmem:[#allocation2] sm:$0xff] %vm18_vm0, %v69_v12 }
  0x8b   :  { %74 = vst.msk [vmem:[#allocation2 + $0x8] sm:$0xff] %vm18_vm0, %v70_v13 }
  0x8c   :  { %v66_v15 = vpop.f32.mrf.mxu2 }
  0x8d   :  { %v71_v16 = vadd.f32 %v66_v15, %v25_v14 }
  0x8f   :  { %76 = vst.msk [vmem:[#allocation2 + $0x10] sm:$0xf] %vm21_vm2, %v71_v16 }
  0x91   :  { %v80_v18 = vld [vmem:[#allocation2] sm:$0xff] }
  0x92   :  { %v81_v19 = vld [vmem:[#allocation2 + $0x8] sm:$0xff]  ;;  %v87_v20 = vadd.f32 %v109_v17, %v80_v18 }
  0x93   :  { %v88_v21 = vadd.f32 %v109_v17, %v81_v19 }
  0x94   :  { %90 = vst.msk [vmem:[%s176_s3] sm:$0xff] %vm18_vm0, %v87_v20 }
  0x95   :  { %91 = vst.msk [vmem:[%s176_s3 + $0x8] sm:$0xff] %vm18_vm0, %v88_v21 }
  0x96   :  { %v82_v22 = vld [vmem:[#allocation2 + $0x10] sm:$0xf] }
  0x97   :  { %v89_v23 = vadd.f32 %v109_v17, %v82_v22 }
  0x99   :  { %92 = vst.msk [vmem:[%s176_s3 + $0x10] sm:$0xf] %vm21_vm2, %v89_v23 }

// kernel: transformer_forward.28
= control target key start
LH: loop header
LB: loop body
LE: loop exit
PB: predicated region body
PF: predicated region fallthrough
CT: control target
= control target key end

     0   :  { %s874_s15 = smov 0   ;;  %s979_s0 = inlined_call_operand.vmem [shape: f32[2,4,10,8], index: 0, kind: input, shape index: {}]   ;;  %s980_s1 = inlined_call_operand.vmem [shape: f32[2,4,10,8], index: 1, kind: input, shape index: {}]   ;;  %s981_s2 = inlined_call_operand.vmem [shape: f32[2,4,10,8], index: 2, kind: input, shape index: {}]   ;;  %s982_s3 = inlined_call_operand.vmem [shape: f32[2,1,10], index: 3, kind: input, shape index: {}]   ;;  %s983_s4 = inlined_call_operand.vmem [shape: f32[2,4,10,8], index: 4, kind: output, shape index: {}]  }
   0x1 LB: > { %s753_s16 = sadd.s32 4294967295, %s847_s15   ;;  %p757_p0 = scmp.ge.s32.totalorder %s847_s15, 1  ;;  %s847_s15 = sphi %s874_s15, %s14_s15  }
   0x2   : > { %p190_p1 = scmp.lt.s32.totalorder %s847_s15, 3 }
   0x4   : > { %p191_p2 = pnand %p757_p0, %p190_p1 }
   0x5   : > { %p229_p3 = scmp.lt.s32.totalorder (!%p191_p2), %s753_s16, 1 }
   0x6   : > { %194 = sbr.rel (%p191_p2) target bundleno = 565 (0x235), region = 36 }
   0xb   : > { %s985_s16 = smov (!%p229_p3, %s753_s16), 1  ;;  %vm277_vm0 = vcmask 64512   ;;  %vm437_vm1 = vcmask 80896   ;;  %vm441_vm2 = vcmask 74752   ;;  %vm533_vm3 = vcmask 1041408  }
   0xc   : > { %s885_s17 = sshll.u32 %s985_s16, 6  ;;  %s246_s20 = scalar_lea.vmem %s982_s3, %s985_s16  ;;  %vm657_vm4 = vcmask 58368  }
   0xd   : > { %s238_s23 = scalar_lea.vmem %s980_s1, %s885_s17  ;;  %s233_s26 = scalar_lea.vmem %s979_s0, %s885_s17  ;;  %v808_v16 = vld [vmem:[%s246_s20] ss:$0 sm:$0xff] }
   0xe   : > { %v261_v0 = vld [vmem:[%s238_s23 + $0x8] sm:$0x3]  ;;  %v260_v2 = vld [vmem:[%s238_s23] sm:$0xff]  ;;  %v263_v4 = vld [vmem:[%s238_s23 + $0x18] sm:$0x3]  ;;  %s243_s5 = scalar_lea.vmem %s981_s2, %s885_s17  ;;  %s251_s8 = scalar_lea.vmem %s983_s4, %s885_s17 }
   0xf   : > { %v265_v1 = vld [vmem:[%s238_s23 + $0x28] sm:$0x3]  ;;  %766 = vmatpush.xpose.msk.msra.mxu0 %vm277_vm0, %v261_v0  ;;  %v264_v3 = vld [vmem:[%s238_s23 + $0x20] sm:$0xff]  ;;  %v267_v5 = vld [vmem:[%s238_s23 + $0x38] sm:$0x3]  ;;  %770 = vmatpush.xpose.msk.msra.mxu1 %vm277_vm0, %v263_v4 }
  0x10   : > { %774 = vmatpush.xpose.msk.msra.mxu2 %vm277_vm0, %v265_v1  ;;  %778 = vmatpush.xpose.msk.msra.mxu3 %vm277_vm0, %v267_v5  ;;  %v262_v6 = vld [vmem:[%s238_s23 + $0x10] sm:$0xff]  ;;  %v252_v8 = vld [vmem:[%s233_s26] sm:$0xff]  ;;  %v257_v12 = vld [vmem:[%s233_s26 + $0x28] sm:$0x3] }
  0x11   : > { %v266_v7 = vld [vmem:[%s238_s23 + $0x30] sm:$0xff]  ;;  %v256_v9 = vld [vmem:[%s233_s26 + $0x20] sm:$0xff]  ;;  %v253_v13 = vld [vmem:[%s233_s26 + $0x8] sm:$0x3] }
  0x12   : > { %v254_v10 = vld [vmem:[%s233_s26 + $0x10] sm:$0xff]  ;;  %v255_v14 = vld [vmem:[%s233_s26 + $0x18] sm:$0x3] }
  0x13   : > { %767 = vmatpush.xpose.msk.msra.mxu0 %vm277_vm0, %v260_v2  ;;  %771 = vmatpush.xpose.msk.msra.mxu1 %vm277_vm0, %v262_v6  ;;  %v258_v11 = vld [vmem:[%s233_s26 + $0x30] sm:$0xff]  ;;  %v259_v15 = vld [vmem:[%s233_s26 + $0x38] sm:$0x3] }
  0x14   : > { %775 = vmatpush.xpose.msk.msra.mxu2 %vm277_vm0, %v264_v3  ;;  %779 = vmatpush.xpose.msk.msra.mxu3 %vm277_vm0, %v266_v7 }
  0x16   : > { %768 = vmatmul.msk.f32.vlgmr.msra.gmra.mxu0 %vm277_vm0, %v252_v8  ;;  %772 = vmatmul.msk.f32.vlgmr.msra.gmra.mxu1 %vm277_vm0, %v254_v10 }
  0x17   : > { %776 = vmatmul.msk.f32.vlgmr.msra.gmra.mxu2 %vm277_vm0, %v256_v9  ;;  %780 = vmatmul.msk.f32.vlgmr.msra.gmra.mxu3 %vm277_vm0, %v258_v11 }
  0x1e   : > { %769 = vmatmul.msk.f32.gmra.mxu0 %vm277_vm0, %v253_v13  ;;  %773 = vmatmul.msk.f32.gmra.mxu1 %vm277_vm0, %v255_v14 }
  0x1f   : > { %777 = vmatmul.msk.f32.gmra.mxu2 %vm277_vm0, %v257_v12  ;;  %781 = vmatmul.msk.f32.gmra.mxu3 %vm277_vm0, %v259_v15 }
  0x93   : > { %v307_v17 = vpop.f32.mrf.mxu0  ;;  %v342_v19 = vpop.f32.mrf.mxu1 }
  0x94   : > { %v418_v18 = vmul.f32 0.35355338, %v307_v17  ;;  %v420_v21 = vmul.f32 0.35355338, %v342_v19 }
  0x96   : > { %v429_v20 = vadd.f32 %v808_v16, %v418_v18  ;;  %v431_v25 = vadd.f32 %v808_v16, %v420_v21 }
  0x98   : > { %v438_v22 = vsel %vm437_vm1, %v429_v20, -inf  ;;  %v445_v31 = vsel %vm437_vm1, %v431_v25, -inf }
  0x99   : > { %439 = vmax.xlane.f32.xlu1 %v438_v22 }
  0x9a   : > { %v377_v23 = vpop.f32.mrf.mxu2  ;;  %v412_v26 = vpop.f32.mrf.mxu3 }
  0x9b   : > { %v422_v24 = vmul.f32 0.35355338, %v377_v23  ;;  %v424_v28 = vmul.f32 0.35355338, %v412_v26  ;;  %v345_v29 = vpop.f32.mrf.mxu1  ;;  %v310_v35 = vpop.f32.mrf.mxu0  ;;  %v268_v26 = vld [vmem:[%s243_s5] sm:$0xff] }
  0x9c   : > { %v421_v32 = vmul.f32 0.35355338, %v345_v29  ;;  %v419_v42 = vmul.f32 0.35355338, %v310_v35  ;;  %v272_v29 = vld [vmem:[%s243_s5 + $0x20] sm:$0xff] }
  0x9d   : > { %v433_v27 = vadd.f32 %v808_v16, %v422_v24  ;;  %v435_v33 = vadd.f32 %v808_v16, %v424_v28  ;;  %v275_v28 = vld [vmem:[%s243_s5 + $0x38] sm:$0x3] }
  0x9e   : > { %v432_v37 = vadd.f32 %v808_v16, %v421_v32  ;;  %v430_v46 = vadd.f32 %v808_v16, %v419_v42  ;;  %791 = vmatpush.msk.msrb.mxu3 %vm533_vm3, %v275_v28  ;;  %v270_v32 = vld [vmem:[%s243_s5 + $0x10] sm:$0xff] }
  0x9f   : > { %v451_v30 = vsel %vm437_vm1, %v433_v27, -inf  ;;  %v457_v39 = vsel %vm437_vm1, %v435_v33, -inf }
  0xa0   : > { %452 = vmax.xlane.f32.xlu0 %v451_v30  ;;  %v448_v44 = vsel %vm441_vm2, %v432_v37, -inf  ;;  %v442_v48 = vsel %vm441_vm2, %v430_v46, -inf  ;;  %v271_v30 = vld [vmem:[%s243_s5 + $0x18] sm:$0x3] }
  0xa1   : > { %446 = vmax.xlane.f32.xlu1 %v445_v31  ;;  %v274_v31 = vld [vmem:[%s243_s5 + $0x30] sm:$0xff]  ;;  %785 = vmatpush.msk.msrb.mxu1 %vm533_vm3, %v271_v30 }
  0xa2   : > { %v380_v34 = vpop.f32.mrf.mxu2  ;;  %v415_v38 = vpop.f32.mrf.mxu3  ;;  %648 = vmatpush.msrb.mxu3 %v274_v31 }
  0xa3   : > { %v423_v36 = vmul.f32 0.35355338, %v380_v34  ;;  %v425_v41 = vmul.f32 0.35355338, %v415_v38  ;;  %584 = vmatpush.msrb.mxu1 %v270_v32 }
  0xa5   : > { %v434_v40 = vadd.f32 %v808_v16, %v423_v36  ;;  %v436_v45 = vadd.f32 %v808_v16, %v425_v41 }
  0xa7   : > { %v454_v43 = vsel %vm441_vm2, %v434_v40, -inf  ;;  %v460_v47 = vsel %vm441_vm2, %v436_v45, -inf }
  0xa8   : > { %458 = vmax.xlane.f32.xlu0 %v457_v39  ;;  %455 = vmax.xlane.f32.xlu2 %v454_v43 }
  0xa9   : > { %449 = vmax.xlane.f32.xlu1 %v448_v44 }
  0xb0   : > { %461 = vmax.xlane.f32.xlu2 %v460_v47  ;;  %443 = vmax.xlane.f32.xlu0 %v442_v48 }
 0x10c   : > { %v440_v49 = vpop.xlane.xlu1 %439 }
 0x10d   : > { %v463_v50 = vsub.f32 %v429_v20, %v440_v49 }
 0x10f   : > { %v471_v51 = vmul.f32 1.442695, %v463_v50 }
 0x111   : > { %809 = vpow2.f32 %v471_v51 }
 0x113   : > { %v453_v52 = vpop.xlane.xlu0 %452 }
 0x114   : > { %v467_v53 = vsub.f32 %v433_v27, %v453_v52  ;;  %v447_v54 = vpop.xlane.xlu1 %446  ;;  %v273_v27 = vld [vmem:[%s243_s5 + $0x28] sm:$0x3] }
 0x115   : > { %v465_v56 = vsub.f32 %v431_v25, %v447_v54  ;;  %v269_v25 = vld [vmem:[%s243_s5 + $0x8] sm:$0x3]  ;;  %788 = vmatpush.msk.msrb.mxu2 %vm533_vm3, %v273_v27 }
 0x116   : > { %v479_v55 = vmul.f32 1.442695, %v467_v53  ;;  %782 = vmatpush.msk.msrb.mxu0 %vm533_vm3, %v269_v25 }
 0x117   : > { %v928_v57 = vpop.eup %809  ;;  %v475_v59 = vmul.f32 1.442695, %v465_v56  ;;  %616 = vmatpush.msrb.mxu2 %v272_v29 }
 0x118   : > { %811 = vpow2.f32 %v479_v55  ;;  %v487_v58 = vsel %vm437_vm1, %v928_v57, 0.0  ;;  %552 = vmatpush.msrb.mxu0 %v268_v26 }
 0x119   : > { %488 = vadd.xlane.f32.xlu1 %v487_v58  ;;  %813 = vpow2.f32 %v475_v59 }
 0x11b   : > { %v459_v60 = vpop.xlane.xlu0 %458  ;;  %v456_v61 = vpop.xlane.xlu2 %455 }
 0x11c   : > { %v469_v62 = vsub.f32 %v435_v33, %v459_v60  ;;  %v468_v1 = vsub.f32 %v434_v40, %v456_v61  ;;  %v450_v4 = vpop.xlane.xlu1 %449 }
 0x11d   : > { %v466_v11 = vsub.f32 %v432_v37, %v450_v4 }
 0x11e   : > { %v932_v63 = vpop.eup %811  ;;  %v483_v0 = vmul.f32 1.442695, %v469_v62  ;;  %v481_v3 = vmul.f32 1.442695, %v468_v1 }
 0x11f   : > { %v499_v2 = vsel %vm437_vm1, %v932_v63, 0.0  ;;  %v936_v7 = vpop.eup %813  ;;  %v477_v16 = vmul.f32 1.442695, %v466_v11 }
 0x120   : > { %815 = vpow2.f32 %v483_v0  ;;  %500 = vadd.xlane.f32.xlu2 %v499_v2  ;;  %v493_v14 = vsel %vm437_vm1, %v936_v7, 0.0 }
 0x121   : > { %817 = vpow2.f32 %v481_v3 }
 0x123   : > { %v462_v5 = vpop.xlane.xlu2 %461  ;;  %v444_v6 = vpop.xlane.xlu0 %443 }
 0x124   : > { %v470_v8 = vsub.f32 %v436_v45, %v462_v5  ;;  %v464_v9 = vsub.f32 %v430_v46, %v444_v6 }
 0x126   : > { %v938_v10 = vpop.eup %815  ;;  %v485_v12 = vmul.f32 1.442695, %v470_v8  ;;  %v473_v13 = vmul.f32 1.442695, %v464_v9 }
 0x127   : > { %v505_v15 = vsel %vm437_vm1, %v938_v10, 0.0  ;;  %v944_v17 = vpop.eup %817 }
 0x128   : > { %819 = vpow2.f32 %v485_v12  ;;  %494 = vadd.xlane.f32.xlu2 %v493_v14  ;;  %506 = vadd.xlane.f32.xlu0 %v505_v15  ;;  %v502_v21 = vsel %vm441_vm2, %v944_v17, 0.0 }
 0x129   : > { %821 = vpow2.f32 %v473_v13 }
 0x12a   : > { %823 = vpow2.f32 %v477_v16 }
 0x12e   : > { %v820_v18 = vpop.eup %819 }
 0x12f   : > { %v822_v19 = vpop.eup %821  ;;  %v508_v20 = vsel %vm441_vm2, %v820_v18, 0.0 }
 0x130   : > { %509 = vadd.xlane.f32.xlu1 %v508_v20  ;;  %503 = vadd.xlane.f32.xlu0 %v502_v21  ;;  %v490_v22 = vsel %vm441_vm2, %v822_v19, 0.0  ;;  %v824_v23 = vpop.eup %823 }
 0x131   : > { %491 = vadd.xlane.f32.xlu2 %v490_v22  ;;  %v496_v24 = vsel %vm441_vm2, %v824_v23, 0.0 }
 0x138   : > { %497 = vadd.xlane.f32.xlu0 %v496_v24 }
 0x18c   : > { %v489_v33 = vpop.xlane.xlu1 %488 }
 0x18d   : > { %825 = vrcp.f32 %v489_v33 }
 0x193   : > { %v501_v34 = vpop.xlane.xlu2 %500  ;;  %v826_v35 = vpop.eup %825 }
 0x194   : > { %827 = vrcp.f32 %v501_v34  ;;  %v519_v36 = vmul.f32 %v826_v35, %v928_v57 }
 0x196   : > { %783 = vmatmul.msk.f32.vlgmr.msrb.gmra.mxu0 %vm437_vm1, %v519_v36 }
 0x19a   : > { %v828_v37 = vpop.eup %827 }
 0x19b   : > { %v495_v38 = vpop.xlane.xlu2 %494  ;;  %v507_v39 = vpop.xlane.xlu0 %506  ;;  %v523_v40 = vmul.f32 %v828_v37, %v932_v63 }
 0x19c   : > { %829 = vrcp.f32 %v495_v38 }
 0x19d   : > { %831 = vrcp.f32 %v507_v39  ;;  %789 = vmatmul.msk.f32.vlgmr.msrb.gmra.mxu2 %vm437_vm1, %v523_v40 }
 0x1a2   : > { %v830_v41 = vpop.eup %829 }
 0x1a3   : > { %v832_v42 = vpop.eup %831  ;;  %v510_v43 = vpop.xlane.xlu1 %509  ;;  %v521_v45 = vmul.f32 %v830_v41, %v936_v7 }
 0x1a4   : > { %v504_v44 = vpop.xlane.xlu0 %503  ;;  %833 = vrcp.f32 %v510_v43  ;;  %v492_v46 = vpop.xlane.xlu2 %491  ;;  %v525_v47 = vmul.f32 %v832_v42, %v938_v10 }
 0x1a5   : > { %835 = vrcp.f32 %v492_v46  ;;  %786 = vmatmul.msk.f32.vlgmr.msrb.gmra.mxu1 %vm437_vm1, %v521_v45 }
 0x1a6   : > { %837 = vrcp.f32 %v504_v44  ;;  %792 = vmatmul.msk.f32.vlgmr.msrb.gmra.mxu3 %vm437_vm1, %v525_v47 }
 0x1aa   : > { %v834_v48 = vpop.eup %833 }
 0x1ab   : > { %v836_v49 = vpop.eup %835  ;;  %v526_v51 = vmul.f32 %v834_v48, %v820_v18 }
 0x1ac   : > { %v498_v50 = vpop.xlane.xlu0 %497  ;;  %v838_v52 = vpop.eup %837  ;;  %v520_v53 = vmul.f32 %v836_v49, %v822_v19 }
 0x1ad   : > { %839 = vrcp.f32 %v498_v50  ;;  %v524_v54 = vmul.f32 %v838_v52, %v944_v17 }
 0x1ae   : > { %784 = vmatmul.msk.f32.gmra.mxu0 %vm437_vm1, %v520_v53  ;;  %793 = vmatmul.msk.f32.gmra.mxu3 %vm437_vm1, %v526_v51 }
 0x1af   : > { %790 = vmatmul.msk.f32.gmra.mxu2 %vm437_vm1, %v524_v54 }
 0x1b3   : > { %v840_v55 = vpop.eup %839 }
 0x1b4   : > { %v522_v56 = vmul.f32 %v840_v55, %v824_v23 }
 0x1b6   : > { %787 = vmatmul.msk.f32.gmra.mxu1 %vm437_vm1, %v522_v56 }
 0x213   : > { %v554_v57 = vpop.f32.mrf.mxu0 }
 0x214   : > { %656 = vst.msk [vmem:[%s251_s8] sm:$0xff] %vm277_vm0, %v554_v57 }
 0x220   : > { %v618_v58 = vpop.f32.mrf.mxu2 }
 0x221   : > { %661 = vst.msk [vmem:[%s251_s8 + $0x20] sm:$0xff] %vm277_vm0, %v618_v58 }
 0x222   : > { %v586_v59 = vpop.f32.mrf.mxu1 }
 0x223   : > { %659 = vst.msk [vmem:[%s251_s8 + $0x10] sm:$0xff] %vm277_vm0, %v586_v59 }
 0x229   : > { %v650_v60 = vpop.f32.mrf.mxu3 }
 0x22a   : > { %663 = vst.msk [vmem:[%s251_s8 + $0x30] sm:$0xff] %vm277_vm0, %v650_v60 }
 0x22b   : > { %v557_v61 = vpop.f32.mrf.mxu0 }
 0x22c   : > { %658 = vst.msk [vmem:[%s251_s8 + $0x8] sm:$0x3] %vm657_vm4, %v557_v61 }
 0x231   : > { %v653_v62 = vpop.f32.mrf.mxu3 }
 0x232   : > { %v621_v63 = vpop.f32.mrf.mxu2  ;;  %664 = vst.msk [vmem:[%s251_s8 + $0x38] sm:$0x3] %vm657_vm4, %v653_v62 }
 0x233   : > { %v589_v0 = vpop.f32.mrf.mxu1  ;;  %662 = vst.msk [vmem:[%s251_s8 + $0x28] sm:$0x3] %vm657_vm4, %v621_v63 }
 0x234   : > { %660 = vst.msk [vmem:[%s251_s8 + $0x18] sm:$0x3] %vm657_vm4, %v589_v0 }
 0x235 PF: > { %s14_s15 = sadd.s32 1, %s847_s15  }
 0x236   : > { %p11_p4 = scmp.ge.s32.totalorder %s14_s15, 4  }
 0x238   :  { %13 = sbr.rel (!%p11_p4) target bundleno = 1 (0x1), region = 75 }

// kernel: transformer_forward.29
= control target key start
LH: loop header
LB: loop body
LE: loop exit
PB: predicated region body
PF: predicated region fallthrough
CT: control target
= control target key end

     0   :  { %vm34_vm0 = vcmask 261120   ;;  %vm82_vm1 = vcmask 257024   ;;  %v194_v23 = vmov 32.0   ;;  %s290_s1 = inlined_call_operand.vmem [shape: f32[32,32], index: 1, kind: input, shape index: {}]   ;;  %s291_s2 = inlined_call_operand.vmem [shape: f32[1,32], index: 2, kind: input, shape index: {}]   ;;  %s292_s0 = inlined_call_operand.vmem [shape: f32[20,32], index: 0, kind: input, shape index: {}]   ;;  %s293_s3 = inlined_call_operand.vmem [shape: f32[20,32], index: 3, kind: input, shape index: {}]   ;;  %s294_s4 = inlined_call_operand.vmem [shape: f32[1,32], index: 4, kind: input, shape index: {}]   ;;  %s295_s5 = inlined_call_operand.vmem [shape: f32[1,32], index: 5, kind: input, shape index: {}]   ;;  %s296_s6 = inlined_call_operand.vmem [shape: f32[20,32], index: 6, kind: output, shape index: {}]  }
   0x1   :  { %v29_v0 = vld [vmem:[%s290_s1 + $0x18] sm:$0xff]  ;;  %v28_v1 = vld [vmem:[%s290_s1 + $0x10] sm:$0xff]  ;;  %v27_v2 = vld [vmem:[%s290_s1 + $0x8] sm:$0xff]  ;;  %186 = vrcp.f32 %v194_v23 }
   0x2   :  { %56 = vmatpush.msra.mxu0 %v29_v0  ;;  %175 = vmatpush.msra.mxu2 %v29_v0  ;;  %v26_v3 = vld [vmem:[%s290_s1] sm:$0xff]  ;;  %v25_v5 = vld [vmem:[%s292_s0 + $0x10] sm:$0xf]  ;;  %v24_v6 = vld [vmem:[%s292_s0 + $0x8] sm:$0xff] }
   0x3   :  { %174 = vmatpush.msra.mxu1 %v29_v0  ;;  %v23_v4 = vld [vmem:[%s292_s0] sm:$0xff]  ;;  %v71_v14 = vld [vmem:[%s293_s3 + $0x8] sm:$0xff]  ;;  %v72_v17 = vld [vmem:[%s293_s3 + $0x10] sm:$0xf] }
   0x4   :  { %57 = vmatpush.msra.mxu0 %v28_v1  ;;  %177 = vmatpush.msra.mxu2 %v28_v1  ;;  %v183_v7 = vld [vmem:[%s291_s2] ss:$0 sm:$0xff] }
   0x5   :  { %176 = vmatpush.msra.mxu1 %v28_v1  ;;  %v70_v9 = vld [vmem:[%s293_s3] sm:$0xff] }
   0x6   :  { %58 = vmatpush.msra.mxu0 %v27_v2  ;;  %179 = vmatpush.msra.mxu2 %v27_v2  ;;  %v184_v62 = vld [vmem:[%s294_s4] ss:$0 sm:$0xff] }
   0x7   :  { %178 = vmatpush.msra.mxu1 %v27_v2  ;;  %v187_v24 = vpop.eup %186  ;;  %v185_v1 = vld [vmem:[%s295_s5] ss:$0 sm:$0xff] }
   0x8   :  { %59 = vmatpush.msra.mxu0 %v26_v3  ;;  %181 = vmatpush.msra.mxu2 %v26_v3  ;;  %v87_v25 = vmul.f32 32.0, %v187_v24  ;;  %vm91_vm2 = vweird.f32 %v187_v24 }
   0x9   :  { %171 = vmatmul.msk.f32.vlgmr.msra.gmra.mxu0 %vm34_vm0, %v23_v4  ;;  %173 = vmatmul.msk.f32.vlgmr.msra.gmra.mxu2 %vm34_vm0, %v25_v5 }
   0xa   :  { %180 = vmatpush.msra.mxu1 %v26_v3  ;;  %v88_v26 = vsub.f32 1.0, %v87_v25 }
   0xb   :  { %172 = vmatmul.msk.f32.vlgmr.msra.gmra.mxu1 %vm34_vm0, %v24_v6 }
   0xc   :  { %v89_v27 = vmul.f32 %v187_v24, %v88_v26 }
   0xe   :  { %v90_v28 = vadd.f32 %v187_v24, %v89_v27 }
  0x10   :  { %v92_v29 = vsel %vm91_vm2, %v187_v24, %v90_v28 }
  0x86   :  { %v61_v8 = vpop.f32.mrf.mxu0 }
  0x87   :  { %v62_v10 = vadd.f32 %v183_v7, %v61_v8 }
  0x88   :  { %v64_v11 = vpop.f32.mrf.mxu1 }
  0x89   :  { %v73_v12 = vadd.f32 %v70_v9, %v62_v10  ;;  %v65_v13 = vadd.f32 %v183_v7, %v64_v11 }
  0x8b   :  { %v76_v15 = vsel %vm34_vm0, %v73_v12, 0.0  ;;  %v74_v19 = vadd.f32 %v71_v14, %v65_v13 }
  0x8c   :  { %v67_v16 = vpop.f32.mrf.mxu2  ;;  %77 = vadd.xlane.f32.xlu0 %v76_v15 }
  0x8d   :  { %v68_v18 = vadd.f32 %v183_v7, %v67_v16  ;;  %v79_v22 = vsel %vm34_vm0, %v74_v19, 0.0 }
  0x8f   :  { %v75_v20 = vadd.f32 %v72_v17, %v68_v18 }
  0x91   :  { %v83_v21 = vsel %vm82_vm1, %v75_v20, 0.0 }
  0x92   :  { %84 = vadd.xlane.f32.xlu1 %v83_v21 }
  0x94   :  { %80 = vadd.xlane.f32.xlu0 %v79_v22 }
  0xff   :  { %v78_v30 = vpop.xlane.xlu0 %77 }
 0x100   :  { %v93_v31 = vmul.f32 %v92_v29, %v78_v30 }
 0x102   :  { %v96_v32 = vsub.f32 %v73_v12, %v93_v31 }
 0x104   :  { %v99_v33 = vmul.f32 %v96_v32, %v96_v32 }
 0x105   :  { %v85_v35 = vpop.xlane.xlu1 %84 }
 0x106   :  { %v102_v34 = vsel %vm34_vm0, %v99_v33, 0.0  ;;  %v95_v38 = vmul.f32 %v92_v29, %v85_v35 }
 0x107   :  { %103 = vadd.xlane.f32.xlu1 %v102_v34  ;;  %v81_v36 = vpop.xlane.xlu0 %80 }
 0x108   :  { %v94_v37 = vmul.f32 %v92_v29, %v81_v36  ;;  %v98_v41 = vsub.f32 %v75_v20, %v95_v38 }
 0x10a   :  { %v97_v39 = vsub.f32 %v74_v19, %v94_v37  ;;  %v101_v43 = vmul.f32 %v98_v41, %v98_v41 }
 0x10c   :  { %v100_v40 = vmul.f32 %v97_v39, %v97_v39  ;;  %v108_v44 = vsel %vm82_vm1, %v101_v43, 0.0 }
 0x10e   :  { %v105_v42 = vsel %vm34_vm0, %v100_v40, 0.0 }
 0x10f   :  { %106 = vadd.xlane.f32.xlu2 %v105_v42 }
 0x117   :  { %109 = vadd.xlane.f32.xlu2 %v108_v44 }
 0x17a   :  { %v104_v45 = vpop.xlane.xlu1 %103 }
 0x17b   :  { %v111_v46 = vmul.f32 %v104_v45, %v92_v29 }
 0x17d   :  { %v114_v47 = vadd.f32 1e-05, %v111_v46 }
 0x17f   :  { %188 = vrsqrt.f32 %v114_v47  ;;  %vm123_vm4 = vweird.f32 %v114_v47 }
 0x182   :  { %v107_v48 = vpop.xlane.xlu2 %106 }
 0x183   :  { %v112_v49 = vmul.f32 %v107_v48, %v92_v29 }
 0x185   :  { %v189_v50 = vpop.eup %188  ;;  %v115_v51 = vadd.f32 1e-05, %v112_v49 }
 0x186   :  { %v118_v52 = vmul.f32 %v189_v50, %v114_v47  ;;  %vm124_vm3 = vweird.f32 %v189_v50 }
 0x187   :  { %190 = vrsqrt.f32 %v115_v51  ;;  %vm125_vm5 = vmor %vm123_vm4, %vm124_vm3  ;;  %vm133_vm7 = vweird.f32 %v115_v51 }
 0x188   :  { %v119_v53 = vmul.f32 %v189_v50, %v118_v52 }
 0x18a   :  { %v120_v54 = vmul.f32 0.5, %v119_v53  ;;  %v110_v55 = vpop.xlane.xlu2 %109 }
 0x18b   :  { %v113_v56 = vmul.f32 %v110_v55, %v92_v29 }
 0x18c   :  { %v121_v57 = vsub.f32 1.5, %v120_v54 }
 0x18d   :  { %v191_v58 = vpop.eup %190  ;;  %v116_v59 = vadd.f32 1e-05, %v113_v56 }
 0x18e   :  { %v122_v60 = vmul.f32 %v189_v50, %v121_v57  ;;  %v128_v61 = vmul.f32 %v191_v58, %v115_v51  ;;  %vm134_vm6 = vweird.f32 %v191_v58 }
 0x18f   :  { %192 = vrsqrt.f32 %v116_v59  ;;  %vm135_vm8 = vmor %vm133_vm7, %vm134_vm6  ;;  %vm143_vm10 = vweird.f32 %v116_v59 }
 0x190   :  { %v126_v63 = vsel %vm125_vm5, %v189_v50, %v122_v60  ;;  %v129_v0 = vmul.f32 %v191_v58, %v128_v61 }
 0x191   :  { %v147_v2 = vmul.f32 %v126_v63, %v96_v32 }
 0x192   :  { %v130_v3 = vmul.f32 0.5, %v129_v0 }
 0x193   :  { %v154_v4 = vmul.f32 %v184_v62, %v147_v2 }
 0x194   :  { %v131_v5 = vsub.f32 1.5, %v130_v3 }
 0x195   :  { %v193_v6 = vpop.eup %192  ;;  %v161_v7 = vadd.f32 %v185_v1, %v154_v4 }
 0x196   :  { %v132_v8 = vmul.f32 %v191_v58, %v131_v5  ;;  %v138_v9 = vmul.f32 %v193_v6, %v116_v59  ;;  %vm144_vm9 = vweird.f32 %v193_v6 }
 0x197   :  { %164 = vst.msk [vmem:[%s296_s6] sm:$0xff] %vm34_vm0, %v161_v7  ;;  %vm145_vm11 = vmor %vm143_vm10, %vm144_vm9 }
 0x198   :  { %v136_v10 = vsel %vm135_vm8, %v191_v58, %v132_v8  ;;  %v139_v11 = vmul.f32 %v193_v6, %v138_v9 }
 0x199   :  { %v148_v12 = vmul.f32 %v136_v10, %v97_v39 }
 0x19a   :  { %v140_v13 = vmul.f32 0.5, %v139_v11 }
 0x19b   :  { %v155_v14 = vmul.f32 %v184_v62, %v148_v12 }
 0x19c   :  { %v141_v15 = vsub.f32 1.5, %v140_v13 }
 0x19d   :  { %v162_v16 = vadd.f32 %v185_v1, %v155_v14 }
 0x19e   :  { %v142_v17 = vmul.f32 %v193_v6, %v141_v15 }
 0x19f   :  { %165 = vst.msk [vmem:[%s296_s6 + $0x8] sm:$0xff] %vm34_vm0, %v162_v16 }
 0x1a0   :  { %v146_v18 = vsel %vm145_vm11, %v193_v6, %v142_v17 }
 0x1a1   :  { %v149_v19 = vmul.f32 %v146_v18, %v98_v41 }
 0x1a3   :  { %v156_v20 = vmul.f32 %v184_v62, %v149_v19 }
 0x1a5   :  { %v163_v21 = vadd.f32 %v185_v1, %v156_v20 }
 0x1a7   :  { %166 = vst.msk [vmem:[%s296_s6 + $0x10] sm:$0xf] %vm82_vm1, %v163_v21 }

// kernel: transformer_forward.35
= control target key start
LH: loop header
LB: loop body
LE: loop exit
PB: predicated region body
PF: predicated region fallthrough
CT: control target
= control target key end

     0   :  { %vm17_vm0 = vcmask 261120   ;;  %vm24_vm1 = vcmask 257024   ;;  %v124_v6 = vmov 32.0   ;;  %s178_s0 = inlined_call_operand.vmem [shape: f32[20,32], index: 0, kind: input, shape index: {}]   ;;  %s179_s1 = inlined_call_operand.vmem [shape: f32[1,32], index: 1, kind: input, shape index: {}]   ;;  %s180_s2 = inlined_call_operand.vmem [shape: f32[1,32], index: 2, kind: input, shape index: {}]   ;;  %s181_s3 = inlined_call_operand.vmem [shape: f32[20,32], index: 3, kind: output, shape index: {}]  }
   0x1   :  { %v14_v0 = vld [vmem:[%s178_s0] sm:$0xff]  ;;  %v16_v1 = vld [vmem:[%s178_s0 + $0x10] sm:$0xf]  ;;  %v15_v4 = vld [vmem:[%s178_s0 + $0x8] sm:$0xff]  ;;  %116 = vrcp.f32 %v124_v6 }
   0x2   :  { %v18_v2 = vsel %vm17_vm0, %v14_v0, 0.0  ;;  %v25_v3 = vsel %vm24_vm1, %v16_v1, 0.0  ;;  %v21_v5 = vsel %vm17_vm0, %v15_v4, 0.0  ;;  %v114_v45 = vld [vmem:[%s179_s1] ss:$0 sm:$0xff] }
   0x3   :  { %19 = vadd.xlane.f32.xlu0 %v18_v2  ;;  %26 = vadd.xlane.f32.xlu1 %v25_v3  ;;  %v115_v48 = vld [vmem:[%s180_s2] ss:$0 sm:$0xff] }
   0x7   :  { %v117_v7 = vpop.eup %116 }
   0x8   :  { %v29_v8 = vmul.f32 32.0, %v117_v7  ;;  %vm33_vm2 = vweird.f32 %v117_v7 }
   0xa   :  { %v30_v9 = vsub.f32 1.0, %v29_v8 }
   0xb   :  { %22 = vadd.xlane.f32.xlu0 %v21_v5 }
   0xc   :  { %v31_v10 = vmul.f32 %v117_v7, %v30_v9 }
   0xe   :  { %v32_v11 = vadd.f32 %v117_v7, %v31_v10 }
  0x10   :  { %v34_v12 = vsel %vm33_vm2, %v117_v7, %v32_v11 }
  0x76   :  { %v20_v13 = vpop.xlane.xlu0 %19  ;;  %v27_v17 = vpop.xlane.xlu1 %26 }
  0x77   :  { %v35_v14 = vmul.f32 %v34_v12, %v20_v13  ;;  %v37_v21 = vmul.f32 %v34_v12, %v27_v17 }
  0x79   :  { %v38_v15 = vsub.f32 %v14_v0, %v35_v14  ;;  %v40_v23 = vsub.f32 %v16_v1, %v37_v21 }
  0x7b   :  { %v41_v16 = vmul.f32 %v38_v15, %v38_v15  ;;  %v43_v26 = vmul.f32 %v40_v23, %v40_v23 }
  0x7d   :  { %v44_v18 = vsel %vm17_vm0, %v41_v16, 0.0  ;;  %v50_v27 = vsel %vm24_vm1, %v43_v26, 0.0 }
  0x7e   :  { %45 = vadd.xlane.f32.xlu1 %v44_v18  ;;  %v23_v19 = vpop.xlane.xlu0 %22 }
  0x7f   :  { %v36_v20 = vmul.f32 %v34_v12, %v23_v19 }
  0x81   :  { %v39_v22 = vsub.f32 %v15_v4, %v36_v20 }
  0x83   :  { %v42_v24 = vmul.f32 %v39_v22, %v39_v22 }
  0x85   :  { %v47_v25 = vsel %vm17_vm0, %v42_v24, 0.0 }
  0x86   :  { %48 = vadd.xlane.f32.xlu2 %v47_v25 }
  0x8e   :  { %51 = vadd.xlane.f32.xlu2 %v50_v27 }
  0xf1   :  { %v46_v28 = vpop.xlane.xlu1 %45 }
  0xf2   :  { %v53_v29 = vmul.f32 %v46_v28, %v34_v12 }
  0xf4   :  { %v56_v30 = vadd.f32 1e-05, %v53_v29 }
  0xf6   :  { %118 = vrsqrt.f32 %v56_v30  ;;  %vm65_vm4 = vweird.f32 %v56_v30 }
  0xf9   :  { %v49_v31 = vpop.xlane.xlu2 %48 }
  0xfa   :  { %v54_v32 = vmul.f32 %v49_v31, %v34_v12 }
  0xfc   :  { %v119_v33 = vpop.eup %118  ;;  %v57_v34 = vadd.f32 1e-05, %v54_v32 }
  0xfd   :  { %v60_v35 = vmul.f32 %v119_v33, %v56_v30  ;;  %vm66_vm3 = vweird.f32 %v119_v33 }
  0xfe   :  { %120 = vrsqrt.f32 %v57_v34  ;;  %vm67_vm5 = vmor %vm65_vm4, %vm66_vm3  ;;  %vm75_vm7 = vweird.f32 %v57_v34 }
  0xff   :  { %v61_v36 = vmul.f32 %v119_v33, %v60_v35 }
 0x101   :  { %v62_v37 = vmul.f32 0.5, %v61_v36  ;;  %v52_v38 = vpop.xlane.xlu2 %51 }
 0x102   :  { %v55_v39 = vmul.f32 %v52_v38, %v34_v12 }
 0x103   :  { %v63_v40 = vsub.f32 1.5, %v62_v37 }
 0x104   :  { %v121_v41 = vpop.eup %120  ;;  %v58_v42 = vadd.f32 1e-05, %v55_v39 }
 0x105   :  { %v64_v43 = vmul.f32 %v119_v33, %v63_v40  ;;  %v70_v44 = vmul.f32 %v121_v41, %v57_v34  ;;  %vm76_vm6 = vweird.f32 %v121_v41 }
 0x106   :  { %122 = vrsqrt.f32 %v58_v42  ;;  %vm77_vm8 = vmor %vm75_vm7, %vm76_vm6  ;;  %vm85_vm10 = vweird.f32 %v58_v42 }
 0x107   :  { %v68_v46 = vsel %vm67_vm5, %v119_v33, %v64_v43  ;;  %v71_v47 = vmul.f32 %v121_v41, %v70_v44 }
 0x108   :  { %v89_v49 = vmul.f32 %v68_v46, %v38_v15 }
 0x109   :  { %v72_v50 = vmul.f32 0.5, %v71_v47 }
 0x10a   :  { %v96_v51 = vmul.f32 %v114_v45, %v89_v49 }
 0x10b   :  { %v73_v52 = vsub.f32 1.5, %v72_v50 }
 0x10c   :  { %v123_v53 = vpop.eup %122  ;;  %v103_v54 = vadd.f32 %v115_v48, %v96_v51 }
 0x10d   :  { %v74_v55 = vmul.f32 %v121_v41, %v73_v52  ;;  %v80_v56 = vmul.f32 %v123_v53, %v58_v42  ;;  %vm86_vm9 = vweird.f32 %v123_v53 }
 0x10e   :  { %106 = vst.msk [vmem:[%s181_s3] sm:$0xff] %vm17_vm0, %v103_v54  ;;  %vm87_vm11 = vmor %vm85_vm10, %vm86_vm9 }
 0x10f   :  { %v78_v57 = vsel %vm77_vm8, %v121_v41, %v74_v55  ;;  %v81_v58 = vmul.f32 %v123_v53, %v80_v56 }
 0x110   :  { %v90_v59 = vmul.f32 %v78_v57, %v39_v22 }
 0x111   :  { %v82_v60 = vmul.f32 0.5, %v81_v58 }
 0x112   :  { %v97_v61 = vmul.f32 %v114_v45, %v90_v59 }
 0x113   :  { %v83_v62 = vsub.f32 1.5, %v82_v60 }
 0x114   :  { %v104_v63 = vadd.f32 %v115_v48, %v97_v61 }
 0x115   :  { %v84_v0 = vmul.f32 %v123_v53, %v83_v62 }
 0x116   :  { %107 = vst.msk [vmem:[%s181_s3 + $0x8] sm:$0xff] %vm17_vm0, %v104_v63 }
 0x117   :  { %v88_v1 = vsel %vm87_vm11, %v123_v53, %v84_v0 }
 0x118   :  { %v91_v2 = vmul.f32 %v88_v1, %v40_v23 }
 0x11a   :  { %v98_v3 = vmul.f32 %v114_v45, %v91_v2 }
 0x11c   :  { %v105_v4 = vadd.f32 %v115_v48, %v98_v3 }
 0x11e   :  { %108 = vst.msk [vmem:[%s181_s3 + $0x10] sm:$0xf] %vm24_vm1, %v105_v4 }

// kernel: transformer_forward.30
= control target key start
LH: loop header
LB: loop body
LE: loop exit
PB: predicated region body
PF: predicated region fallthrough
CT: control target
= control target key end

     0   :  { %vm30_vm0 = vcmask 261120   ;;  %v284_v15 = vmov 0.0   ;;  %vm96_vm1 = vcmask 523264   ;;  %vm33_vm2 = vcmask 257024   ;;  %s417_s1 = inlined_call_operand.vmem [shape: f32[32,64], index: 1, kind: input, shape index: {}]   ;;  %s418_s3 = inlined_call_operand.vmem [shape: f32[64,32], index: 3, kind: input, shape index: {}]   ;;  %s419_s0 = inlined_call_operand.vmem [shape: f32[20,32], index: 0, kind: input, shape index: {}]   ;;  %s420_s2 = inlined_call_operand.vmem [shape: f32[1,64], index: 2, kind: input, shape index: {}]   ;;  %s421_s4 = inlined_call_operand.vmem [shape: f32[1,32], index: 4, kind: input, shape index: {}]   ;;  %s422_s5 = inlined_call_operand.vmem [shape: f32[1,32], index: 5, kind: input, shape index: {}]   ;;  %s423_s6 = inlined_call_operand.vmem [shape: f32[1,32], index: 6, kind: input, shape index: {}]   ;;  %s424_s7 = inlined_call_operand.vmem [shape: f32[20,32], index: 7, kind: output, shape index: {}]  }
   0x1   :  { %v41_v0 = vld [vmem:[%s417_s1 + $0x18] sm:$0xff]  ;;  %v40_v1 = vld [vmem:[%s417_s1 + $0x10] sm:$0xff]  ;;  %v39_v2 = vld [vmem:[%s417_s1 + $0x8] sm:$0xff]  ;;  %31 = vst.msk [vmem:[#allocation2] sm:$0xff] %vm30_vm0, %v284_v15  ;;  %v285_v49 = vmov 32.0  }
   0x2   :  { %68 = vmatpush.msra.mxu0 %v41_v0  ;;  %258 = vmatpush.msra.mxu3 %v41_v0  ;;  %v95_v3 = vld [vmem:[%s418_s3 + $0x38] sm:$0xff]  ;;  %v94_v4 = vld [vmem:[%s418_s3 + $0x30] sm:$0xff]  ;;  %v38_v5 = vld [vmem:[%s417_s1] sm:$0xff]  ;;  %32 = vst.msk [vmem:[#allocation2 + $0x8] sm:$0xff] %vm30_vm0, %v284_v15  ;;  %276 = vrcp.f32 %v285_v49 }
   0x3   :  { %114 = vmatpush.msra.mxu1 %v95_v3  ;;  %262 = vmatpush.msra.mxu2 %v95_v3  ;;  %v35_v6 = vld [vmem:[%s419_s0] sm:$0xff]  ;;  %v350_v7 = vld [vmem:[%s419_s0 + $0x8] sm:$0xff]  ;;  %v91_v10 = vld [vmem:[%s418_s3 + $0x18] sm:$0xff]  ;;  %34 = vst.msk [vmem:[#allocation2 + $0x10] sm:$0xf] %vm33_vm2, %v284_v15 }
   0x4   :  { %69 = vmatpush.msra.mxu0 %v40_v1  ;;  %259 = vmatpush.msra.mxu3 %v40_v1  ;;  %v93_v8 = vld [vmem:[%s418_s3 + $0x28] sm:$0xff]  ;;  %v92_v9 = vld [vmem:[%s418_s3 + $0x20] sm:$0xff]  ;;  %v37_v11 = vld [vmem:[%s419_s0 + $0x10] sm:$0xf] }
   0x5   :  { %115 = vmatpush.msra.mxu1 %v94_v4  ;;  %263 = vmatpush.msra.mxu2 %v94_v4  ;;  %v90_v12 = vld [vmem:[%s418_s3 + $0x10] sm:$0xff]  ;;  %v89_v13 = vld [vmem:[%s418_s3 + $0x8] sm:$0xff]  ;;  %v88_v14 = vld [vmem:[%s418_s3] sm:$0xff] }
   0x6   :  { %70 = vmatpush.msra.mxu0 %v39_v2  ;;  %260 = vmatpush.msra.mxu3 %v39_v2  ;;  %v272_v16 = vld [vmem:[%s420_s2] ss:$0 sm:$0xff]  ;;  %v154_v45 = vld [vmem:[%s419_s0 + $0x10] sm:$0xf] }
   0x7   :  { %116 = vmatpush.msra.mxu1 %v93_v8  ;;  %264 = vmatpush.msra.mxu2 %v93_v8  ;;  %v273_v29 = vld [vmem:[%s421_s4] ss:$0 sm:$0xff] }
   0x8   :  { %71 = vmatpush.msra.mxu0 %v38_v5  ;;  %261 = vmatpush.msra.mxu3 %v38_v5  ;;  %v85_v26 = vld [vmem:[#allocation2] sm:$0xff]  ;;  %v277_v50 = vpop.eup %276 }
   0x9   :  { %252 = vmatmul.msk.f32.vlgmr.msra.gmra.mxu0 %vm30_vm0, %v35_v6  ;;  %253 = vmatmul.msk.f32.vlgmr.msra.gmra.mxu3 %vm30_vm0, %v350_v7  ;;  %v86_v30 = vld [vmem:[#allocation2 + $0x8] sm:$0xff]  ;;  %v168_v51 = vmul.f32 32.0, %v277_v50  ;;  %vm172_vm3 = vweird.f32 %v277_v50 }
   0xa   :  { %117 = vmatpush.msra.mxu1 %v92_v9  ;;  %265 = vmatpush.msra.mxu2 %v92_v9  ;;  %v87_v37 = vld [vmem:[#allocation2 + $0x10] sm:$0xf] }
   0xb   :  { %v169_v52 = vsub.f32 1.0, %v168_v51 }
   0xc   :  { %118 = vmatpush.msra.mxu1 %v91_v10  ;;  %266 = vmatpush.msra.mxu2 %v91_v10 }
   0xd   :  { %v170_v53 = vmul.f32 %v277_v50, %v169_v52 }
   0xe   :  { %119 = vmatpush.msra.mxu1 %v90_v12  ;;  %267 = vmatpush.msra.mxu2 %v90_v12 }
   0xf   :  { %v171_v54 = vadd.f32 %v277_v50, %v170_v53 }
  0x10   :  { %120 = vmatpush.msra.mxu1 %v89_v13  ;;  %268 = vmatpush.msra.mxu2 %v89_v13 }
  0x11   :  { %254 = vmatmul.msk.f32.gmra.mxu3 %vm30_vm0, %v37_v11  ;;  %v173_v55 = vsel %vm172_vm3, %v277_v50, %v171_v54 }
  0x12   :  { %121 = vmatpush.msra.mxu1 %v88_v14  ;;  %269 = vmatpush.msra.mxu2 %v88_v14 }
  0x86   :  { %v73_v17 = vpop.f32.mrf.mxu0 }
  0x87   :  { %v74_v18 = vadd.f32 %v272_v16, %v73_v17 }
  0x89   :  { %v82_v19 = vmax.f32 %v74_v18, 0.0 }
  0x8b   :  { %255 = vmatmul.msk.f32.vlgmr.msra.gmra.mxu1 %vm96_vm1, %v82_v19 }
  0x8c   :  { %v76_v20 = vpop.f32.mrf.mxu3 }
  0x8d   :  { %v77_v21 = vadd.f32 %v272_v16, %v76_v20  ;;  %v274_v20 = vld [vmem:[%s422_s5] ss:$0 sm:$0xff] }
  0x8f   :  { %v83_v22 = vmax.f32 %v77_v21, 0.0 }
  0x91   :  { %256 = vmatmul.msk.f32.vlgmr.msra.gmra.mxu2 %vm96_vm1, %v83_v22 }
  0x94   :  { %v79_v23 = vpop.f32.mrf.mxu3 }
  0x95   :  { %v80_v24 = vadd.f32 %v272_v16, %v79_v23 }
  0x97   :  { %v84_v25 = vmax.f32 %v80_v24, 0.0  ;;  %v275_v24 = vld [vmem:[%s423_s6] ss:$0 sm:$0xff] }
  0x99   :  { %257 = vmatmul.msk.f32.gmra.mxu2 %vm96_vm1, %v84_v25 }
 0x108   :  { %v123_v27 = vpop.f32.mrf.mxu1 }
 0x109   :  { %v132_v28 = vadd.f32 %v123_v27, %v85_v26 }
 0x10b   :  { %135 = vst.msk [vmem:[#allocation2] sm:$0xff] %vm30_vm0, %v132_v28 }
 0x112   :  { %v142_v31 = vld [vmem:[#allocation2] sm:$0xff] }
 0x113   :  { %v149_v32 = vadd.f32 %v273_v29, %v142_v31 }
 0x114   :  { %v126_v33 = vpop.f32.mrf.mxu2 }
 0x115   :  { %v133_v34 = vadd.f32 %v126_v33, %v86_v30  ;;  %v155_v35 = vadd.f32 %v149_v32, %v35_v6 }
 0x117   :  { %136 = vst.msk [vmem:[#allocation2 + $0x8] sm:$0xff] %vm30_vm0, %v133_v34  ;;  %v158_v36 = vsel %vm30_vm0, %v155_v35, 0.0 }
 0x118   :  { %159 = vadd.xlane.f32.xlu0 %v158_v36 }
 0x11c   :  { %v129_v38 = vpop.f32.mrf.mxu2 }
 0x11d   :  { %v134_v39 = vadd.f32 %v129_v38, %v87_v37 }
 0x11e   :  { %v143_v40 = vld [vmem:[#allocation2 + $0x8] sm:$0xff] }
 0x11f   :  { %138 = vst.msk [vmem:[#allocation2 + $0x10] sm:$0xf] %vm33_vm2, %v134_v39  ;;  %v150_v41 = vadd.f32 %v273_v29, %v143_v40 }
 0x121   :  { %v156_v42 = vadd.f32 %v150_v41, %v350_v7 }
 0x123   :  { %v161_v43 = vsel %vm30_vm0, %v156_v42, 0.0 }
 0x124   :  { %162 = vadd.xlane.f32.xlu0 %v161_v43 }
 0x126   :  { %v144_v44 = vld [vmem:[#allocation2 + $0x10] sm:$0xf] }
 0x127   :  { %v151_v46 = vadd.f32 %v273_v29, %v144_v44 }
 0x129   :  { %v157_v47 = vadd.f32 %v154_v45, %v151_v46 }
 0x12b   :  { %v164_v48 = vsel %vm33_vm2, %v157_v47, 0.0 }
 0x12c   :  { %165 = vadd.xlane.f32.xlu1 %v164_v48 }
 0x18b   :  { %v160_v56 = vpop.xlane.xlu0 %159 }
 0x18c   :  { %v174_v57 = vmul.f32 %v173_v55, %v160_v56 }
 0x18e   :  { %v177_v58 = vsub.f32 %v155_v35, %v174_v57 }
 0x190   :  { %v180_v59 = vmul.f32 %v177_v58, %v177_v58 }
 0x192   :  { %v183_v60 = vsel %vm30_vm0, %v180_v59, 0.0 }
 0x193   :  { %184 = vadd.xlane.f32.xlu1 %v183_v60 }
 0x197   :  { %v163_v61 = vpop.xlane.xlu0 %162 }
 0x198   :  { %v175_v62 = vmul.f32 %v173_v55, %v163_v61 }
 0x19a   :  { %v178_v63 = vsub.f32 %v156_v42, %v175_v62 }
 0x19c   :  { %v181_v0 = vmul.f32 %v178_v63, %v178_v63 }
 0x19e   :  { %v186_v1 = vsel %vm30_vm0, %v181_v0, 0.0 }
 0x19f   :  { %v166_v2 = vpop.xlane.xlu1 %165  ;;  %187 = vadd.xlane.f32.xlu2 %v186_v1 }
 0x1a0   :  { %v176_v3 = vmul.f32 %v173_v55, %v166_v2 }
 0x1a2   :  { %v179_v4 = vsub.f32 %v157_v47, %v176_v3 }
 0x1a4   :  { %v182_v5 = vmul.f32 %v179_v4, %v179_v4 }
 0x1a6   :  { %v189_v6 = vsel %vm33_vm2, %v182_v5, 0.0 }
 0x1a7   :  { %190 = vadd.xlane.f32.xlu2 %v189_v6 }
 0x206   :  { %v185_v7 = vpop.xlane.xlu1 %184 }
 0x207   :  { %v192_v8 = vmul.f32 %v185_v7, %v173_v55 }
 0x209   :  { %v195_v9 = vadd.f32 1e-05, %v192_v8 }
 0x20b   :  { %278 = vrsqrt.f32 %v195_v9  ;;  %vm204_vm5 = vweird.f32 %v195_v9 }
 0x211   :  { %v279_v10 = vpop.eup %278 }
 0x212   :  { %v199_v11 = vmul.f32 %v279_v10, %v195_v9  ;;  %v188_v12 = vpop.xlane.xlu2 %187  ;;  %vm205_vm4 = vweird.f32 %v279_v10 }
 0x213   :  { %v193_v13 = vmul.f32 %v188_v12, %v173_v55  ;;  %vm206_vm6 = vmor %vm204_vm5, %vm205_vm4 }
 0x214   :  { %v200_v14 = vmul.f32 %v279_v10, %v199_v11 }
 0x215   :  { %v196_v15 = vadd.f32 1e-05, %v193_v13 }
 0x216   :  { %v201_v16 = vmul.f32 0.5, %v200_v14 }
 0x217   :  { %280 = vrsqrt.f32 %v196_v15  ;;  %vm214_vm8 = vweird.f32 %v196_v15 }
 0x218   :  { %v202_v17 = vsub.f32 1.5, %v201_v16 }
 0x21a   :  { %v203_v18 = vmul.f32 %v279_v10, %v202_v17  ;;  %v191_v19 = vpop.xlane.xlu2 %190 }
 0x21b   :  { %v194_v21 = vmul.f32 %v191_v19, %v173_v55 }
 0x21c   :  { %v207_v22 = vsel %vm206_vm6, %v279_v10, %v203_v18 }
 0x21d   :  { %v281_v23 = vpop.eup %280  ;;  %v228_v25 = vmul.f32 %v207_v22, %v177_v58  ;;  %v197_v26 = vadd.f32 1e-05, %v194_v21 }
 0x21e   :  { %v209_v27 = vmul.f32 %v281_v23, %v196_v15  ;;  %vm215_vm7 = vweird.f32 %v281_v23 }
 0x21f   :  { %v235_v28 = vmul.f32 %v274_v20, %v228_v25  ;;  %282 = vrsqrt.f32 %v197_v26  ;;  %vm216_vm9 = vmor %vm214_vm8, %vm215_vm7  ;;  %vm224_vm11 = vweird.f32 %v197_v26 }
 0x220   :  { %v210_v29 = vmul.f32 %v281_v23, %v209_v27 }
 0x221   :  { %v242_v30 = vadd.f32 %v275_v24, %v235_v28 }
 0x222   :  { %v211_v31 = vmul.f32 0.5, %v210_v29 }
 0x223   :  { %245 = vst.msk [vmem:[%s424_s7] sm:$0xff] %vm30_vm0, %v242_v30 }
 0x224   :  { %v212_v32 = vsub.f32 1.5, %v211_v31 }
 0x225   :  { %v283_v33 = vpop.eup %282 }
 0x226   :  { %v213_v34 = vmul.f32 %v281_v23, %v212_v32  ;;  %v219_v35 = vmul.f32 %v283_v33, %v197_v26  ;;  %vm225_vm10 = vweird.f32 %v283_v33 }
 0x227   :  { %vm226_vm12 = vmor %vm224_vm11, %vm225_vm10 }
 0x228   :  { %v217_v36 = vsel %vm216_vm9, %v281_v23, %v213_v34  ;;  %v220_v37 = vmul.f32 %v283_v33, %v219_v35 }
 0x229   :  { %v229_v38 = vmul.f32 %v217_v36, %v178_v63 }
 0x22a   :  { %v221_v39 = vmul.f32 0.5, %v220_v37 }
 0x22b   :  { %v236_v40 = vmul.f32 %v274_v20, %v229_v38 }
 0x22c   :  { %v222_v41 = vsub.f32 1.5, %v221_v39 }
 0x22d   :  { %v243_v42 = vadd.f32 %v275_v24, %v236_v40 }
 0x22e   :  { %v223_v43 = vmul.f32 %v283_v33, %v222_v41 }
 0x22f   :  { %246 = vst.msk [vmem:[%s424_s7 + $0x8] sm:$0xff] %vm30_vm0, %v243_v42 }
 0x230   :  { %v227_v44 = vsel %vm226_vm12, %v283_v33, %v223_v43 }
 0x231   :  { %v230_v45 = vmul.f32 %v227_v44, %v179_v4 }
 0x233   :  { %v237_v46 = vmul.f32 %v274_v20, %v230_v45 }
 0x235   :  { %v244_v47 = vadd.f32 %v275_v24, %v237_v46 }
 0x237   :  { %247 = vst.msk [vmem:[%s424_s7 + $0x10] sm:$0xf] %vm33_vm2, %v244_v47 }

// kernel: transformer_forward.40
= control target key start
LH: loop header
LB: loop body
LE: loop exit
PB: predicated region body
PF: predicated region fallthrough
CT: control target
= control target key end

     0   :  { %vm18_vm0 = vcmask 523264   ;;  %v110_v2 = vmov 0.0   ;;  %vm33_vm1 = vcmask 261120   ;;  %vm21_vm2 = vcmask 519168   ;;  %s173_s1 = inlined_call_operand.vmem [shape: f32[32,64], index: 1, kind: input, shape index: {}]   ;;  %s174_s0 = inlined_call_operand.vmem [shape: f32[20,32], index: 0, kind: input, shape index: {}]   ;;  %s175_s2 = inlined_call_operand.vmem [shape: f32[1,64], index: 2, kind: input, shape index: {}]   ;;  %s176_s3 = inlined_call_operand.vmem [shape: f32[20,64], index: 3, kind: output, shape index: {}]  }
   0x1   :  { %v32_v0 = vld [vmem:[%s173_s1 + $0x18] sm:$0xff]  ;;  %v31_v1 = vld [vmem:[%s173_s1 + $0x10] sm:$0xff]  ;;  %19 = vst.msk [vmem:[#allocation2] sm:$0xff] %vm18_vm0, %v110_v2  ;;  %v30_v3 = vld [vmem:[%s173_s1 + $0x8] sm:$0xff] }
   0x2   :  { %101 = vmatpush.msra.mxu2 %v32_v0  ;;  %55 = vmatpush.msra.mxu0 %v32_v0  ;;  %20 = vst.msk [vmem:[#allocation2 + $0x8] sm:$0xff] %vm18_vm0, %v110_v2  ;;  %v29_v4 = vld [vmem:[%s173_s1] sm:$0xff]  ;;  %v28_v5 = vld [vmem:[%s174_s0 + $0x10] sm:$0xf]  ;;  %v27_v7 = vld [vmem:[%s174_s0 + $0x8] sm:$0xff] }
   0x3   :  { %100 = vmatpush.msra.mxu1 %v32_v0  ;;  %v26_v6 = vld [vmem:[%s174_s0] sm:$0xff]  ;;  %22 = vst.msk [vmem:[#allocation2 + $0x10] sm:$0xf] %vm21_vm2, %v110_v2 }
   0x4   :  { %103 = vmatpush.msra.mxu2 %v31_v1  ;;  %56 = vmatpush.msra.mxu0 %v31_v1  ;;  %v109_v17 = vld [vmem:[%s175_s2] ss:$0 sm:$0xff] }
   0x5   :  { %102 = vmatpush.msra.mxu1 %v31_v1 }
   0x6   :  { %105 = vmatpush.msra.mxu2 %v30_v3  ;;  %57 = vmatpush.msra.mxu0 %v30_v3 }
   0x7   :  { %104 = vmatpush.msra.mxu1 %v30_v3 }
   0x8   :  { %107 = vmatpush.msra.mxu2 %v29_v4  ;;  %58 = vmatpush.msra.mxu0 %v29_v4  ;;  %v23_v8 = vld [vmem:[#allocation2] sm:$0xff] }
   0x9   :  { %99 = vmatmul.msk.f32.vlgmr.msra.gmra.mxu2 %vm33_vm1, %v28_v5  ;;  %106 = vmatpush.msra.mxu1 %v29_v4  ;;  %v24_v9 = vld [vmem:[#allocation2 + $0x8] sm:$0xff] }
   0xa   :  { %97 = vmatmul.msk.f32.vlgmr.msra.gmra.mxu0 %vm33_vm1, %v26_v6  ;;  %98 = vmatmul.msk.f32.vlgmr.msra.gmra.mxu1 %vm33_vm1, %v27_v7  ;;  %v25_v14 = vld [vmem:[#allocation2 + $0x10] sm:$0xf] }
  0x87   :  { %v60_v10 = vpop.f32.mrf.mxu0  ;;  %v63_v11 = vpop.f32.mrf.mxu1 }
  0x88   :  { %v69_v12 = vadd.f32 %v60_v10, %v23_v8  ;;  %v70_v13 = vadd.f32 %v63_v11, %v24_v9 }
  0x8a   :  { %73 = vst.msk [vmem:[#allocation2] sm:$0xff] %vm18_vm0, %v69_v12 }
  0x8b   :  { %74 = vst.msk [vmem:[#allocation2 + $0x8] sm:$0xff] %vm18_vm0, %v70_v13 }
  0x8c   :  { %v66_v15 = vpop.f32.mrf.mxu2 }
  0x8d   :  { %v71_v16 = vadd.f32 %v66_v15, %v25_v14 }
  0x8f   :  { %76 = vst.msk [vmem:[#allocation2 + $0x10] sm:$0xf] %vm21_vm2, %v71_v16 }
  0x91   :  { %v80_v18 = vld [vmem:[#allocation2] sm:$0xff] }
  0x92   :  { %v81_v19 = vld [vmem:[#allocation2 + $0x8] sm:$0xff]  ;;  %v87_v20 = vadd.f32 %v109_v17, %v80_v18 }
  0x93   :  { %v88_v21 = vadd.f32 %v109_v17, %v81_v19 }
  0x94   :  { %90 = vst.msk [vmem:[%s176_s3] sm:$0xff] %vm18_vm0, %v87_v20 }
  0x95   :  { %91 = vst.msk [vmem:[%s176_s3 + $0x8] sm:$0xff] %vm18_vm0, %v88_v21 }
  0x96   :  { %v82_v22 = vld [vmem:[#allocation2 + $0x10] sm:$0xf] }
  0x97   :  { %v89_v23 = vadd.f32 %v109_v17, %v82_v22 }
  0x99   :  { %92 = vst.msk [vmem:[%s176_s3 + $0x10] sm:$0xf] %vm21_vm2, %v89_v23 }

// kernel: transformer_forward.36
= control target key start
LH: loop header
LB: loop body
LE: loop exit
PB: predicated region body
PF: predicated region fallthrough
CT: control target
= control target key end

     0   :  { %vm18_vm0 = vcmask 785408   ;;  %v89_v2 = vmov 0.0   ;;  %vm29_vm1 = vcmask 261120   ;;  %s143_s1 = inlined_call_operand.vmem [shape: f32[32,96], index: 1, kind: input, shape index: {}]   ;;  %s144_s2 = inlined_call_operand.vmem [shape: f32[1,96], index: 2, kind: input, shape index: {}]   ;;  %s145_s0 = inlined_call_operand.vmem [shape: f32[16,32], index: 0, kind: input, shape index: {}]   ;;  %s146_s3 = inlined_call_operand.vmem [shape: f32[16,96], index: 3, kind: output, shape index: {}]  }
   0x1   :  { %v28_v0 = vld [vmem:[%s143_s1 + $0x18] sm:$0xff]  ;;  %v27_v1 = vld [vmem:[%s143_s1 + $0x10] sm:$0xff]  ;;  %19 = vst.msk [vmem:[#allocation2] sm:$0xff] %vm18_vm0, %v89_v2  ;;  %v26_v3 = vld [vmem:[%s143_s1 + $0x8] sm:$0xff] }
   0x2   :  { %48 = vmatpush.msra.mxu0 %v28_v0  ;;  %83 = vmatpush.msra.mxu1 %v28_v0  ;;  %20 = vst.msk [vmem:[#allocation2 + $0x8] sm:$0xff] %vm18_vm0, %v89_v2  ;;  %v25_v4 = vld [vmem:[%s143_s1] sm:$0xff]  ;;  %v24_v6 = vld [vmem:[%s145_s0 + $0x8] sm:$0xff] }
   0x3   :  { %v23_v5 = vld [vmem:[%s145_s0] sm:$0xff] }
   0x4   :  { %49 = vmatpush.msra.mxu0 %v27_v1  ;;  %84 = vmatpush.msra.mxu1 %v27_v1  ;;  %v88_v13 = vld [vmem:[%s144_s2] ss:$0 sm:$0xff] }
   0x6   :  { %50 = vmatpush.msra.mxu0 %v26_v3  ;;  %85 = vmatpush.msra.mxu1 %v26_v3 }
   0x8   :  { %51 = vmatpush.msra.mxu0 %v25_v4  ;;  %86 = vmatpush.msra.mxu1 %v25_v4  ;;  %v21_v7 = vld [vmem:[#allocation2] sm:$0xff] }
   0x9   :  { %81 = vmatmul.msk.f32.vlgmr.msra.gmra.mxu0 %vm29_vm1, %v23_v5  ;;  %82 = vmatmul.msk.f32.vlgmr.msra.gmra.mxu1 %vm29_vm1, %v24_v6  ;;  %v22_v8 = vld [vmem:[#allocation2 + $0x8] sm:$0xff] }
  0x86   :  { %v53_v9 = vpop.f32.mrf.mxu0  ;;  %v56_v10 = vpop.f32.mrf.mxu1 }
  0x87   :  { %v59_v11 = vadd.f32 %v53_v9, %v21_v7  ;;  %v60_v12 = vadd.f32 %v56_v10, %v22_v8 }
  0x89   :  { %62 = vst.msk [vmem:[#allocation2] sm:$0xff] %vm18_vm0, %v59_v11 }
  0x8a   :  { %63 = vst.msk [vmem:[#allocation2 + $0x8] sm:$0xff] %vm18_vm0, %v60_v12 }
  0x90   :  { %v67_v14 = vld [vmem:[#allocation2] sm:$0xff] }
  0x91   :  { %v73_v15 = vadd.f32 %v88_v13, %v67_v14  ;;  %v68_v16 = vld [vmem:[#allocation2 + $0x8] sm:$0xff] }
  0x92   :  { %v74_v17 = vadd.f32 %v88_v13, %v68_v16 }
  0x93   :  { %75 = vst.msk [vmem:[%s146_s3] sm:$0xff] %vm18_vm0, %v73_v15 }
  0x94   :  { %76 = vst.msk [vmem:[%s146_s3 + $0x8] sm:$0xff] %vm18_vm0, %v74_v17 }

// kernel: transformer_forward.37
= control target key start
LH: loop header
LB: loop body
LE: loop exit
PB: predicated region body
PF: predicated region fallthrough
CT: control target
= control target key end

     0   :  { %s709_s15 = smov 0   ;;  %s769_s0 = inlined_call_operand.vmem [shape: f32[2,4,8,8], index: 0, kind: input, shape index: {}]   ;;  %s770_s1 = inlined_call_operand.vmem [shape: f32[2,4,8,8], index: 1, kind: input, shape index: {}]   ;;  %s771_s2 = inlined_call_operand.vmem [shape: f32[2,4,8,8], index: 2, kind: input, shape index: {}]   ;;  %s772_s3 = inlined_call_operand.vmem [shape: f32[2,1,8], index: 3, kind: input, shape index: {}]   ;;  %s773_s4 = inlined_call_operand.vmem [shape: f32[2,4,8,8], index: 4, kind: output, shape index: {}]  }
   0x1 LB: > { %s620_s16 = sadd.s32 4294967295, %s682_s15   ;;  %p624_p0 = scmp.ge.s32.totalorder %s682_s15, 1  ;;  %s682_s15 = sphi %s709_s15, %s14_s15  }
   0x2   : > { %p190_p1 = scmp.lt.s32.totalorder %s682_s15, 3 }
   0x4   : > { %p191_p2 = pnand %p624_p0, %p190_p1 }
   0x5   : > { %p229_p3 = scmp.lt.s32.totalorder (!%p191_p2), %s620_s16, 1 }
   0x6   : > { %194 = sbr.rel (%p191_p2) target bundleno = 550 (0x226), region = 36 }
   0xb   : > { %s775_s16 = smov (!%p229_p3, %s620_s16), 1  ;;  %vm265_vm0 = vcmask 64512   ;;  %v381_v8 = vlaneseq }
   0xc   : > { %s717_s17 = sshll.u32 %s775_s16, 5  ;;  %s246_s20 = scalar_lea.vmem %s772_s3, %s775_s16 }
   0xd   : > { %s238_s23 = scalar_lea.vmem %s770_s1, %s717_s17  ;;  %s233_s26 = scalar_lea.vmem %s769_s0, %s717_s17  ;;  %v382_v9 = vshrl.u32 %v381_v8, 7  ;;  %v384_v10 = vand.u32 127, %v381_v8  ;;  %v659_v11 = vld [vmem:[%s246_s20] ss:$0 sm:$0xff] }
   0xe   : > { %v256_v0 = vld [vmem:[%s238_s23] sm:$0xff]  ;;  %v258_v1 = vld [vmem:[%s238_s23 + $0x10] sm:$0xff]  ;;  %v257_v4 = vld [vmem:[%s238_s23 + $0x8] sm:$0xff]  ;;  %s243_s29 = scalar_lea.vmem %s771_s2, %s717_s17  ;;  %s251_s6 = scalar_lea.vmem %s773_s4, %s717_s17 }
   0xf   : > { %v252_v2 = vld [vmem:[%s233_s26] sm:$0xff]  ;;  %633 = vmatpush.xpose.msk.msra.mxu0 %vm265_vm0, %v256_v0  ;;  %637 = vmatpush.xpose.msk.msra.mxu2 %vm265_vm0, %v258_v1  ;;  %v254_v3 = vld [vmem:[%s233_s26 + $0x10] sm:$0xff]  ;;  %v259_v5 = vld [vmem:[%s238_s23 + $0x18] sm:$0xff]  ;;  %vm385_vm1 = vcmp.le.s32.totalorder %v384_v10, %v382_v9 }
  0x10   : > { %635 = vmatpush.xpose.msk.msra.mxu1 %vm265_vm0, %v257_v4  ;;  %639 = vmatpush.xpose.msk.msra.mxu3 %vm265_vm0, %v259_v5  ;;  %v253_v6 = vld [vmem:[%s233_s26 + $0x8] sm:$0xff]  ;;  %v255_v7 = vld [vmem:[%s233_s26 + $0x18] sm:$0xff]  ;;  %v260_v52 = vld [vmem:[%s243_s29] sm:$0xff] }
  0x11   : > { %v262_v53 = vld [vmem:[%s243_s29 + $0x10] sm:$0xff]  ;;  %v261_v54 = vld [vmem:[%s243_s29 + $0x8] sm:$0xff]  ;;  %v263_v55 = vld [vmem:[%s243_s29 + $0x18] sm:$0xff] }
  0x12   : > { %634 = vmatmul.msk.f32.vlgmr.msra.gmra.mxu0 %vm265_vm0, %v252_v2  ;;  %638 = vmatmul.msk.f32.vlgmr.msra.gmra.mxu2 %vm265_vm0, %v254_v3 }
  0x13   : > { %636 = vmatmul.msk.f32.vlgmr.msra.gmra.mxu1 %vm265_vm0, %v253_v6  ;;  %640 = vmatmul.msk.f32.vlgmr.msra.gmra.mxu3 %vm265_vm0, %v255_v7 }
  0x14   : > { %454 = vmatpush.msrb.mxu0 %v260_v52  ;;  %500 = vmatpush.msrb.mxu2 %v262_v53 }
  0x15   : > { %477 = vmatpush.msrb.mxu1 %v261_v54  ;;  %523 = vmatpush.msrb.mxu3 %v263_v55 }
  0x8f   : > { %v289_v12 = vpop.f32.mrf.mxu0 }
  0x90   : > { %v370_v13 = vmul.f32 0.35355338, %v289_v12  ;;  %v315_v14 = vpop.f32.mrf.mxu1 }
  0x91   : > { %v371_v15 = vmul.f32 0.35355338, %v315_v14 }
  0x92   : > { %v377_v16 = vadd.f32 %v659_v11, %v370_v13 }
  0x93   : > { %v378_v18 = vadd.f32 %v659_v11, %v371_v15 }
  0x94   : > { %v388_v17 = vsel %vm385_vm1, %v377_v16, -1e+30 }
  0x95   : > { %v341_v19 = vpop.f32.mrf.mxu2  ;;  %v392_v20 = vsel %vm265_vm0, %v388_v17, -inf  ;;  %v389_v25 = vsel %vm385_vm1, %v378_v18, -1e+30 }
  0x96   : > { %v372_v21 = vmul.f32 0.35355338, %v341_v19  ;;  %393 = vmax.xlane.f32.xlu1 %v392_v20  ;;  %v367_v22 = vpop.f32.mrf.mxu3  ;;  %v395_v29 = vsel %vm265_vm0, %v389_v25, -inf }
  0x97   : > { %v373_v23 = vmul.f32 0.35355338, %v367_v22 }
  0x98   : > { %v379_v24 = vadd.f32 %v659_v11, %v372_v21 }
  0x99   : > { %v380_v27 = vadd.f32 %v659_v11, %v373_v23 }
  0x9a   : > { %v390_v26 = vsel %vm385_vm1, %v379_v24, -1e+30 }
  0x9b   : > { %v398_v28 = vsel %vm265_vm0, %v390_v26, -inf  ;;  %v391_v30 = vsel %vm385_vm1, %v380_v27, -1e+30 }
  0x9c   : > { %399 = vmax.xlane.f32.xlu0 %v398_v28  ;;  %v401_v31 = vsel %vm265_vm0, %v391_v30, -inf }
  0x9e   : > { %396 = vmax.xlane.f32.xlu1 %v395_v29 }
  0xa4   : > { %402 = vmax.xlane.f32.xlu0 %v401_v31 }
 0x109   : > { %v394_v32 = vpop.xlane.xlu1 %393 }
 0x10a   : > { %v404_v33 = vsub.f32 %v388_v17, %v394_v32 }
 0x10c   : > { %v408_v34 = vmul.f32 1.442695, %v404_v33 }
 0x10e   : > { %660 = vpow2.f32 %v408_v34 }
 0x10f   : > { %v400_v35 = vpop.xlane.xlu0 %399 }
 0x110   : > { %v406_v36 = vsub.f32 %v390_v26, %v400_v35 }
 0x111   : > { %v397_v37 = vpop.xlane.xlu1 %396 }
 0x112   : > { %v412_v38 = vmul.f32 1.442695, %v406_v36  ;;  %v405_v39 = vsub.f32 %v389_v25, %v397_v37 }
 0x114   : > { %v661_v40 = vpop.eup %660  ;;  %662 = vpow2.f32 %v412_v38  ;;  %v410_v41 = vmul.f32 1.442695, %v405_v39 }
 0x115   : > { %v416_v42 = vsel %vm265_vm0, %v661_v40, 0.0 }
 0x116   : > { %664 = vpow2.f32 %v410_v41  ;;  %417 = vadd.xlane.f32.xlu0 %v416_v42 }
 0x117   : > { %v403_v43 = vpop.xlane.xlu0 %402 }
 0x118   : > { %v407_v44 = vsub.f32 %v391_v30, %v403_v43 }
 0x11a   : > { %v663_v45 = vpop.eup %662  ;;  %v414_v46 = vmul.f32 1.442695, %v407_v44 }
 0x11b   : > { %v422_v47 = vsel %vm265_vm0, %v663_v45, 0.0 }
 0x11c   : > { %v665_v48 = vpop.eup %664  ;;  %666 = vpow2.f32 %v414_v46  ;;  %423 = vadd.xlane.f32.xlu2 %v422_v47 }
 0x11d   : > { %v419_v49 = vsel %vm265_vm0, %v665_v48, 0.0 }
 0x11e   : > { %420 = vadd.xlane.f32.xlu1 %v419_v49 }
 0x122   : > { %v667_v50 = vpop.eup %666 }
 0x123   : > { %v425_v51 = vsel %vm265_vm0, %v667_v50, 0.0 }
 0x124   : > { %426 = vadd.xlane.f32.xlu2 %v425_v51 }
 0x189   : > { %v418_v56 = vpop.xlane.xlu0 %417 }
 0x18a   : > { %668 = vrcp.f32 %v418_v56 }
 0x18f   : > { %v424_v57 = vpop.xlane.xlu2 %423 }
 0x190   : > { %v669_v58 = vpop.eup %668  ;;  %670 = vrcp.f32 %v424_v57 }
 0x191   : > { %v432_v59 = vmul.f32 %v669_v58, %v661_v40  ;;  %v421_v60 = vpop.xlane.xlu1 %420 }
 0x192   : > { %672 = vrcp.f32 %v421_v60 }
 0x193   : > { %641 = vmatmul.msk.f32.vlgmr.msrb.gmra.mxu0 %vm265_vm0, %v432_v59 }
 0x196   : > { %v671_v61 = vpop.eup %670 }
 0x197   : > { %v427_v62 = vpop.xlane.xlu2 %426  ;;  %v434_v63 = vmul.f32 %v671_v61, %v663_v45 }
 0x198   : > { %v673_v0 = vpop.eup %672  ;;  %674 = vrcp.f32 %v427_v62 }
 0x199   : > { %v433_v1 = vmul.f32 %v673_v0, %v665_v48  ;;  %643 = vmatmul.msk.f32.vlgmr.msrb.gmra.mxu2 %vm265_vm0, %v434_v63 }
 0x19b   : > { %642 = vmatmul.msk.f32.vlgmr.msrb.gmra.mxu1 %vm265_vm0, %v433_v1 }
 0x19e   : > { %v675_v2 = vpop.eup %674 }
 0x19f   : > { %v435_v3 = vmul.f32 %v675_v2, %v667_v50 }
 0x1a1   : > { %644 = vmatmul.msk.f32.vlgmr.msrb.gmra.mxu3 %vm265_vm0, %v435_v3 }
 0x210   : > { %v456_v4 = vpop.f32.mrf.mxu0 }
 0x211   : > { %528 = vst.msk [vmem:[%s251_s6] sm:$0xff] %vm265_vm0, %v456_v4 }
 0x218   : > { %v479_v5 = vpop.f32.mrf.mxu1 }
 0x219   : > { %529 = vst.msk [vmem:[%s251_s6 + $0x8] sm:$0xff] %vm265_vm0, %v479_v5 }
 0x21c   : > { %v502_v6 = vpop.f32.mrf.mxu2 }
 0x21d   : > { %530 = vst.msk [vmem:[%s251_s6 + $0x10] sm:$0xff] %vm265_vm0, %v502_v6 }
 0x224   : > { %v525_v7 = vpop.f32.mrf.mxu3 }
 0x225   : > { %531 = vst.msk [vmem:[%s251_s6 + $0x18] sm:$0xff] %vm265_vm0, %v525_v7 }
 0x226 PF: > { %s14_s15 = sadd.s32 1, %s682_s15  }
 0x227   : > { %p11_p4 = scmp.ge.s32.totalorder %s14_s15, 4  }
 0x229   :  { %13 = sbr.rel (!%p11_p4) target bundleno = 1 (0x1), region = 75 }

// kernel: transformer_forward.39
= control target key start
LH: loop header
LB: loop body
LE: loop exit
PB: predicated region body
PF: predicated region fallthrough
CT: control target
= control target key end

     0   :  { %vm18_vm0 = vcmask 261120   ;;  %v88_v2 = vmov 0.0   ;;  %s144_s1 = inlined_call_operand.vmem [shape: f32[32,32], index: 1, kind: input, shape index: {}]   ;;  %s145_s2 = inlined_call_operand.vmem [shape: f32[1,32], index: 2, kind: input, shape index: {}]   ;;  %s146_s0 = inlined_call_operand.vmem [shape: f32[16,32], index: 0, kind: input, shape index: {}]   ;;  %s147_s3 = inlined_call_operand.vmem [shape: f32[16,32], index: 3, kind: output, shape index: {}]  }
   0x1   :  { %v28_v0 = vld [vmem:[%s144_s1 + $0x18] sm:$0xff]  ;;  %v27_v1 = vld [vmem:[%s144_s1 + $0x10] sm:$0xff]  ;;  %19 = vst.msk [vmem:[#allocation2] sm:$0xff] %vm18_vm0, %v88_v2  ;;  %v26_v3 = vld [vmem:[%s144_s1 + $0x8] sm:$0xff] }
   0x2   :  { %48 = vmatpush.msra.mxu0 %v28_v0  ;;  %82 = vmatpush.msra.mxu1 %v28_v0  ;;  %20 = vst.msk [vmem:[#allocation2 + $0x8] sm:$0xff] %vm18_vm0, %v88_v2  ;;  %v25_v4 = vld [vmem:[%s144_s1] sm:$0xff]  ;;  %v24_v6 = vld [vmem:[%s146_s0 + $0x8] sm:$0xff] }
   0x3   :  { %v23_v5 = vld [vmem:[%s146_s0] sm:$0xff] }
   0x4   :  { %49 = vmatpush.msra.mxu0 %v27_v1  ;;  %83 = vmatpush.msra.mxu1 %v27_v1  ;;  %v87_v13 = vld [vmem:[%s145_s2] ss:$0 sm:$0xff] }
   0x6   :  { %50 = vmatpush.msra.mxu0 %v26_v3  ;;  %84 = vmatpush.msra.mxu1 %v26_v3 }
   0x8   :  { %51 = vmatpush.msra.mxu0 %v25_v4  ;;  %85 = vmatpush.msra.mxu1 %v25_v4  ;;  %v21_v7 = vld [vmem:[#allocation2] sm:$0xff] }
   0x9   :  { %80 = vmatmul.msk.f32.vlgmr.msra.gmra.mxu0 %vm18_vm0, %v23_v5  ;;  %81 = vmatmul.msk.f32.vlgmr.msra.gmra.mxu1 %vm18_vm0, %v24_v6  ;;  %v22_v8 = vld [vmem:[#allocation2 + $0x8] sm:$0xff] }
  0x86   :  { %v53_v9 = vpop.f32.mrf.mxu0  ;;  %v56_v10 = vpop.f32.mrf.mxu1 }
  0x87   :  { %v59_v11 = vadd.f32 %v53_v9, %v21_v7  ;;  %v60_v12 = vadd.f32 %v56_v10, %v22_v8 }
  0x89   :  { %61 = vst.msk [vmem:[#allocation2] sm:$0xff] %vm18_vm0, %v59_v11 }
  0x8a   :  { %62 = vst.msk [vmem:[#allocation2 + $0x8] sm:$0xff] %vm18_vm0, %v60_v12 }
  0x90   :  { %v66_v14 = vld [vmem:[#allocation2] sm:$0xff] }
  0x91   :  { %v72_v15 = vadd.f32 %v87_v13, %v66_v14  ;;  %v67_v16 = vld [vmem:[#allocation2 + $0x8] sm:$0xff] }
  0x92   :  { %v73_v17 = vadd.f32 %v87_v13, %v67_v16 }
  0x93   :  { %74 = vst.msk [vmem:[%s147_s3] sm:$0xff] %vm18_vm0, %v72_v15 }
  0x94   :  { %75 = vst.msk [vmem:[%s147_s3 + $0x8] sm:$0xff] %vm18_vm0, %v73_v17 }

// kernel: transformer_forward.38
= control target key start
LH: loop header
LB: loop body
LE: loop exit
PB: predicated region body
PF: predicated region fallthrough
CT: control target
= control target key end

     0   :  { %vm33_vm0 = vcmask 261120   ;;  %v152_v17 = vmov 32.0   ;;  %s235_s1 = inlined_call_operand.vmem [shape: f32[32,32], index: 1, kind: input, shape index: {}]   ;;  %s236_s2 = inlined_call_operand.vmem [shape: f32[1,32], index: 2, kind: input, shape index: {}]   ;;  %s237_s0 = inlined_call_operand.vmem [shape: f32[16,32], index: 0, kind: input, shape index: {}]   ;;  %s238_s3 = inlined_call_operand.vmem [shape: f32[16,32], index: 3, kind: input, shape index: {}]   ;;  %s239_s4 = inlined_call_operand.vmem [shape: f32[1,32], index: 4, kind: input, shape index: {}]   ;;  %s240_s5 = inlined_call_operand.vmem [shape: f32[1,32], index: 5, kind: input, shape index: {}]   ;;  %s241_s6 = inlined_call_operand.vmem [shape: f32[16,32], index: 6, kind: output, shape index: {}]  }
   0x1   :  { %v28_v0 = vld [vmem:[%s235_s1 + $0x18] sm:$0xff]  ;;  %v27_v1 = vld [vmem:[%s235_s1 + $0x10] sm:$0xff]  ;;  %v26_v2 = vld [vmem:[%s235_s1 + $0x8] sm:$0xff]  ;;  %146 = vrcp.f32 %v152_v17 }
   0x2   :  { %52 = vmatpush.msra.mxu0 %v28_v0  ;;  %138 = vmatpush.msra.mxu1 %v28_v0  ;;  %v25_v3 = vld [vmem:[%s235_s1] sm:$0xff]  ;;  %v24_v5 = vld [vmem:[%s237_s0 + $0x8] sm:$0xff] }
   0x3   :  { %v23_v4 = vld [vmem:[%s237_s0] sm:$0xff]  ;;  %v64_v13 = vld [vmem:[%s238_s3 + $0x8] sm:$0xff] }
   0x4   :  { %53 = vmatpush.msra.mxu0 %v27_v1  ;;  %139 = vmatpush.msra.mxu1 %v27_v1  ;;  %v143_v6 = vld [vmem:[%s236_s2] ss:$0 sm:$0xff] }
   0x5   :  { %v63_v8 = vld [vmem:[%s238_s3] sm:$0xff] }
   0x6   :  { %54 = vmatpush.msra.mxu0 %v26_v2  ;;  %140 = vmatpush.msra.mxu1 %v26_v2  ;;  %v144_v48 = vld [vmem:[%s239_s4] ss:$0 sm:$0xff] }
   0x7   :  { %v147_v18 = vpop.eup %146  ;;  %v145_v51 = vld [vmem:[%s240_s5] ss:$0 sm:$0xff] }
   0x8   :  { %55 = vmatpush.msra.mxu0 %v25_v3  ;;  %141 = vmatpush.msra.mxu1 %v25_v3  ;;  %v74_v19 = vmul.f32 32.0, %v147_v18  ;;  %vm78_vm1 = vweird.f32 %v147_v18 }
   0x9   :  { %136 = vmatmul.msk.f32.vlgmr.msra.gmra.mxu0 %vm33_vm0, %v23_v4  ;;  %137 = vmatmul.msk.f32.vlgmr.msra.gmra.mxu1 %vm33_vm0, %v24_v5 }
   0xa   :  { %v75_v20 = vsub.f32 1.0, %v74_v19 }
   0xc   :  { %v76_v21 = vmul.f32 %v147_v18, %v75_v20 }
   0xe   :  { %v77_v22 = vadd.f32 %v147_v18, %v76_v21 }
  0x10   :  { %v79_v23 = vsel %vm78_vm1, %v147_v18, %v77_v22 }
  0x86   :  { %v57_v7 = vpop.f32.mrf.mxu0  ;;  %v60_v9 = vpop.f32.mrf.mxu1 }
  0x87   :  { %v58_v10 = vadd.f32 %v143_v6, %v57_v7  ;;  %v61_v12 = vadd.f32 %v143_v6, %v60_v9 }
  0x89   :  { %v65_v11 = vadd.f32 %v63_v8, %v58_v10  ;;  %v66_v15 = vadd.f32 %v64_v13, %v61_v12 }
  0x8b   :  { %v67_v14 = vsel %vm33_vm0, %v65_v11, 0.0  ;;  %v70_v16 = vsel %vm33_vm0, %v66_v15, 0.0 }
  0x8c   :  { %68 = vadd.xlane.f32.xlu0 %v67_v14 }
  0x94   :  { %71 = vadd.xlane.f32.xlu0 %v70_v16 }
  0xff   :  { %v69_v24 = vpop.xlane.xlu0 %68 }
 0x100   :  { %v80_v25 = vmul.f32 %v79_v23, %v69_v24 }
 0x102   :  { %v82_v26 = vsub.f32 %v65_v11, %v80_v25 }
 0x104   :  { %v84_v27 = vmul.f32 %v82_v26, %v82_v26 }
 0x106   :  { %v86_v28 = vsel %vm33_vm0, %v84_v27, 0.0 }
 0x107   :  { %87 = vadd.xlane.f32.xlu1 %v86_v28  ;;  %v72_v29 = vpop.xlane.xlu0 %71 }
 0x108   :  { %v81_v30 = vmul.f32 %v79_v23, %v72_v29 }
 0x10a   :  { %v83_v31 = vsub.f32 %v66_v15, %v81_v30 }
 0x10c   :  { %v85_v32 = vmul.f32 %v83_v31, %v83_v31 }
 0x10e   :  { %v89_v33 = vsel %vm33_vm0, %v85_v32, 0.0 }
 0x10f   :  { %90 = vadd.xlane.f32.xlu1 %v89_v33 }
 0x17a   :  { %v88_v34 = vpop.xlane.xlu1 %87 }
 0x17b   :  { %v92_v35 = vmul.f32 %v88_v34, %v79_v23 }
 0x17d   :  { %v94_v36 = vadd.f32 1e-05, %v92_v35 }
 0x17f   :  { %148 = vrsqrt.f32 %v94_v36  ;;  %vm102_vm3 = vweird.f32 %v94_v36 }
 0x182   :  { %v91_v37 = vpop.xlane.xlu1 %90 }
 0x183   :  { %v93_v38 = vmul.f32 %v91_v37, %v79_v23 }
 0x185   :  { %v149_v39 = vpop.eup %148  ;;  %v95_v40 = vadd.f32 1e-05, %v93_v38 }
 0x186   :  { %v97_v41 = vmul.f32 %v149_v39, %v94_v36  ;;  %vm103_vm2 = vweird.f32 %v149_v39 }
 0x187   :  { %150 = vrsqrt.f32 %v95_v40  ;;  %vm104_vm4 = vmor %vm102_vm3, %vm103_vm2  ;;  %vm112_vm6 = vweird.f32 %v95_v40 }
 0x188   :  { %v98_v42 = vmul.f32 %v149_v39, %v97_v41 }
 0x18a   :  { %v99_v43 = vmul.f32 0.5, %v98_v42 }
 0x18c   :  { %v100_v44 = vsub.f32 1.5, %v99_v43 }
 0x18d   :  { %v151_v45 = vpop.eup %150 }
 0x18e   :  { %v101_v46 = vmul.f32 %v149_v39, %v100_v44  ;;  %v107_v47 = vmul.f32 %v151_v45, %v95_v40  ;;  %vm113_vm5 = vweird.f32 %v151_v45 }
 0x18f   :  { %vm114_vm7 = vmor %vm112_vm6, %vm113_vm5 }
 0x190   :  { %v105_v49 = vsel %vm104_vm4, %v149_v39, %v101_v46  ;;  %v108_v50 = vmul.f32 %v151_v45, %v107_v47 }
 0x191   :  { %v116_v52 = vmul.f32 %v105_v49, %v82_v26 }
 0x192   :  { %v109_v53 = vmul.f32 0.5, %v108_v50 }
 0x193   :  { %v122_v54 = vmul.f32 %v144_v48, %v116_v52 }
 0x194   :  { %v110_v55 = vsub.f32 1.5, %v109_v53 }
 0x195   :  { %v128_v56 = vadd.f32 %v145_v51, %v122_v54 }
 0x196   :  { %v111_v57 = vmul.f32 %v151_v45, %v110_v55 }
 0x197   :  { %130 = vst.msk [vmem:[%s241_s6] sm:$0xff] %vm33_vm0, %v128_v56 }
 0x198   :  { %v115_v58 = vsel %vm114_vm7, %v151_v45, %v111_v57 }
 0x199   :  { %v117_v59 = vmul.f32 %v115_v58, %v83_v31 }
 0x19b   :  { %v123_v60 = vmul.f32 %v144_v48, %v117_v59 }
 0x19d   :  { %v129_v61 = vadd.f32 %v145_v51, %v123_v60 }
 0x19f   :  { %131 = vst.msk [vmem:[%s241_s6 + $0x8] sm:$0xff] %vm33_vm0, %v129_v61 }

// kernel: transformer_forward.41
= control target key start
LH: loop header
LB: loop body
LE: loop exit
PB: predicated region body
PF: predicated region fallthrough
CT: control target
= control target key end

     0   :  { %s740_s15 = smov 0   ;;  %s807_s0 = inlined_call_operand.vmem [shape: f32[2,4,8,8], index: 0, kind: input, shape index: {}]   ;;  %s808_s1 = inlined_call_operand.vmem [shape: f32[2,4,10,8], index: 1, kind: input, shape index: {}]   ;;  %s809_s2 = inlined_call_operand.vmem [shape: f32[2,4,10,8], index: 2, kind: input, shape index: {}]   ;;  %s810_s3 = inlined_call_operand.vmem [shape: f32[2,1,10], index: 3, kind: input, shape index: {}]   ;;  %s811_s4 = inlined_call_operand.vmem [shape: f32[2,4,8,8], index: 4, kind: output, shape index: {}]  }
   0x1 LB: > { %s643_s16 = sadd.s32 4294967295, %s713_s15   ;;  %p647_p0 = scmp.ge.s32.totalorder %s713_s15, 1  ;;  %s713_s15 = sphi %s740_s15, %s14_s15  }
   0x2   : > { %p190_p1 = scmp.lt.s32.totalorder %s713_s15, 3 }
   0x4   : > { %p191_p2 = pnand %p647_p0, %p190_p1 }
   0x5   : > { %p229_p3 = scmp.lt.s32.totalorder (!%p191_p2), %s643_s16, 1 }
   0x6   : > { %194 = sbr.rel (%p191_p2) target bundleno = 554 (0x22a), region = 36 }
   0xb   : > { %s813_s16 = smov (!%p229_p3, %s643_s16), 1  ;;  %vm273_vm0 = vcmask 64512   ;;  %vm401_vm1 = vcmask 80896   ;;  %vm449_vm2 = vcmask 1041408  }
   0xc   : > { %s679_s17 = sshll.u32 %s813_s16, 6  ;;  %s678_s21 = sshll.u32 %s813_s16, 5 }
   0xd   : > { %s238_s20 = scalar_lea.vmem %s808_s1, %s679_s17  ;;  %s233_s24 = scalar_lea.vmem %s807_s0, %s678_s21 }
   0xe   : > { %v257_v0 = vld [vmem:[%s238_s20 + $0x8] sm:$0x3]  ;;  %v256_v2 = vld [vmem:[%s238_s20] sm:$0xff]  ;;  %v259_v4 = vld [vmem:[%s238_s20 + $0x18] sm:$0x3]  ;;  %s246_s27 = scalar_lea.vmem %s810_s3, %s813_s16  ;;  %s243_s30 = scalar_lea.vmem %s809_s2, %s679_s17 }
   0xf   : > { %v261_v1 = vld [vmem:[%s238_s20 + $0x28] sm:$0x3]  ;;  %656 = vmatpush.xpose.msk.msra.mxu0 %vm273_vm0, %v257_v0  ;;  %v260_v3 = vld [vmem:[%s238_s20 + $0x20] sm:$0xff]  ;;  %v263_v5 = vld [vmem:[%s238_s20 + $0x38] sm:$0x3]  ;;  %659 = vmatpush.xpose.msk.msra.mxu1 %vm273_vm0, %v259_v4  ;;  %s251_s7 = scalar_lea.vmem %s811_s4, %s678_s21 }
  0x10   : > { %662 = vmatpush.xpose.msk.msra.mxu2 %vm273_vm0, %v261_v1  ;;  %665 = vmatpush.xpose.msk.msra.mxu3 %vm273_vm0, %v263_v5  ;;  %v258_v6 = vld [vmem:[%s238_s20 + $0x10] sm:$0xff]  ;;  %v252_v8 = vld [vmem:[%s233_s24] sm:$0xff]  ;;  %v253_v10 = vld [vmem:[%s233_s24 + $0x8] sm:$0xff] }
  0x11   : > { %v262_v7 = vld [vmem:[%s238_s20 + $0x30] sm:$0xff]  ;;  %v255_v11 = vld [vmem:[%s233_s24 + $0x18] sm:$0xff]  ;;  %v690_v12 = vld [vmem:[%s246_s27] ss:$0 sm:$0xff] }
  0x12   : > { %v254_v9 = vld [vmem:[%s233_s24 + $0x10] sm:$0xff]  ;;  %v265_v49 = vld [vmem:[%s243_s30 + $0x8] sm:$0x3]  ;;  %v264_v50 = vld [vmem:[%s243_s30] sm:$0xff] }
  0x13   : > { %657 = vmatpush.xpose.msk.msra.mxu0 %vm273_vm0, %v256_v2  ;;  %660 = vmatpush.xpose.msk.msra.mxu1 %vm273_vm0, %v258_v6  ;;  %v269_v51 = vld [vmem:[%s243_s30 + $0x28] sm:$0x3]  ;;  %v267_v52 = vld [vmem:[%s243_s30 + $0x18] sm:$0x3]  ;;  %v268_v53 = vld [vmem:[%s243_s30 + $0x20] sm:$0xff] }
  0x14   : > { %663 = vmatpush.xpose.msk.msra.mxu2 %vm273_vm0, %v260_v3  ;;  %666 = vmatpush.xpose.msk.msra.mxu3 %vm273_vm0, %v262_v7  ;;  %v266_v54 = vld [vmem:[%s243_s30 + $0x10] sm:$0xff]  ;;  %v271_v55 = vld [vmem:[%s243_s30 + $0x38] sm:$0x3] }
  0x15   : > { %v270_v56 = vld [vmem:[%s243_s30 + $0x30] sm:$0xff] }
  0x16   : > { %658 = vmatmul.msk.f32.vlgmr.msra.gmra.mxu0 %vm273_vm0, %v252_v8  ;;  %661 = vmatmul.msk.f32.vlgmr.msra.gmra.mxu1 %vm273_vm0, %v253_v10 }
  0x17   : > { %664 = vmatmul.msk.f32.vlgmr.msra.gmra.mxu2 %vm273_vm0, %v254_v9  ;;  %667 = vmatmul.msk.f32.vlgmr.msra.gmra.mxu3 %vm273_vm0, %v255_v11 }
  0x18   : > { %668 = vmatpush.msk.msrb.mxu0 %vm449_vm2, %v265_v49  ;;  %672 = vmatpush.msk.msrb.mxu2 %vm449_vm2, %v269_v51 }
  0x19   : > { %670 = vmatpush.msk.msrb.mxu1 %vm449_vm2, %v267_v52  ;;  %674 = vmatpush.msk.msrb.mxu3 %vm449_vm2, %v271_v55 }
  0x1a   : > { %468 = vmatpush.msrb.mxu0 %v264_v50  ;;  %520 = vmatpush.msrb.mxu2 %v268_v53 }
  0x1b   : > { %494 = vmatpush.msrb.mxu1 %v266_v54  ;;  %546 = vmatpush.msrb.mxu3 %v270_v56 }
  0x93   : > { %v300_v13 = vpop.f32.mrf.mxu0  ;;  %v329_v15 = vpop.f32.mrf.mxu1 }
  0x94   : > { %v390_v14 = vmul.f32 0.35355338, %v300_v13  ;;  %v391_v17 = vmul.f32 0.35355338, %v329_v15 }
  0x96   : > { %v397_v16 = vadd.f32 %v690_v12, %v390_v14  ;;  %v398_v21 = vadd.f32 %v690_v12, %v391_v17 }
  0x98   : > { %v402_v18 = vsel %vm401_vm1, %v397_v16, -inf  ;;  %v405_v26 = vsel %vm401_vm1, %v398_v21, -inf }
  0x99   : > { %403 = vmax.xlane.f32.xlu1 %v402_v18 }
  0x9a   : > { %v358_v19 = vpop.f32.mrf.mxu2  ;;  %v387_v22 = vpop.f32.mrf.mxu3 }
  0x9b   : > { %v392_v20 = vmul.f32 0.35355338, %v358_v19  ;;  %v393_v24 = vmul.f32 0.35355338, %v387_v22 }
  0x9d   : > { %v399_v23 = vadd.f32 %v690_v12, %v392_v20  ;;  %v400_v27 = vadd.f32 %v690_v12, %v393_v24 }
  0x9f   : > { %v408_v25 = vsel %vm401_vm1, %v399_v23, -inf  ;;  %v411_v28 = vsel %vm401_vm1, %v400_v27, -inf }
  0xa0   : > { %409 = vmax.xlane.f32.xlu0 %v408_v25 }
  0xa1   : > { %406 = vmax.xlane.f32.xlu1 %v405_v26 }
  0xa8   : > { %412 = vmax.xlane.f32.xlu0 %v411_v28 }
 0x10c   : > { %v404_v29 = vpop.xlane.xlu1 %403 }
 0x10d   : > { %v414_v30 = vsub.f32 %v397_v16, %v404_v29 }
 0x10f   : > { %v418_v31 = vmul.f32 1.442695, %v414_v30 }
 0x111   : > { %691 = vpow2.f32 %v418_v31 }
 0x113   : > { %v410_v32 = vpop.xlane.xlu0 %409 }
 0x114   : > { %v416_v33 = vsub.f32 %v399_v23, %v410_v32  ;;  %v407_v34 = vpop.xlane.xlu1 %406 }
 0x115   : > { %v415_v36 = vsub.f32 %v398_v21, %v407_v34 }
 0x116   : > { %v422_v35 = vmul.f32 1.442695, %v416_v33 }
 0x117   : > { %v692_v37 = vpop.eup %691  ;;  %v420_v38 = vmul.f32 1.442695, %v415_v36 }
 0x118   : > { %693 = vpow2.f32 %v422_v35  ;;  %v426_v39 = vsel %vm401_vm1, %v692_v37, 0.0 }
 0x119   : > { %695 = vpow2.f32 %v420_v38  ;;  %427 = vadd.xlane.f32.xlu0 %v426_v39 }
 0x11b   : > { %v413_v40 = vpop.xlane.xlu0 %412 }
 0x11c   : > { %v417_v41 = vsub.f32 %v400_v27, %v413_v40 }
 0x11e   : > { %v694_v42 = vpop.eup %693  ;;  %v424_v43 = vmul.f32 1.442695, %v417_v41 }
 0x11f   : > { %v432_v44 = vsel %vm401_vm1, %v694_v42, 0.0  ;;  %v696_v45 = vpop.eup %695 }
 0x120   : > { %697 = vpow2.f32 %v424_v43  ;;  %433 = vadd.xlane.f32.xlu2 %v432_v44  ;;  %v429_v46 = vsel %vm401_vm1, %v696_v45, 0.0 }
 0x121   : > { %430 = vadd.xlane.f32.xlu1 %v429_v46 }
 0x126   : > { %v698_v47 = vpop.eup %697 }
 0x127   : > { %v435_v48 = vsel %vm401_vm1, %v698_v47, 0.0 }
 0x128   : > { %436 = vadd.xlane.f32.xlu2 %v435_v48 }
 0x18c   : > { %v428_v57 = vpop.xlane.xlu0 %427 }
 0x18d   : > { %699 = vrcp.f32 %v428_v57 }
 0x193   : > { %v434_v58 = vpop.xlane.xlu2 %433  ;;  %v700_v59 = vpop.eup %699 }
 0x194   : > { %701 = vrcp.f32 %v434_v58  ;;  %v442_v60 = vmul.f32 %v700_v59, %v692_v37  ;;  %v431_v61 = vpop.xlane.xlu1 %430 }
 0x195   : > { %703 = vrcp.f32 %v431_v61 }
 0x196   : > { %669 = vmatmul.msk.f32.vlgmr.msrb.gmra.mxu0 %vm401_vm1, %v442_v60 }
 0x19a   : > { %v702_v62 = vpop.eup %701 }
 0x19b   : > { %v437_v63 = vpop.xlane.xlu2 %436  ;;  %v444_v0 = vmul.f32 %v702_v62, %v694_v42  ;;  %v704_v1 = vpop.eup %703 }
 0x19c   : > { %705 = vrcp.f32 %v437_v63  ;;  %v443_v2 = vmul.f32 %v704_v1, %v696_v45 }
 0x19d   : > { %673 = vmatmul.msk.f32.vlgmr.msrb.gmra.mxu2 %vm401_vm1, %v444_v0 }
 0x19e   : > { %671 = vmatmul.msk.f32.vlgmr.msrb.gmra.mxu1 %vm401_vm1, %v443_v2 }
 0x1a2   : > { %v706_v3 = vpop.eup %705 }
 0x1a3   : > { %v445_v4 = vmul.f32 %v706_v3, %v698_v47 }
 0x1a5   : > { %675 = vmatmul.msk.f32.vlgmr.msrb.gmra.mxu3 %vm401_vm1, %v445_v4 }
 0x213   : > { %v470_v5 = vpop.f32.mrf.mxu0 }
 0x214   : > { %551 = vst.msk [vmem:[%s251_s7] sm:$0xff] %vm273_vm0, %v470_v5 }
 0x21b   : > { %v496_v6 = vpop.f32.mrf.mxu1 }
 0x21c   : > { %552 = vst.msk [vmem:[%s251_s7 + $0x8] sm:$0xff] %vm273_vm0, %v496_v6 }
 0x220   : > { %v522_v7 = vpop.f32.mrf.mxu2 }
 0x221   : > { %553 = vst.msk [vmem:[%s251_s7 + $0x10] sm:$0xff] %vm273_vm0, %v522_v7 }
 0x228   : > { %v548_v8 = vpop.f32.mrf.mxu3 }
 0x229   : > { %554 = vst.msk [vmem:[%s251_s7 + $0x18] sm:$0xff] %vm273_vm0, %v548_v8 }
 0x22a PF: > { %s14_s15 = sadd.s32 1, %s713_s15  }
 0x22b   : > { %p11_p4 = scmp.ge.s32.totalorder %s14_s15, 4  }
 0x22d   :  { %13 = sbr.rel (!%p11_p4) target bundleno = 1 (0x1), region = 75 }

// kernel: transformer_forward.52
= control target key start
LH: loop header
LB: loop body
LE: loop exit
PB: predicated region body
PF: predicated region fallthrough
CT: control target
= control target key end

     0   :  { %vm16_vm0 = vcmask 261120   ;;  %v95_v4 = vmov 32.0   ;;  %s140_s0 = inlined_call_operand.vmem [shape: f32[16,32], index: 0, kind: input, shape index: {}]   ;;  %s141_s1 = inlined_call_operand.vmem [shape: f32[1,32], index: 1, kind: input, shape index: {}]   ;;  %s142_s2 = inlined_call_operand.vmem [shape: f32[1,32], index: 2, kind: input, shape index: {}]   ;;  %s143_s3 = inlined_call_operand.vmem [shape: f32[16,32], index: 3, kind: output, shape index: {}]  }
   0x1   :  { %v14_v0 = vld [vmem:[%s140_s0] sm:$0xff]  ;;  %v15_v2 = vld [vmem:[%s140_s0 + $0x8] sm:$0xff]  ;;  %89 = vrcp.f32 %v95_v4 }
   0x2   :  { %v17_v1 = vsel %vm16_vm0, %v14_v0, 0.0  ;;  %v20_v3 = vsel %vm16_vm0, %v15_v2, 0.0  ;;  %v87_v35 = vld [vmem:[%s141_s1] ss:$0 sm:$0xff] }
   0x3   :  { %18 = vadd.xlane.f32.xlu0 %v17_v1  ;;  %v88_v38 = vld [vmem:[%s142_s2] ss:$0 sm:$0xff] }
   0x7   :  { %v90_v5 = vpop.eup %89 }
   0x8   :  { %v24_v6 = vmul.f32 32.0, %v90_v5  ;;  %vm28_vm1 = vweird.f32 %v90_v5 }
   0xa   :  { %v25_v7 = vsub.f32 1.0, %v24_v6 }
   0xb   :  { %21 = vadd.xlane.f32.xlu0 %v20_v3 }
   0xc   :  { %v26_v8 = vmul.f32 %v90_v5, %v25_v7 }
   0xe   :  { %v27_v9 = vadd.f32 %v90_v5, %v26_v8 }
  0x10   :  { %v29_v10 = vsel %vm28_vm1, %v90_v5, %v27_v9 }
  0x76   :  { %v19_v11 = vpop.xlane.xlu0 %18 }
  0x77   :  { %v30_v12 = vmul.f32 %v29_v10, %v19_v11 }
  0x79   :  { %v32_v13 = vsub.f32 %v14_v0, %v30_v12 }
  0x7b   :  { %v34_v14 = vmul.f32 %v32_v13, %v32_v13 }
  0x7d   :  { %v36_v15 = vsel %vm16_vm0, %v34_v14, 0.0 }
  0x7e   :  { %37 = vadd.xlane.f32.xlu1 %v36_v15  ;;  %v22_v16 = vpop.xlane.xlu0 %21 }
  0x7f   :  { %v31_v17 = vmul.f32 %v29_v10, %v22_v16 }
  0x81   :  { %v33_v18 = vsub.f32 %v15_v2, %v31_v17 }
  0x83   :  { %v35_v19 = vmul.f32 %v33_v18, %v33_v18 }
  0x85   :  { %v39_v20 = vsel %vm16_vm0, %v35_v19, 0.0 }
  0x86   :  { %40 = vadd.xlane.f32.xlu1 %v39_v20 }
  0xf1   :  { %v38_v21 = vpop.xlane.xlu1 %37 }
  0xf2   :  { %v42_v22 = vmul.f32 %v38_v21, %v29_v10 }
  0xf4   :  { %v44_v23 = vadd.f32 1e-05, %v42_v22 }
  0xf6   :  { %91 = vrsqrt.f32 %v44_v23  ;;  %vm52_vm3 = vweird.f32 %v44_v23 }
  0xf9   :  { %v41_v24 = vpop.xlane.xlu1 %40 }
  0xfa   :  { %v43_v25 = vmul.f32 %v41_v24, %v29_v10 }
  0xfc   :  { %v92_v26 = vpop.eup %91  ;;  %v45_v27 = vadd.f32 1e-05, %v43_v25 }
  0xfd   :  { %v47_v28 = vmul.f32 %v92_v26, %v44_v23  ;;  %vm53_vm2 = vweird.f32 %v92_v26 }
  0xfe   :  { %93 = vrsqrt.f32 %v45_v27  ;;  %vm54_vm4 = vmor %vm52_vm3, %vm53_vm2  ;;  %vm62_vm6 = vweird.f32 %v45_v27 }
  0xff   :  { %v48_v29 = vmul.f32 %v92_v26, %v47_v28 }
 0x101   :  { %v49_v30 = vmul.f32 0.5, %v48_v29 }
 0x103   :  { %v50_v31 = vsub.f32 1.5, %v49_v30 }
 0x104   :  { %v94_v32 = vpop.eup %93 }
 0x105   :  { %v51_v33 = vmul.f32 %v92_v26, %v50_v31  ;;  %v57_v34 = vmul.f32 %v94_v32, %v45_v27  ;;  %vm63_vm5 = vweird.f32 %v94_v32 }
 0x106   :  { %vm64_vm7 = vmor %vm62_vm6, %vm63_vm5 }
 0x107   :  { %v55_v36 = vsel %vm54_vm4, %v92_v26, %v51_v33  ;;  %v58_v37 = vmul.f32 %v94_v32, %v57_v34 }
 0x108   :  { %v66_v39 = vmul.f32 %v55_v36, %v32_v13 }
 0x109   :  { %v59_v40 = vmul.f32 0.5, %v58_v37 }
 0x10a   :  { %v72_v41 = vmul.f32 %v87_v35, %v66_v39 }
 0x10b   :  { %v60_v42 = vsub.f32 1.5, %v59_v40 }
 0x10c   :  { %v78_v43 = vadd.f32 %v88_v38, %v72_v41 }
 0x10d   :  { %v61_v44 = vmul.f32 %v94_v32, %v60_v42 }
 0x10e   :  { %80 = vst.msk [vmem:[%s143_s3] sm:$0xff] %vm16_vm0, %v78_v43 }
 0x10f   :  { %v65_v45 = vsel %vm64_vm7, %v94_v32, %v61_v44 }
 0x110   :  { %v67_v46 = vmul.f32 %v65_v45, %v33_v18 }
 0x112   :  { %v73_v47 = vmul.f32 %v87_v35, %v67_v46 }
 0x114   :  { %v79_v48 = vadd.f32 %v88_v38, %v73_v47 }
 0x116   :  { %81 = vst.msk [vmem:[%s143_s3 + $0x8] sm:$0xff] %vm16_vm0, %v79_v48 }

// kernel: transformer_forward.43
= control target key start
LH: loop header
LB: loop body
LE: loop exit
PB: predicated region body
PF: predicated region fallthrough
CT: control target
= control target key end

     0   :  { %vm30_vm0 = vcmask 261120   ;;  %v231_v14 = vmov 0.0   ;;  %vm85_vm1 = vcmask 523264   ;;  %v232_v37 = vmov 32.0   ;;  %s345_s1 = inlined_call_operand.vmem [shape: f32[32,64], index: 1, kind: input, shape index: {}]   ;;  %s346_s3 = inlined_call_operand.vmem [shape: f32[64,32], index: 3, kind: input, shape index: {}]   ;;  %s347_s0 = inlined_call_operand.vmem [shape: f32[16,32], index: 0, kind: input, shape index: {}]   ;;  %s348_s2 = inlined_call_operand.vmem [shape: f32[1,64], index: 2, kind: input, shape index: {}]   ;;  %s349_s4 = inlined_call_operand.vmem [shape: f32[1,32], index: 4, kind: input, shape index: {}]   ;;  %s350_s5 = inlined_call_operand.vmem [shape: f32[1,32], index: 5, kind: input, shape index: {}]   ;;  %s351_s6 = inlined_call_operand.vmem [shape: f32[1,32], index: 6, kind: input, shape index: {}]   ;;  %s352_s7 = inlined_call_operand.vmem [shape: f32[16,32], index: 7, kind: output, shape index: {}]  }
   0x1   :  { %v38_v0 = vld [vmem:[%s345_s1 + $0x18] sm:$0xff]  ;;  %v37_v1 = vld [vmem:[%s345_s1 + $0x10] sm:$0xff]  ;;  %v36_v2 = vld [vmem:[%s345_s1 + $0x8] sm:$0xff]  ;;  %31 = vst.msk [vmem:[#allocation2] sm:$0xff] %vm30_vm0, %v231_v14  ;;  %225 = vrcp.f32 %v232_v37 }
   0x2   :  { %62 = vmatpush.msra.mxu0 %v38_v0  ;;  %207 = vmatpush.msra.mxu3 %v38_v0  ;;  %v84_v3 = vld [vmem:[%s346_s3 + $0x38] sm:$0xff]  ;;  %v83_v4 = vld [vmem:[%s346_s3 + $0x30] sm:$0xff]  ;;  %v35_v5 = vld [vmem:[%s345_s1] sm:$0xff]  ;;  %32 = vst.msk [vmem:[#allocation2 + $0x8] sm:$0xff] %vm30_vm0, %v231_v14 }
   0x3   :  { %100 = vmatpush.msra.mxu1 %v84_v3  ;;  %211 = vmatpush.msra.mxu2 %v84_v3  ;;  %v33_v6 = vld [vmem:[%s347_s0] sm:$0xff]  ;;  %v34_v7 = vld [vmem:[%s347_s0 + $0x8] sm:$0xff]  ;;  %v80_v10 = vld [vmem:[%s346_s3 + $0x18] sm:$0xff] }
   0x4   :  { %63 = vmatpush.msra.mxu0 %v37_v1  ;;  %208 = vmatpush.msra.mxu3 %v37_v1  ;;  %v82_v8 = vld [vmem:[%s346_s3 + $0x28] sm:$0xff]  ;;  %v81_v9 = vld [vmem:[%s346_s3 + $0x20] sm:$0xff]  ;;  %v79_v11 = vld [vmem:[%s346_s3 + $0x10] sm:$0xff] }
   0x5   :  { %101 = vmatpush.msra.mxu1 %v83_v4  ;;  %212 = vmatpush.msra.mxu2 %v83_v4  ;;  %v78_v12 = vld [vmem:[%s346_s3 + $0x8] sm:$0xff]  ;;  %v77_v13 = vld [vmem:[%s346_s3] sm:$0xff] }
   0x6   :  { %64 = vmatpush.msra.mxu0 %v36_v2  ;;  %209 = vmatpush.msra.mxu3 %v36_v2  ;;  %v221_v15 = vld [vmem:[%s348_s2] ss:$0 sm:$0xff] }
   0x7   :  { %102 = vmatpush.msra.mxu1 %v82_v8  ;;  %213 = vmatpush.msra.mxu2 %v82_v8  ;;  %v222_v25 = vld [vmem:[%s349_s4] ss:$0 sm:$0xff]  ;;  %v226_v38 = vpop.eup %225 }
   0x8   :  { %65 = vmatpush.msra.mxu0 %v35_v5  ;;  %210 = vmatpush.msra.mxu3 %v35_v5  ;;  %v75_v22 = vld [vmem:[#allocation2] sm:$0xff]  ;;  %v141_v39 = vmul.f32 32.0, %v226_v38  ;;  %vm145_vm2 = vweird.f32 %v226_v38 }
   0x9   :  { %203 = vmatmul.msk.f32.vlgmr.msra.gmra.mxu0 %vm30_vm0, %v33_v6  ;;  %204 = vmatmul.msk.f32.vlgmr.msra.gmra.mxu3 %vm30_vm0, %v34_v7  ;;  %v76_v26 = vld [vmem:[#allocation2 + $0x8] sm:$0xff]  ;;  %v223_v2 = vld [vmem:[%s350_s5] ss:$0 sm:$0xff] }
   0xa   :  { %103 = vmatpush.msra.mxu1 %v81_v9  ;;  %214 = vmatpush.msra.mxu2 %v81_v9  ;;  %v142_v40 = vsub.f32 1.0, %v141_v39  ;;  %v224_v5 = vld [vmem:[%s351_s6] ss:$0 sm:$0xff] }
   0xc   :  { %104 = vmatpush.msra.mxu1 %v80_v10  ;;  %215 = vmatpush.msra.mxu2 %v80_v10  ;;  %v143_v41 = vmul.f32 %v226_v38, %v142_v40 }
   0xe   :  { %105 = vmatpush.msra.mxu1 %v79_v11  ;;  %216 = vmatpush.msra.mxu2 %v79_v11  ;;  %v144_v42 = vadd.f32 %v226_v38, %v143_v41 }
  0x10   :  { %106 = vmatpush.msra.mxu1 %v78_v12  ;;  %217 = vmatpush.msra.mxu2 %v78_v12  ;;  %v146_v43 = vsel %vm145_vm2, %v226_v38, %v144_v42 }
  0x12   :  { %107 = vmatpush.msra.mxu1 %v77_v13  ;;  %218 = vmatpush.msra.mxu2 %v77_v13 }
  0x86   :  { %v67_v16 = vpop.f32.mrf.mxu0 }
  0x87   :  { %v68_v17 = vadd.f32 %v221_v15, %v67_v16 }
  0x89   :  { %v73_v18 = vmax.f32 %v68_v17, 0.0 }
  0x8b   :  { %205 = vmatmul.msk.f32.vlgmr.msra.gmra.mxu1 %vm85_vm1, %v73_v18 }
  0x8c   :  { %v70_v19 = vpop.f32.mrf.mxu3 }
  0x8d   :  { %v71_v20 = vadd.f32 %v221_v15, %v70_v19 }
  0x8f   :  { %v74_v21 = vmax.f32 %v71_v20, 0.0 }
  0x91   :  { %206 = vmatmul.msk.f32.vlgmr.msra.gmra.mxu2 %vm85_vm1, %v74_v21 }
 0x108   :  { %v109_v23 = vpop.f32.mrf.mxu1 }
 0x109   :  { %v115_v24 = vadd.f32 %v109_v23, %v75_v22 }
 0x10b   :  { %117 = vst.msk [vmem:[#allocation2] sm:$0xff] %vm30_vm0, %v115_v24 }
 0x112   :  { %v122_v27 = vld [vmem:[#allocation2] sm:$0xff] }
 0x113   :  { %v128_v28 = vadd.f32 %v222_v25, %v122_v27 }
 0x114   :  { %v112_v29 = vpop.f32.mrf.mxu2 }
 0x115   :  { %v116_v30 = vadd.f32 %v112_v29, %v76_v26  ;;  %v132_v31 = vadd.f32 %v128_v28, %v33_v6 }
 0x117   :  { %118 = vst.msk [vmem:[#allocation2 + $0x8] sm:$0xff] %vm30_vm0, %v116_v30  ;;  %v134_v32 = vsel %vm30_vm0, %v132_v31, 0.0 }
 0x118   :  { %135 = vadd.xlane.f32.xlu0 %v134_v32 }
 0x11e   :  { %v123_v33 = vld [vmem:[#allocation2 + $0x8] sm:$0xff] }
 0x11f   :  { %v129_v34 = vadd.f32 %v222_v25, %v123_v33 }
 0x121   :  { %v133_v35 = vadd.f32 %v129_v34, %v34_v7 }
 0x123   :  { %v137_v36 = vsel %vm30_vm0, %v133_v35, 0.0 }
 0x124   :  { %138 = vadd.xlane.f32.xlu0 %v137_v36 }
 0x18b   :  { %v136_v44 = vpop.xlane.xlu0 %135 }
 0x18c   :  { %v147_v45 = vmul.f32 %v146_v43, %v136_v44 }
 0x18e   :  { %v149_v46 = vsub.f32 %v132_v31, %v147_v45 }
 0x190   :  { %v151_v47 = vmul.f32 %v149_v46, %v149_v46 }
 0x192   :  { %v153_v48 = vsel %vm30_vm0, %v151_v47, 0.0 }
 0x193   :  { %154 = vadd.xlane.f32.xlu1 %v153_v48 }
 0x197   :  { %v139_v49 = vpop.xlane.xlu0 %138 }
 0x198   :  { %v148_v50 = vmul.f32 %v146_v43, %v139_v49 }
 0x19a   :  { %v150_v51 = vsub.f32 %v133_v35, %v148_v50 }
 0x19c   :  { %v152_v52 = vmul.f32 %v150_v51, %v150_v51 }
 0x19e   :  { %v156_v53 = vsel %vm30_vm0, %v152_v52, 0.0 }
 0x19f   :  { %157 = vadd.xlane.f32.xlu1 %v156_v53 }
 0x206   :  { %v155_v54 = vpop.xlane.xlu1 %154 }
 0x207   :  { %v159_v55 = vmul.f32 %v155_v54, %v146_v43 }
 0x209   :  { %v161_v56 = vadd.f32 1e-05, %v159_v55 }
 0x20b   :  { %227 = vrsqrt.f32 %v161_v56  ;;  %vm169_vm4 = vweird.f32 %v161_v56 }
 0x211   :  { %v228_v57 = vpop.eup %227 }
 0x212   :  { %v164_v58 = vmul.f32 %v228_v57, %v161_v56  ;;  %v158_v59 = vpop.xlane.xlu1 %157  ;;  %vm170_vm3 = vweird.f32 %v228_v57 }
 0x213   :  { %v160_v60 = vmul.f32 %v158_v59, %v146_v43  ;;  %vm171_vm5 = vmor %vm169_vm4, %vm170_vm3 }
 0x214   :  { %v165_v61 = vmul.f32 %v228_v57, %v164_v58 }
 0x215   :  { %v162_v62 = vadd.f32 1e-05, %v160_v60 }
 0x216   :  { %v166_v63 = vmul.f32 0.5, %v165_v61 }
 0x217   :  { %229 = vrsqrt.f32 %v162_v62  ;;  %vm179_vm7 = vweird.f32 %v162_v62 }
 0x218   :  { %v167_v0 = vsub.f32 1.5, %v166_v63 }
 0x21a   :  { %v168_v1 = vmul.f32 %v228_v57, %v167_v0 }
 0x21c   :  { %v172_v3 = vsel %vm171_vm5, %v228_v57, %v168_v1 }
 0x21d   :  { %v230_v4 = vpop.eup %229  ;;  %v183_v6 = vmul.f32 %v172_v3, %v149_v46 }
 0x21e   :  { %v174_v7 = vmul.f32 %v230_v4, %v162_v62  ;;  %vm180_vm6 = vweird.f32 %v230_v4 }
 0x21f   :  { %v189_v8 = vmul.f32 %v223_v2, %v183_v6  ;;  %vm181_vm8 = vmor %vm179_vm7, %vm180_vm6 }
 0x220   :  { %v175_v9 = vmul.f32 %v230_v4, %v174_v7 }
 0x221   :  { %v195_v10 = vadd.f32 %v224_v5, %v189_v8 }
 0x222   :  { %v176_v11 = vmul.f32 0.5, %v175_v9 }
 0x223   :  { %197 = vst.msk [vmem:[%s352_s7] sm:$0xff] %vm30_vm0, %v195_v10 }
 0x224   :  { %v177_v12 = vsub.f32 1.5, %v176_v11 }
 0x226   :  { %v178_v13 = vmul.f32 %v230_v4, %v177_v12 }
 0x228   :  { %v182_v14 = vsel %vm181_vm8, %v230_v4, %v178_v13 }
 0x229   :  { %v184_v15 = vmul.f32 %v182_v14, %v150_v51 }
 0x22b   :  { %v190_v16 = vmul.f32 %v223_v2, %v184_v15 }
 0x22d   :  { %v196_v17 = vadd.f32 %v224_v5, %v190_v16 }
 0x22f   :  { %198 = vst.msk [vmem:[%s352_s7 + $0x8] sm:$0xff] %vm30_vm0, %v196_v17 }

// kernel: transformer_forward.53
= control target key start
LH: loop header
LB: loop body
LE: loop exit
PB: predicated region body
PF: predicated region fallthrough
CT: control target
= control target key end

     0   :  { %vm19_vm0 = vcmask 490496   ;;  %v133_v2 = vmov 0.0   ;;  %s187_s0 = inlined_call_operand.vmem [shape: f32[16,32], index: 0, kind: input, shape index: {}]   ;;  %s188_s1 = inlined_call_operand.vmem [shape: f32[32,60], index: 1, kind: input, shape index: {}]   ;;  %s189_s2 = inlined_call_operand.vmem [shape: f32[1,60], index: 2, kind: input, shape index: {}]   ;;  %s190_s3 = inlined_call_operand.hbm [shape: f32[16,60], index: 3, kind: output, shape index: {}]  }
   0x1   :  { %v29_v0 = vld [vmem:[%s188_s1 + $0x18] sm:$0xff]  ;;  %v28_v1 = vld [vmem:[%s188_s1 + $0x10] sm:$0xff]  ;;  %20 = vst.msk [vmem:[#allocation2] sm:$0xff] %vm19_vm0, %v133_v2  ;;  %v27_v3 = vld [vmem:[%s188_s1 + $0x8] sm:$0xff] }
   0x2   :  { %49 = vmatpush.msra.mxu0 %v29_v0  ;;  %98 = vmatpush.msra.mxu1 %v29_v0  ;;  %21 = vst.msk [vmem:[#allocation2 + $0x8] sm:$0xff] %vm19_vm0, %v133_v2 }
   0x3   :  { %8 = vsyncpa [#allocation4], 0  ;;  %v26_v4 = vld [vmem:[%s188_s1] sm:$0xff]  ;;  %vm30_vm1 = vcmask 261120   ;;  %v25_v6 = vld [vmem:[%s187_s0 + $0x8] sm:$0xff]  ;;  %s134_s25 = smov [#allocation3]  }
   0x4   :  { %50 = vmatpush.msra.mxu0 %v28_v1  ;;  %99 = vmatpush.msra.mxu1 %v28_v1  ;;  %v24_v5 = vld [vmem:[%s187_s0] sm:$0xff]  ;;  %s82_s0 = sshll.u32 %s134_s25, 4  ;;  %s84_s28 = sshll.u32 %s190_s3, 4  ;;  %s83_s0 = int_to_ptr.vmem [resolvable:$true] %s82_s0  ;;  %s85_s28 = int_to_ptr.hbm [resolvable:$true] %s84_s28 }
   0x5   :  { %v106_v13 = vld [vmem:[%s189_s2] ss:$0 sm:$0xff]  ;;  %s135_s29 = smov 128   ;;  %s136_s30 = smov 8  }
   0x6   :  { %51 = vmatpush.msra.mxu0 %v27_v3  ;;  %100 = vmatpush.msra.mxu1 %v27_v3 }
   0x8   :  { %52 = vmatpush.msra.mxu0 %v26_v4  ;;  %101 = vmatpush.msra.mxu1 %v26_v4  ;;  %v22_v7 = vld [vmem:[#allocation2] sm:$0xff] }
   0x9   :  { %96 = vmatmul.msk.f32.vlgmr.msra.gmra.mxu0 %vm30_vm1, %v24_v5  ;;  %97 = vmatmul.msk.f32.vlgmr.msra.gmra.mxu1 %vm30_vm1, %v25_v6  ;;  %v23_v8 = vld [vmem:[#allocation2 + $0x8] sm:$0xff] }
  0x86   :  { %v54_v9 = vpop.f32.mrf.mxu0  ;;  %v57_v10 = vpop.f32.mrf.mxu1 }
  0x87   :  { %v60_v11 = vadd.f32 %v54_v9, %v22_v7  ;;  %v61_v12 = vadd.f32 %v57_v10, %v23_v8 }
  0x89   :  { %63 = vst.msk [vmem:[#allocation2] sm:$0xff] %vm19_vm0, %v60_v11 }
  0x8a   :  { %64 = vst.msk [vmem:[#allocation2 + $0x8] sm:$0xff] %vm19_vm0, %v61_v12 }
  0x90   :  { %v68_v14 = vld [vmem:[#allocation2] sm:$0xff] }
  0x91   :  { %v69_v15 = vld [vmem:[#allocation2 + $0x8] sm:$0xff]  ;;  %v74_v16 = vadd.f32 %v106_v13, %v68_v14 }
  0x92   :  { %v75_v17 = vadd.f32 %v106_v13, %v69_v15 }
  0x93   :  { %76 = vst.msk [vmem:[#allocation3] sm:$0xff] %vm19_vm0, %v74_v16 }
  0x94   :  { %77 = vst.msk [vmem:[#allocation3 + $0x8] sm:$0xff] %vm19_vm0, %v75_v17 }
  0x95   :  { %90 = dma.vmem_to_hbm [thread:$0]  %s83_s0, 256, %s85_s28, [#allocation4], %s135_s29, %s135_s29, %s136_s30  }
  0x96   :  { %131 = dma.done.wait [#allocation4], 256  }
  0x97   :  { %132 = vsyncadd [#allocation4], 4294967040 }
  0x98   :  { %95 = vsyncpa [#allocation4], 1 }

</bundles_post_ra>
